<compile_context>
chip_gen: v5e
topology: v5e:2x2
jax: 0.10.0
libtpu: 0.0.40
codegen_flags: <defaults>
</compile_context>

<pallas_src>
import jax
import jax.numpy as jnp
from jax.experimental import pallas as pl
from jax.experimental.pallas import tpu as pltpu


# ---------------------------------------------------------------------------
# Fused kernel: conv1+BN+ReLU+pool -> conv2+BN+ReLU+pool -> fc1+ReLU -> fc2
# One grid step processes a block of TB samples end-to-end.
# ---------------------------------------------------------------------------
def _fused_cnn_kernel(x_ref, w1_ref, s1_ref, t1_ref, w2_ref, s2_ref, t2_ref,
                      fw1_ref, fb1_ref, fw2_ref, fb2_ref, o_ref,
                      z1_ref, y1p_ref, z2_ref, p2_ref):
    K = 3
    TB, H, W, KCin = x_ref.shape
    C1 = z1_ref.shape[-1]
    _, Ho1, Wo1, C2 = z2_ref.shape
    _, Ho2, Wo2, _ = p2_ref.shape

    # ---- conv1: im2col done in wrapper -> ONE [TB*H*W, 9*Cin] x [9*Cin, C1]
    # bf16 MXU matmul with f32 accumulation, then folded BN + ReLU -------------
    lhs1 = x_ref[...].reshape(TB * H * W, KCin)
    acc1 = jnp.dot(lhs1, w1_ref[...], preferred_element_type=jnp.float32)
    y1 = jnp.maximum(acc1 * s1_ref[...] + t1_ref[...], 0.0)
    z1_ref[...] = y1.reshape(TB, H, W, C1)

    # ---- 2x2 maxpool #1: four strided ref reads + pairwise max ---------------
    p1 = jnp.maximum(
        jnp.maximum(z1_ref[:, pl.ds(0, Ho1, stride=2), pl.ds(0, Wo1, stride=2), :],
                    z1_ref[:, pl.ds(0, Ho1, stride=2), pl.ds(1, Wo1, stride=2), :]),
        jnp.maximum(z1_ref[:, pl.ds(1, Ho1, stride=2), pl.ds(0, Wo1, stride=2), :],
                    z1_ref[:, pl.ds(1, Ho1, stride=2), pl.ds(1, Wo1, stride=2), :]))

    # ---- zero only the 1-wide border (every step; scratch is per-core, so a
    # program_id==0 gate would miss the second TensorCore under megacore) ------
    y1p_ref[:, pl.ds(0, 1), :, :] = jnp.zeros((TB, 1, Wo1 + 2, C1), jnp.float32)
    y1p_ref[:, pl.ds(Ho1 + 1, 1), :, :] = jnp.zeros((TB, 1, Wo1 + 2, C1), jnp.float32)
    y1p_ref[:, :, pl.ds(0, 1), :] = jnp.zeros((TB, Ho1 + 2, 1, C1), jnp.float32)
    y1p_ref[:, :, pl.ds(Wo1 + 1, 1), :] = jnp.zeros((TB, Ho1 + 2, 1, C1), jnp.float32)
    y1p_ref[:, pl.ds(1, Ho1), pl.ds(1, Wo1), :] = p1

    # ---- conv2: stack 9 taps along K -> ONE [TB*Ho1*Wo1, 9*C1] x [9*C1, C2] ---
    taps = [y1p_ref[:, pl.ds(di, Ho1), pl.ds(dj, Wo1), :]
            for di in range(K) for dj in range(K)]                # 9 x [TB,Ho1,Wo1,C1]
    patches = jnp.concatenate(taps, axis=-1)                      # [TB,Ho1,Wo1,9*C1]
    lhs2 = patches.reshape(TB * Ho1 * Wo1, K * K * C1).astype(jnp.bfloat16)
    acc2 = jnp.dot(lhs2, w2_ref[...], preferred_element_type=jnp.float32)
    y2 = jnp.maximum(acc2 * s2_ref[...] + t2_ref[...], 0.0)
    z2_ref[...] = y2.reshape(TB, Ho1, Wo1, C2)

    # ---- 2x2 maxpool #2 -------------------------------------------------------
    p2_ref[...] = jnp.maximum(
        jnp.maximum(z2_ref[:, pl.ds(0, Ho2, stride=2), pl.ds(0, Wo2, stride=2), :],
                    z2_ref[:, pl.ds(0, Ho2, stride=2), pl.ds(1, Wo2, stride=2), :]),
        jnp.maximum(z2_ref[:, pl.ds(1, Ho2, stride=2), pl.ds(0, Wo2, stride=2), :],
                    z2_ref[:, pl.ds(1, Ho2, stride=2), pl.ds(1, Wo2, stride=2), :]))

    # ---- fc1 (+ReLU): ONE lane-dense [TB, Ho2*Wo2*C2] x [Ho2*Wo2*C2, U] matmul
    # (fw1 rows were pre-permuted to this NHWC flatten order at trace time) -----
    rows = [p2_ref[:, i, j, :] for i in range(Ho2) for j in range(Wo2)]  # 16 x [TB,C2]
    flat = jnp.concatenate(rows, axis=-1).astype(jnp.bfloat16)          # [TB, S*C2]
    h = jnp.dot(flat, fw1_ref[...], preferred_element_type=jnp.float32)
    h = jnp.maximum(h + fb1_ref[...], 0.0)
    # TODO(synk): Dropout is identity in eval mode (no RNG mask applied).

    # ---- fc2 (U -> 1): lane reduction; one small [TB, 1] store per block ------
    o_ref[...] = jnp.sum(h * fw2_ref[...], axis=-1, keepdims=True) + fb2_ref[...]


# ---------------------------------------------------------------------------
# Wrapper: trace-time parameter folding/permutation + single pallas_call
# ---------------------------------------------------------------------------
def _fold_bn(conv_bias, gamma, beta, run_mean, run_var, eps=1e-5):
    scale = gamma / jnp.sqrt(run_var + eps)
    shift = beta + (conv_bias - run_mean) * scale
    return (scale.reshape(1, -1).astype(jnp.float32),
            shift.reshape(1, -1).astype(jnp.float32))


def _fc1_rows_to_nhwc(fw1, c2, h, w):
    """Permute fc1 weight rows from PyTorch NCHW-flatten (c,h,w) order to the
    kernel-native NHWC-flatten (h,w,c) order. Zero cost, done at trace time."""
    u = fw1.shape[1]
    return fw1.reshape(c2, h, w, u).transpose(1, 2, 0, 3).reshape(h * w * c2, u)


def _im2col_3x3(x_nhwc):
    """Stack the 9 shifted 'same'-padded views along the channel axis so conv1
    becomes one K=9*Cin matmul. Rows are in (kh, kw, cin) order."""
    B, H, W, _ = x_nhwc.shape
    xp = jnp.pad(x_nhwc, ((0, 0), (1, 1), (1, 1), (0, 0)))
    cols = [xp[:, di:di + H, dj:dj + W, :] for di in range(3) for dj in range(3)]
    return jnp.concatenate(cols, axis=-1)                       # [B, H, W, 9*Cin]


@jax.jit
def advanced_cnn_regressor_forward(x_nchw, params):
    """Eval-mode forward. x_nchw: [B, Cin, H, W] float32 -> [B, 1] float32."""
    B, Cin, H, W = x_nchw.shape
    C1 = params["w1"].shape[1]
    C2 = params["w2"].shape[1]
    U = params["fw1"].shape[1]
    assert H % 4 == 0 and W % 4 == 0, "two 2x2 maxpools require H, W % 4 == 0"
    Ho1, Wo1 = H // 2, W // 2
    Ho2, Wo2 = Ho1 // 2, Wo1 // 2
    assert params["fw1"].shape[0] == C2 * Ho2 * Wo2
    assert params["fw2"].shape[1] == 1

    # Batch block per grid step (>=2 steps for large B keeps both v7x cores fed;
    # B is zero-padded up to a multiple of TB and the tail sliced off below).
    TB = min(B, 8)
    NB = pl.cdiv(B, TB)
    B_pad = NB * TB

    x = jnp.transpose(x_nchw, (0, 2, 3, 1))                     # NCHW -> NHWC
    xcol = _im2col_3x3(x).astype(jnp.bfloat16)                  # [B, H, W, 9*Cin]
    if B_pad != B:
        xcol = jnp.pad(xcol, ((0, B_pad - B), (0, 0), (0, 0), (0, 0)))

    s1, t1 = _fold_bn(params["b1"], params["g1"], params["be1"],
                      params["rm1"], params["rv1"])
    s2, t2 = _fold_bn(params["b2"], params["g2"], params["be2"],
                      params["rm2"], params["rv2"])
    w1 = params["w1"].astype(jnp.bfloat16)
    w2 = params["w2"].astype(jnp.bfloat16)
    fw1 = _fc1_rows_to_nhwc(params["fw1"], C2, Ho2, Wo2).astype(jnp.bfloat16)
    fb1 = params["fb1"].reshape(1, U).astype(jnp.float32)
    fw2 = params["fw2"].reshape(1, U).astype(jnp.float32)       # [U,1] -> [1,U]
    fb2 = params["fb2"].reshape(1, 1).astype(jnp.float32)

    def _full(a):
        nd = a.ndim
        return pl.BlockSpec(a.shape, lambda nb, _nd=nd: (0,) * _nd)

    out = pl.pallas_call(
        _fused_cnn_kernel,
        out_shape=jax.ShapeDtypeStruct((B_pad, 1), jnp.float32),
        grid=(NB,),
        in_specs=[
            pl.BlockSpec((TB, H, W, 9 * Cin), lambda nb: (nb, 0, 0, 0)),
            _full(w1), _full(s1), _full(t1),
            _full(w2), _full(s2), _full(t2),
            _full(fw1), _full(fb1), _full(fw2), _full(fb2),
        ],
        out_specs=pl.BlockSpec((TB, 1), lambda nb: (nb, 0)),
        scratch_shapes=[
            pltpu.VMEM((TB, H, W, C1), jnp.float32),              # conv1 activations
            pltpu.VMEM((TB, Ho1 + 2, Wo1 + 2, C1), jnp.float32),  # padded pooled map
            pltpu.VMEM((TB, Ho1, Wo1, C2), jnp.float32),          # conv2 activations
            pltpu.VMEM((TB, Ho2, Wo2, C2), jnp.float32),          # pooled conv2 map
        ],
        compiler_params=pltpu.CompilerParams(
            dimension_semantics=("parallel",)),
    )(xcol, w1, s1, t1, w2, s2, t2, fw1, fb1, fw2, fb2)
    return out[:B]


# ---------------------------------------------------------------------------
# Pure-JAX reference (numerical self-check) and deterministic parameters
# ---------------------------------------------------------------------------
def _reference_forward(x_nchw, params):
    def conv_bn_relu_pool(x, w, bias, gamma, beta, rm, rv):
        B, H, W, _ = x.shape
        xp = jnp.pad(x, ((0, 0), (1, 1), (1, 1), (0, 0)))
        cols = []
        for di in range(3):
            for dj in range(3):
                cols.append(xp[:, di:di + H, dj:dj + W, :])
        patches = jnp.concatenate(cols, axis=-1)               # [B,H,W,9*Cin]
        y = (patches.reshape(B * H * W, -1) @ w).reshape(B, H, W, w.shape[1])
        scale = gamma / jnp.sqrt(rv + 1e-5)
        y = (y + bias - rm) * scale + beta
        y = jnp.maximum(y, 0.0)
        return y.reshape(B, H // 2, 2, W // 2, 2, -1).max(axis=(2, 4))

    x = jnp.transpose(x_nchw, (0, 2, 3, 1))
    y1 = conv_bn_relu_pool(x, params["w1"], params["b1"], params["g1"],
                           params["be1"], params["rm1"], params["rv1"])
    y2 = conv_bn_relu_pool(y1, params["w2"], params["b2"], params["g2"],
                           params["be2"], params["rm2"], params["rv2"])
    B = x.shape[0]
    flat = jnp.transpose(y2, (0, 3, 1, 2)).reshape(B, -1)       # NCHW flatten
    h = jnp.maximum(flat @ params["fw1"] + params["fb1"], 0.0)
    return h @ params["fw2"] + params["fb2"]


def make_params(key, cin=4, conv_filters=(32, 64), k=3, fc_units=128, out=1,
                hw_after_convs=4):
    ks = jax.random.split(key, 12)
    c1, c2 = conv_filters
    params = {
        # conv weights stored as [k*k*Cin, Cout], rows in (kh, kw, cin) order
        "w1": 0.1 * jax.random.normal(ks[0], (k * k * cin, c1), jnp.float32),
        "b1": 0.05 * jax.random.normal(ks[1], (c1,), jnp.float32),
        "g1": 1.0 + 0.1 * jax.random.normal(ks[2], (c1,), jnp.float32),
        "be1": 0.05 * jax.random.normal(ks[3], (c1,), jnp.float32),
        "rm1": jnp.zeros((c1,), jnp.float32),
        "rv1": jnp.ones((c1,), jnp.float32),

        "w2": 0.05 * jax.random.normal(ks[4], (k * k * c1, c2), jnp.float32),
        "b2": 0.05 * jax.random.normal(ks[5], (c2,), jnp.float32),
        "g2": 1.0 + 0.1 * jax.random.normal(ks[6], (c2,), jnp.float32),
        "be2": 0.05 * jax.random.normal(ks[7], (c2,), jnp.float32),
        "rm2": jnp.zeros((c2,), jnp.float32),
        "rv2": jnp.ones((c2,), jnp.float32),
    }
    flat_dim = c2 * hw_after_convs * hw_after_convs
    params.update({
        "fw1": 0.02 * jax.random.normal(ks[8], (flat_dim, fc_units), jnp.float32),
        "fb1": 0.02 * jax.random.normal(ks[9], (fc_units,), jnp.float32),
        "fw2": 0.1 * jax.random.normal(ks[10], (fc_units, out), jnp.float32),
        "fb2": 0.1 * jax.random.normal(ks[11], (out,), jnp.float32),
    })
    return params


if __name__ == "__main__":
    key = jax.random.PRNGKey(0)
    kx, kp = jax.random.split(key)

    # small shapes: batch=2, channels=4, spatial=16x16 (NCHW like PyTorch)
    x = jax.random.normal(kx, (2, 4, 16, 16), jnp.float32)
    params = make_params(kp, cin=4)

    out = advanced_cnn_regressor_forward(x, params)
    out = jax.block_until_ready(out)
    assert out.shape == (2, 1), out.shape

    ref = _reference_forward(x, params)
    # bf16 MXU inputs (f32 accumulation) -> slightly wider tolerance than pure f32
    assert jnp.allclose(out, ref, rtol=5e-2, atol=5e-2), (out, ref)

    print("KERNEL_OK")
</pallas_src>

<mosaic_0001>
module attributes {stable_mosaic.version = 11 : i64} {
  func.func @_fused_cnn_kernel(%arg0: i32, %arg1: memref<2x16x16x36xbf16, #tpu.memory_space<vmem>>, %arg2: memref<36x32xbf16, #tpu.memory_space<vmem>>, %arg3: memref<1x32xf32, #tpu.memory_space<vmem>>, %arg4: memref<1x32xf32, #tpu.memory_space<vmem>>, %arg5: memref<288x64xbf16, #tpu.memory_space<vmem>>, %arg6: memref<1x64xf32, #tpu.memory_space<vmem>>, %arg7: memref<1x64xf32, #tpu.memory_space<vmem>>, %arg8: memref<1024x128xbf16, #tpu.memory_space<vmem>>, %arg9: memref<1x128xf32, #tpu.memory_space<vmem>>, %arg10: memref<1x128xf32, #tpu.memory_space<vmem>>, %arg11: memref<1x1xf32, #tpu.memory_space<vmem>>, %arg12: memref<2x1xf32, #tpu.memory_space<vmem>>, %arg13: memref<2x16x16x32xf32, #tpu.memory_space<vmem>>, %arg14: memref<2x10x10x32xf32, #tpu.memory_space<vmem>>, %arg15: memref<2x8x8x64xf32, #tpu.memory_space<vmem>>, %arg16: memref<2x4x4x64xf32, #tpu.memory_space<vmem>>) attributes {dimension_semantics = [#tpu.dimension_semantics<parallel>], iteration_bounds = array<i64: 1>, scalar_prefetch = 0 : i64, scratch_operands = 4 : i64, tpu.core_type = #tpu.core_type<tc>, window_params = [{transform_indices = @transform_0, window_bounds = array<i64: 2, 16, 16, 36>}, {pipeline_mode = #tpu.pipeline_mode<synchronous>, transform_indices = @transform_1, window_bounds = array<i64: 36, 32>}, {pipeline_mode = #tpu.pipeline_mode<synchronous>, transform_indices = @transform_2, window_bounds = array<i64: 1, 32>}, {pipeline_mode = #tpu.pipeline_mode<synchronous>, transform_indices = @transform_3, window_bounds = array<i64: 1, 32>}, {pipeline_mode = #tpu.pipeline_mode<synchronous>, transform_indices = @transform_4, window_bounds = array<i64: 288, 64>}, {pipeline_mode = #tpu.pipeline_mode<synchronous>, transform_indices = @transform_5, window_bounds = array<i64: 1, 64>}, {pipeline_mode = #tpu.pipeline_mode<synchronous>, transform_indices = @transform_6, window_bounds = array<i64: 1, 64>}, {pipeline_mode = #tpu.pipeline_mode<synchronous>, transform_indices = @transform_7, window_bounds = array<i64: 1024, 128>}, {pipeline_mode = #tpu.pipeline_mode<synchronous>, transform_indices = @transform_8, window_bounds = array<i64: 1, 128>}, {pipeline_mode = #tpu.pipeline_mode<synchronous>, transform_indices = @transform_9, window_bounds = array<i64: 1, 128>}, {pipeline_mode = #tpu.pipeline_mode<synchronous>, transform_indices = @transform_10, window_bounds = array<i64: 1, 1>}, {transform_indices = @transform_11, window_bounds = array<i64: 2, 1>}]} {
    %c0 = arith.constant 0 : index
    %c0_0 = arith.constant 0 : index
    %c0_1 = arith.constant 0 : index
    %c0_2 = arith.constant 0 : index
    %0 = vector.load %arg1[%c0, %c0_0, %c0_1, %c0_2] : memref<2x16x16x36xbf16, #tpu.memory_space<vmem>>, vector<2x16x16x36xbf16>
    %1 = vector.shape_cast %0 : vector<2x16x16x36xbf16> to vector<512x36xbf16>
    %c0_3 = arith.constant 0 : index
    %c0_4 = arith.constant 0 : index
    %2 = vector.load %arg2[%c0_3, %c0_4] : memref<36x32xbf16, #tpu.memory_space<vmem>>, vector<36x32xbf16>
    %cst = arith.constant dense<0.000000e+00> : vector<512x32xf32>
    %3 = tpu.matmul %1, %2, %cst {dimension_numbers = #tpu.dot_dimension_numbers<[1], [0], [0], [1], [0, 0, 1, 1], [], []>} : vector<512x36xbf16>, vector<36x32xbf16>, vector<512x32xf32> -> vector<512x32xf32>
    %c0_5 = arith.constant 0 : index
    %c0_6 = arith.constant 0 : index
    %4 = vector.load %arg3[%c0_5, %c0_6] : memref<1x32xf32, #tpu.memory_space<vmem>>, vector<1x32xf32>
    %5 = vector.broadcast %4 : vector<1x32xf32> to vector<512x32xf32>
    %6 = arith.mulf %3, %5 : vector<512x32xf32>
    %c0_7 = arith.constant 0 : index
    %c0_8 = arith.constant 0 : index
    %7 = vector.load %arg4[%c0_7, %c0_8] : memref<1x32xf32, #tpu.memory_space<vmem>>, vector<1x32xf32>
    %8 = vector.broadcast %7 : vector<1x32xf32> to vector<512x32xf32>
    %9 = arith.addf %6, %8 : vector<512x32xf32>
    %cst_9 = arith.constant 0.000000e+00 : f32
    %10 = vector.broadcast %cst_9 : f32 to vector<512x32xf32>
    %11 = arith.maximumf %9, %10 : vector<512x32xf32>
    %12 = vector.shape_cast %11 : vector<512x32xf32> to vector<2x16x16x32xf32>
    %c0_10 = arith.constant 0 : index
    %c0_11 = arith.constant 0 : index
    %c0_12 = arith.constant 0 : index
    %c0_13 = arith.constant 0 : index
    %13 = vector.load %arg13[%c0_10, %c0_11, %c0_12, %c0_13] : memref<2x16x16x32xf32, #tpu.memory_space<vmem>>, vector<2x16x16x32xf32>
    tpu.vector_store %arg13[%c0_10, %c0_11, %c0_12, %c0_13], %12 {strides = array<i32>} : memref<2x16x16x32xf32, #tpu.memory_space<vmem>>, vector<2x16x16x32xf32>,
    %c0_14 = arith.constant 0 : index
    %c0_15 = arith.constant 0 : index
    %c0_16 = arith.constant 0 : index
    %c0_17 = arith.constant 0 : index
    %14 = tpu.strided_load %arg13[%c0_14, %c0_15, %c0_16, %c0_17] {strides = array<i32: 1, 2, 2, 1>} : memref<2x16x16x32xf32, #tpu.memory_space<vmem>>, vector<2x8x8x32xf32>
    %c0_18 = arith.constant 0 : index
    %c0_19 = arith.constant 0 : index
    %c1 = arith.constant 1 : index
    %c0_20 = arith.constant 0 : index
    %15 = tpu.strided_load %arg13[%c0_18, %c0_19, %c1, %c0_20] {strides = array<i32: 1, 2, 2, 1>} : memref<2x16x16x32xf32, #tpu.memory_space<vmem>>, vector<2x8x8x32xf32>
    %16 = arith.maximumf %14, %15 : vector<2x8x8x32xf32>
    %c0_21 = arith.constant 0 : index
    %c1_22 = arith.constant 1 : index
    %c0_23 = arith.constant 0 : index
    %c0_24 = arith.constant 0 : index
    %17 = tpu.strided_load %arg13[%c0_21, %c1_22, %c0_23, %c0_24] {strides = array<i32: 1, 2, 2, 1>} : memref<2x16x16x32xf32, #tpu.memory_space<vmem>>, vector<2x8x8x32xf32>
    %c0_25 = arith.constant 0 : index
    %c1_26 = arith.constant 1 : index
    %c1_27 = arith.constant 1 : index
    %c0_28 = arith.constant 0 : index
    %18 = tpu.strided_load %arg13[%c0_25, %c1_26, %c1_27, %c0_28] {strides = array<i32: 1, 2, 2, 1>} : memref<2x16x16x32xf32, #tpu.memory_space<vmem>>, vector<2x8x8x32xf32>
    %19 = arith.maximumf %17, %18 : vector<2x8x8x32xf32>
    %20 = arith.maximumf %16, %19 : vector<2x8x8x32xf32>
    %cst_29 = arith.constant 0.000000e+00 : f32
    %21 = vector.broadcast %cst_29 : f32 to vector<2x1x10x32xf32>
    %c0_30 = arith.constant 0 : index
    %c0_31 = arith.constant 0 : index
    %c0_32 = arith.constant 0 : index
    %c0_33 = arith.constant 0 : index
    %22 = vector.load %arg14[%c0_30, %c0_31, %c0_32, %c0_33] : memref<2x10x10x32xf32, #tpu.memory_space<vmem>>, vector<2x1x10x32xf32>
    tpu.vector_store %arg14[%c0_30, %c0_31, %c0_32, %c0_33], %21 {strides = array<i32>} : memref<2x10x10x32xf32, #tpu.memory_space<vmem>>, vector<2x1x10x32xf32>,
    %cst_34 = arith.constant 0.000000e+00 : f32
    %23 = vector.broadcast %cst_34 : f32 to vector<2x1x10x32xf32>
    %c0_35 = arith.constant 0 : index
    %c9 = arith.constant 9 : index
    %c0_36 = arith.constant 0 : index
    %c0_37 = arith.constant 0 : index
    %24 = vector.load %arg14[%c0_35, %c9, %c0_36, %c0_37] : memref<2x10x10x32xf32, #tpu.memory_space<vmem>>, vector<2x1x10x32xf32>
    tpu.vector_store %arg14[%c0_35, %c9, %c0_36, %c0_37], %23 {strides = array<i32>} : memref<2x10x10x32xf32, #tpu.memory_space<vmem>>, vector<2x1x10x32xf32>,
    %cst_38 = arith.constant 0.000000e+00 : f32
    %25 = vector.broadcast %cst_38 : f32 to vector<2x10x1x32xf32>
    %c0_39 = arith.constant 0 : index
    %c0_40 = arith.constant 0 : index
    %c0_41 = arith.constant 0 : index
    %c0_42 = arith.constant 0 : index
    %26 = vector.load %arg14[%c0_39, %c0_40, %c0_41, %c0_42] : memref<2x10x10x32xf32, #tpu.memory_space<vmem>>, vector<2x10x1x32xf32>
    tpu.vector_store %arg14[%c0_39, %c0_40, %c0_41, %c0_42], %25 {strides = array<i32>} : memref<2x10x10x32xf32, #tpu.memory_space<vmem>>, vector<2x10x1x32xf32>,
    %cst_43 = arith.constant 0.000000e+00 : f32
    %27 = vector.broadcast %cst_43 : f32 to vector<2x10x1x32xf32>
    %c0_44 = arith.constant 0 : index
    %c0_45 = arith.constant 0 : index
    %c9_46 = arith.constant 9 : index
    %c0_47 = arith.constant 0 : index
    %28 = vector.load %arg14[%c0_44, %c0_45, %c9_46, %c0_47] : memref<2x10x10x32xf32, #tpu.memory_space<vmem>>, vector<2x10x1x32xf32>
    tpu.vector_store %arg14[%c0_44, %c0_45, %c9_46, %c0_47], %27 {strides = array<i32>} : memref<2x10x10x32xf32, #tpu.memory_space<vmem>>, vector<2x10x1x32xf32>,
    %c0_48 = arith.constant 0 : index
    %c1_49 = arith.constant 1 : index
    %c1_50 = arith.constant 1 : index
    %c0_51 = arith.constant 0 : index
    %29 = vector.load %arg14[%c0_48, %c1_49, %c1_50, %c0_51] : memref<2x10x10x32xf32, #tpu.memory_space<vmem>>, vector<2x8x8x32xf32>
    tpu.vector_store %arg14[%c0_48, %c1_49, %c1_50, %c0_51], %20 {strides = array<i32>} : memref<2x10x10x32xf32, #tpu.memory_space<vmem>>, vector<2x8x8x32xf32>,
    %c0_52 = arith.constant 0 : index
    %c0_53 = arith.constant 0 : index
    %c0_54 = arith.constant 0 : index
    %c0_55 = arith.constant 0 : index
    %30 = vector.load %arg14[%c0_52, %c0_53, %c0_54, %c0_55] : memref<2x10x10x32xf32, #tpu.memory_space<vmem>>, vector<2x8x8x32xf32>
    %c0_56 = arith.constant 0 : index
    %c0_57 = arith.constant 0 : index
    %c1_58 = arith.constant 1 : index
    %c0_59 = arith.constant 0 : index
    %31 = vector.load %arg14[%c0_56, %c0_57, %c1_58, %c0_59] : memref<2x10x10x32xf32, #tpu.memory_space<vmem>>, vector<2x8x8x32xf32>
    %c0_60 = arith.constant 0 : index
    %c0_61 = arith.constant 0 : index
    %c2 = arith.constant 2 : index
    %c0_62 = arith.constant 0 : index
    %32 = vector.load %arg14[%c0_60, %c0_61, %c2, %c0_62] : memref<2x10x10x32xf32, #tpu.memory_space<vmem>>, vector<2x8x8x32xf32>
    %c0_63 = arith.constant 0 : index
    %c1_64 = arith.constant 1 : index
    %c0_65 = arith.constant 0 : index
    %c0_66 = arith.constant 0 : index
    %33 = vector.load %arg14[%c0_63, %c1_64, %c0_65, %c0_66] : memref<2x10x10x32xf32, #tpu.memory_space<vmem>>, vector<2x8x8x32xf32>
    %c0_67 = arith.constant 0 : index
    %c1_68 = arith.constant 1 : index
    %c1_69 = arith.constant 1 : index
    %c0_70 = arith.constant 0 : index
    %34 = vector.load %arg14[%c0_67, %c1_68, %c1_69, %c0_70] : memref<2x10x10x32xf32, #tpu.memory_space<vmem>>, vector<2x8x8x32xf32>
    %c0_71 = arith.constant 0 : index
    %c1_72 = arith.constant 1 : index
    %c2_73 = arith.constant 2 : index
    %c0_74 = arith.constant 0 : index
    %35 = vector.load %arg14[%c0_71, %c1_72, %c2_73, %c0_74] : memref<2x10x10x32xf32, #tpu.memory_space<vmem>>, vector<2x8x8x32xf32>
    %c0_75 = arith.constant 0 : index
    %c2_76 = arith.constant 2 : index
    %c0_77 = arith.constant 0 : index
    %c0_78 = arith.constant 0 : index
    %36 = vector.load %arg14[%c0_75, %c2_76, %c0_77, %c0_78] : memref<2x10x10x32xf32, #tpu.memory_space<vmem>>, vector<2x8x8x32xf32>
    %c0_79 = arith.constant 0 : index
    %c2_80 = arith.constant 2 : index
    %c1_81 = arith.constant 1 : index
    %c0_82 = arith.constant 0 : index
    %37 = vector.load %arg14[%c0_79, %c2_80, %c1_81, %c0_82] : memref<2x10x10x32xf32, #tpu.memory_space<vmem>>, vector<2x8x8x32xf32>
    %c0_83 = arith.constant 0 : index
    %c2_84 = arith.constant 2 : index
    %c2_85 = arith.constant 2 : index
    %c0_86 = arith.constant 0 : index
    %38 = vector.load %arg14[%c0_83, %c2_84, %c2_85, %c0_86] : memref<2x10x10x32xf32, #tpu.memory_space<vmem>>, vector<2x8x8x32xf32>
    %39 = tpu.concatenate %30, %31, %32, %33, %34, %35, %36, %37, %38 in 3 : vector<2x8x8x32xf32>, vector<2x8x8x32xf32>, vector<2x8x8x32xf32>, vector<2x8x8x32xf32>, vector<2x8x8x32xf32>, vector<2x8x8x32xf32>, vector<2x8x8x32xf32>, vector<2x8x8x32xf32>, vector<2x8x8x32xf32> -> vector<2x8x8x288xf32>
    %40 = vector.shape_cast %39 : vector<2x8x8x288xf32> to vector<128x288xf32>
    %41 = arith.truncf %40 : vector<128x288xf32> to vector<128x288xbf16>
    %c0_87 = arith.constant 0 : index
    %c0_88 = arith.constant 0 : index
    %42 = vector.load %arg5[%c0_87, %c0_88] : memref<288x64xbf16, #tpu.memory_space<vmem>>, vector<288x64xbf16>
    %cst_89 = arith.constant dense<0.000000e+00> : vector<128x64xf32>
    %43 = tpu.matmul %41, %42, %cst_89 {dimension_numbers = #tpu.dot_dimension_numbers<[1], [0], [0], [1], [0, 0, 1, 1], [], []>} : vector<128x288xbf16>, vector<288x64xbf16>, vector<128x64xf32> -> vector<128x64xf32>
    %c0_90 = arith.constant 0 : index
    %c0_91 = arith.constant 0 : index
    %44 = vector.load %arg6[%c0_90, %c0_91] : memref<1x64xf32, #tpu.memory_space<vmem>>, vector<1x64xf32>
    %45 = vector.broadcast %44 : vector<1x64xf32> to vector<128x64xf32>
    %46 = arith.mulf %43, %45 : vector<128x64xf32>
    %c0_92 = arith.constant 0 : index
    %c0_93 = arith.constant 0 : index
    %47 = vector.load %arg7[%c0_92, %c0_93] : memref<1x64xf32, #tpu.memory_space<vmem>>, vector<1x64xf32>
    %48 = vector.broadcast %47 : vector<1x64xf32> to vector<128x64xf32>
    %49 = arith.addf %46, %48 : vector<128x64xf32>
    %cst_94 = arith.constant 0.000000e+00 : f32
    %50 = vector.broadcast %cst_94 : f32 to vector<128x64xf32>
    %51 = arith.maximumf %49, %50 : vector<128x64xf32>
    %52 = vector.shape_cast %51 : vector<128x64xf32> to vector<2x8x8x64xf32>
    %c0_95 = arith.constant 0 : index
    %c0_96 = arith.constant 0 : index
    %c0_97 = arith.constant 0 : index
    %c0_98 = arith.constant 0 : index
    %53 = vector.load %arg15[%c0_95, %c0_96, %c0_97, %c0_98] : memref<2x8x8x64xf32, #tpu.memory_space<vmem>>, vector<2x8x8x64xf32>
    tpu.vector_store %arg15[%c0_95, %c0_96, %c0_97, %c0_98], %52 {strides = array<i32>} : memref<2x8x8x64xf32, #tpu.memory_space<vmem>>, vector<2x8x8x64xf32>,
    %c0_99 = arith.constant 0 : index
    %c0_100 = arith.constant 0 : index
    %c0_101 = arith.constant 0 : index
    %c0_102 = arith.constant 0 : index
    %54 = tpu.strided_load %arg15[%c0_99, %c0_100, %c0_101, %c0_102] {strides = array<i32: 1, 2, 2, 1>} : memref<2x8x8x64xf32, #tpu.memory_space<vmem>>, vector<2x4x4x64xf32>
    %c0_103 = arith.constant 0 : index
    %c0_104 = arith.constant 0 : index
    %c1_105 = arith.constant 1 : index
    %c0_106 = arith.constant 0 : index
    %55 = tpu.strided_load %arg15[%c0_103, %c0_104, %c1_105, %c0_106] {strides = array<i32: 1, 2, 2, 1>} : memref<2x8x8x64xf32, #tpu.memory_space<vmem>>, vector<2x4x4x64xf32>
    %56 = arith.maximumf %54, %55 : vector<2x4x4x64xf32>
    %c0_107 = arith.constant 0 : index
    %c1_108 = arith.constant 1 : index
    %c0_109 = arith.constant 0 : index
    %c0_110 = arith.constant 0 : index
    %57 = tpu.strided_load %arg15[%c0_107, %c1_108, %c0_109, %c0_110] {strides = array<i32: 1, 2, 2, 1>} : memref<2x8x8x64xf32, #tpu.memory_space<vmem>>, vector<2x4x4x64xf32>
    %c0_111 = arith.constant 0 : index
    %c1_112 = arith.constant 1 : index
    %c1_113 = arith.constant 1 : index
    %c0_114 = arith.constant 0 : index
    %58 = tpu.strided_load %arg15[%c0_111, %c1_112, %c1_113, %c0_114] {strides = array<i32: 1, 2, 2, 1>} : memref<2x8x8x64xf32, #tpu.memory_space<vmem>>, vector<2x4x4x64xf32>
    %59 = arith.maximumf %57, %58 : vector<2x4x4x64xf32>
    %60 = arith.maximumf %56, %59 : vector<2x4x4x64xf32>
    %c0_115 = arith.constant 0 : index
    %c0_116 = arith.constant 0 : index
    %c0_117 = arith.constant 0 : index
    %c0_118 = arith.constant 0 : index
    %61 = vector.load %arg16[%c0_115, %c0_116, %c0_117, %c0_118] : memref<2x4x4x64xf32, #tpu.memory_space<vmem>>, vector<2x4x4x64xf32>
    tpu.vector_store %arg16[%c0_115, %c0_116, %c0_117, %c0_118], %60 {strides = array<i32>} : memref<2x4x4x64xf32, #tpu.memory_space<vmem>>, vector<2x4x4x64xf32>,
    %c0_119 = arith.constant 0 : index
    %c0_120 = arith.constant 0 : index
    %c0_121 = arith.constant 0 : index
    %c0_122 = arith.constant 0 : index
    %62 = vector.load %arg16[%c0_119, %c0_120, %c0_121, %c0_122] : memref<2x4x4x64xf32, #tpu.memory_space<vmem>>, vector<2x1x1x64xf32>
    %63 = vector.shape_cast %62 : vector<2x1x1x64xf32> to vector<2x64xf32>
    %c0_123 = arith.constant 0 : index
    %c0_124 = arith.constant 0 : index
    %c1_125 = arith.constant 1 : index
    %c0_126 = arith.constant 0 : index
    %64 = vector.load %arg16[%c0_123, %c0_124, %c1_125, %c0_126] : memref<2x4x4x64xf32, #tpu.memory_space<vmem>>, vector<2x1x1x64xf32>
    %65 = vector.shape_cast %64 : vector<2x1x1x64xf32> to vector<2x64xf32>
    %c0_127 = arith.constant 0 : index
    %c0_128 = arith.constant 0 : index
    %c2_129 = arith.constant 2 : index
    %c0_130 = arith.constant 0 : index
    %66 = vector.load %arg16[%c0_127, %c0_128, %c2_129, %c0_130] : memref<2x4x4x64xf32, #tpu.memory_space<vmem>>, vector<2x1x1x64xf32>
    %67 = vector.shape_cast %66 : vector<2x1x1x64xf32> to vector<2x64xf32>
    %c0_131 = arith.constant 0 : index
    %c0_132 = arith.constant 0 : index
    %c3 = arith.constant 3 : index
    %c0_133 = arith.constant 0 : index
    %68 = vector.load %arg16[%c0_131, %c0_132, %c3, %c0_133] : memref<2x4x4x64xf32, #tpu.memory_space<vmem>>, vector<2x1x1x64xf32>
    %69 = vector.shape_cast %68 : vector<2x1x1x64xf32> to vector<2x64xf32>
    %c0_134 = arith.constant 0 : index
    %c1_135 = arith.constant 1 : index
    %c0_136 = arith.constant 0 : index
    %c0_137 = arith.constant 0 : index
    %70 = vector.load %arg16[%c0_134, %c1_135, %c0_136, %c0_137] : memref<2x4x4x64xf32, #tpu.memory_space<vmem>>, vector<2x1x1x64xf32>
    %71 = vector.shape_cast %70 : vector<2x1x1x64xf32> to vector<2x64xf32>
    %c0_138 = arith.constant 0 : index
    %c1_139 = arith.constant 1 : index
    %c1_140 = arith.constant 1 : index
    %c0_141 = arith.constant 0 : index
    %72 = vector.load %arg16[%c0_138, %c1_139, %c1_140, %c0_141] : memref<2x4x4x64xf32, #tpu.memory_space<vmem>>, vector<2x1x1x64xf32>
    %73 = vector.shape_cast %72 : vector<2x1x1x64xf32> to vector<2x64xf32>
    %c0_142 = arith.constant 0 : index
    %c1_143 = arith.constant 1 : index
    %c2_144 = arith.constant 2 : index
    %c0_145 = arith.constant 0 : index
    %74 = vector.load %arg16[%c0_142, %c1_143, %c2_144, %c0_145] : memref<2x4x4x64xf32, #tpu.memory_space<vmem>>, vector<2x1x1x64xf32>
    %75 = vector.shape_cast %74 : vector<2x1x1x64xf32> to vector<2x64xf32>
    %c0_146 = arith.constant 0 : index
    %c1_147 = arith.constant 1 : index
    %c3_148 = arith.constant 3 : index
    %c0_149 = arith.constant 0 : index
    %76 = vector.load %arg16[%c0_146, %c1_147, %c3_148, %c0_149] : memref<2x4x4x64xf32, #tpu.memory_space<vmem>>, vector<2x1x1x64xf32>
    %77 = vector.shape_cast %76 : vector<2x1x1x64xf32> to vector<2x64xf32>
    %c0_150 = arith.constant 0 : index
    %c2_151 = arith.constant 2 : index
    %c0_152 = arith.constant 0 : index
    %c0_153 = arith.constant 0 : index
    %78 = vector.load %arg16[%c0_150, %c2_151, %c0_152, %c0_153] : memref<2x4x4x64xf32, #tpu.memory_space<vmem>>, vector<2x1x1x64xf32>
    %79 = vector.shape_cast %78 : vector<2x1x1x64xf32> to vector<2x64xf32>
    %c0_154 = arith.constant 0 : index
    %c2_155 = arith.constant 2 : index
    %c1_156 = arith.constant 1 : index
    %c0_157 = arith.constant 0 : index
    %80 = vector.load %arg16[%c0_154, %c2_155, %c1_156, %c0_157] : memref<2x4x4x64xf32, #tpu.memory_space<vmem>>, vector<2x1x1x64xf32>
    %81 = vector.shape_cast %80 : vector<2x1x1x64xf32> to vector<2x64xf32>
    %c0_158 = arith.constant 0 : index
    %c2_159 = arith.constant 2 : index
    %c2_160 = arith.constant 2 : index
    %c0_161 = arith.constant 0 : index
    %82 = vector.load %arg16[%c0_158, %c2_159, %c2_160, %c0_161] : memref<2x4x4x64xf32, #tpu.memory_space<vmem>>, vector<2x1x1x64xf32>
    %83 = vector.shape_cast %82 : vector<2x1x1x64xf32> to vector<2x64xf32>
    %c0_162 = arith.constant 0 : index
    %c2_163 = arith.constant 2 : index
    %c3_164 = arith.constant 3 : index
    %c0_165 = arith.constant 0 : index
    %84 = vector.load %arg16[%c0_162, %c2_163, %c3_164, %c0_165] : memref<2x4x4x64xf32, #tpu.memory_space<vmem>>, vector<2x1x1x64xf32>
    %85 = vector.shape_cast %84 : vector<2x1x1x64xf32> to vector<2x64xf32>
    %c0_166 = arith.constant 0 : index
    %c3_167 = arith.constant 3 : index
    %c0_168 = arith.constant 0 : index
    %c0_169 = arith.constant 0 : index
    %86 = vector.load %arg16[%c0_166, %c3_167, %c0_168, %c0_169] : memref<2x4x4x64xf32, #tpu.memory_space<vmem>>, vector<2x1x1x64xf32>
    %87 = vector.shape_cast %86 : vector<2x1x1x64xf32> to vector<2x64xf32>
    %c0_170 = arith.constant 0 : index
    %c3_171 = arith.constant 3 : index
    %c1_172 = arith.constant 1 : index
    %c0_173 = arith.constant 0 : index
    %88 = vector.load %arg16[%c0_170, %c3_171, %c1_172, %c0_173] : memref<2x4x4x64xf32, #tpu.memory_space<vmem>>, vector<2x1x1x64xf32>
    %89 = vector.shape_cast %88 : vector<2x1x1x64xf32> to vector<2x64xf32>
    %c0_174 = arith.constant 0 : index
    %c3_175 = arith.constant 3 : index
    %c2_176 = arith.constant 2 : index
    %c0_177 = arith.constant 0 : index
    %90 = vector.load %arg16[%c0_174, %c3_175, %c2_176, %c0_177] : memref<2x4x4x64xf32, #tpu.memory_space<vmem>>, vector<2x1x1x64xf32>
    %91 = vector.shape_cast %90 : vector<2x1x1x64xf32> to vector<2x64xf32>
    %c0_178 = arith.constant 0 : index
    %c3_179 = arith.constant 3 : index
    %c3_180 = arith.constant 3 : index
    %c0_181 = arith.constant 0 : index
    %92 = vector.load %arg16[%c0_178, %c3_179, %c3_180, %c0_181] : memref<2x4x4x64xf32, #tpu.memory_space<vmem>>, vector<2x1x1x64xf32>
    %93 = vector.shape_cast %92 : vector<2x1x1x64xf32> to vector<2x64xf32>
    %94 = tpu.concatenate %63, %65, %67, %69, %71, %73, %75, %77, %79, %81, %83, %85, %87, %89, %91, %93 in 1 : vector<2x64xf32>, vector<2x64xf32>, vector<2x64xf32>, vector<2x64xf32>, vector<2x64xf32>, vector<2x64xf32>, vector<2x64xf32>, vector<2x64xf32>, vector<2x64xf32>, vector<2x64xf32>, vector<2x64xf32>, vector<2x64xf32>, vector<2x64xf32>, vector<2x64xf32>, vector<2x64xf32>, vector<2x64xf32> -> vector<2x1024xf32>
    %95 = arith.truncf %94 : vector<2x1024xf32> to vector<2x1024xbf16>
    %c0_182 = arith.constant 0 : index
    %c0_183 = arith.constant 0 : index
    %96 = vector.load %arg8[%c0_182, %c0_183] : memref<1024x128xbf16, #tpu.memory_space<vmem>>, vector<1024x128xbf16>
    %cst_184 = arith.constant dense<0.000000e+00> : vector<2x128xf32>
    %97 = tpu.matmul %95, %96, %cst_184 {dimension_numbers = #tpu.dot_dimension_numbers<[1], [0], [0], [1], [0, 0, 1, 1], [], []>} : vector<2x1024xbf16>, vector<1024x128xbf16>, vector<2x128xf32> -> vector<2x128xf32>
    %c0_185 = arith.constant 0 : index
    %c0_186 = arith.constant 0 : index
    %98 = vector.load %arg9[%c0_185, %c0_186] : memref<1x128xf32, #tpu.memory_space<vmem>>, vector<1x128xf32>
    %99 = vector.broadcast %98 : vector<1x128xf32> to vector<2x128xf32>
    %100 = arith.addf %97, %99 : vector<2x128xf32>
    %cst_187 = arith.constant 0.000000e+00 : f32
    %101 = vector.broadcast %cst_187 : f32 to vector<2x128xf32>
    %102 = arith.maximumf %100, %101 : vector<2x128xf32>
    %c0_188 = arith.constant 0 : index
    %c0_189 = arith.constant 0 : index
    %103 = vector.load %arg10[%c0_188, %c0_189] : memref<1x128xf32, #tpu.memory_space<vmem>>, vector<1x128xf32>
    %104 = vector.broadcast %103 : vector<1x128xf32> to vector<2x128xf32>
    %105 = arith.mulf %102, %104 : vector<2x128xf32>
    %cst_190 = arith.constant dense<0.000000e+00> : vector<2xf32>
    %106 = vector.multi_reduction <add>, %105, %cst_190 [1] : vector<2x128xf32> to vector<2xf32>
    %107 = vector.shape_cast %106 : vector<2xf32> to vector<2x1xf32>
    %c0_191 = arith.constant 0 : index
    %c0_192 = arith.constant 0 : index
    %108 = vector.load %arg11[%c0_191, %c0_192] : memref<1x1xf32, #tpu.memory_space<vmem>>, vector<1x1xf32>
    %109 = vector.broadcast %108 : vector<1x1xf32> to vector<2x1xf32>
    %110 = arith.addf %107, %109 : vector<2x1xf32>
    %c0_193 = arith.constant 0 : index
    %c0_194 = arith.constant 0 : index
    %111 = vector.load %arg12[%c0_193, %c0_194] : memref<2x1xf32, #tpu.memory_space<vmem>>, vector<2x1xf32>
    tpu.vector_store %arg12[%c0_193, %c0_194], %110 {strides = array<i32>} : memref<2x1xf32, #tpu.memory_space<vmem>>, vector<2x1xf32>,
    return
  }
  func.func @transform_0(%arg0: i32) -> (i32, i32, i32, i32) {
    %c0_i32 = arith.constant 0 : i32
    %c0_i32_0 = arith.constant 0 : i32
    %c0_i32_1 = arith.constant 0 : i32
    %c0_i32_2 = arith.constant 0 : i32
    return %arg0, %c0_i32, %c0_i32_0, %c0_i32_1 : i32, i32, i32, i32
  }
  func.func @transform_1(%arg0: i32) -> (i32, i32) {
    %c0_i32 = arith.constant 0 : i32
    %c0_i32_0 = arith.constant 0 : i32
    %c0_i32_1 = arith.constant 0 : i32
    return %c0_i32, %c0_i32_0 : i32, i32
  }
  func.func @transform_2(%arg0: i32) -> (i32, i32) {
    %c0_i32 = arith.constant 0 : i32
    %c0_i32_0 = arith.constant 0 : i32
    %c0_i32_1 = arith.constant 0 : i32
    return %c0_i32, %c0_i32_0 : i32, i32
  }
  func.func @transform_3(%arg0: i32) -> (i32, i32) {
    %c0_i32 = arith.constant 0 : i32
    %c0_i32_0 = arith.constant 0 : i32
    %c0_i32_1 = arith.constant 0 : i32
    return %c0_i32, %c0_i32_0 : i32, i32
  }
  func.func @transform_4(%arg0: i32) -> (i32, i32) {
    %c0_i32 = arith.constant 0 : i32
    %c0_i32_0 = arith.constant 0 : i32
    %c0_i32_1 = arith.constant 0 : i32
    return %c0_i32, %c0_i32_0 : i32, i32
  }
  func.func @transform_5(%arg0: i32) -> (i32, i32) {
    %c0_i32 = arith.constant 0 : i32
    %c0_i32_0 = arith.constant 0 : i32
    %c0_i32_1 = arith.constant 0 : i32
    return %c0_i32, %c0_i32_0 : i32, i32
  }
  func.func @transform_6(%arg0: i32) -> (i32, i32) {
    %c0_i32 = arith.constant 0 : i32
    %c0_i32_0 = arith.constant 0 : i32
    %c0_i32_1 = arith.constant 0 : i32
    return %c0_i32, %c0_i32_0 : i32, i32
  }
  func.func @transform_7(%arg0: i32) -> (i32, i32) {
    %c0_i32 = arith.constant 0 : i32
    %c0_i32_0 = arith.constant 0 : i32
    %c0_i32_1 = arith.constant 0 : i32
    return %c0_i32, %c0_i32_0 : i32, i32
  }
  func.func @transform_8(%arg0: i32) -> (i32, i32) {
    %c0_i32 = arith.constant 0 : i32
    %c0_i32_0 = arith.constant 0 : i32
    %c0_i32_1 = arith.constant 0 : i32
    return %c0_i32, %c0_i32_0 : i32, i32
  }
  func.func @transform_9(%arg0: i32) -> (i32, i32) {
    %c0_i32 = arith.constant 0 : i32
    %c0_i32_0 = arith.constant 0 : i32
    %c0_i32_1 = arith.constant 0 : i32
    return %c0_i32, %c0_i32_0 : i32, i32
  }
  func.func @transform_10(%arg0: i32) -> (i32, i32) {
    %c0_i32 = arith.constant 0 : i32
    %c0_i32_0 = arith.constant 0 : i32
    %c0_i32_1 = arith.constant 0 : i32
    return %c0_i32, %c0_i32_0 : i32, i32
  }
  func.func @transform_11(%arg0: i32) -> (i32, i32) {
    %c0_i32 = arith.constant 0 : i32
    %c0_i32_0 = arith.constant 0 : i32
    return %arg0, %c0_i32 : i32, i32
  }
}

</mosaic_0001>

<bundles_post_ra>
// kernel: advanced_cnn_regressor_forward.1
= control target key start
LH: loop header
LB: loop body
LE: loop exit
PB: predicated region body
PF: predicated region fallthrough
CT: control target
= control target key end

     0   :  { %vm382_vm0 = vcmask 1041408   ;;  %vm285_vm1 = vcmask 293888   ;;  %vm755_vm2 = vcmask 261120   ;;  %vm996_vm3 = vcmask 254976   ;;  %s3926_s28 = smov 64   ;;  %s3927_s27 = smov 32   ;;  %s5150_s1 = inlined_call_operand.vmem [shape: bf16[36,32], index: 1, kind: input, shape index: {}]   ;;  %s5151_s2 = inlined_call_operand.vmem [shape: f32[1,32], index: 2, kind: input, shape index: {}]   ;;  %s5152_s3 = inlined_call_operand.vmem [shape: f32[1,32], index: 3, kind: input, shape index: {}]   ;;  %s5153_s0 = inlined_call_operand.vmem [shape: bf16[2,16,16,36], index: 0, kind: input, shape index: {}]   ;;  %s5154_s4 = inlined_call_operand.vmem [shape: bf16[288,64], index: 4, kind: input, shape index: {}]   ;;  %s5155_s5 = inlined_call_operand.vmem [shape: f32[1,64], index: 5, kind: input, shape index: {}]   ;;  %s5156_s6 = inlined_call_operand.vmem [shape: f32[1,64], index: 6, kind: input, shape index: {}]   ;;  %s5157_s7 = inlined_call_operand.vmem [shape: bf16[1024,128], index: 7, kind: input, shape index: {}]   ;;  %s5158_s8 = inlined_call_operand.vmem [shape: f32[1,128], index: 8, kind: input, shape index: {}]   ;;  %s5159_s9 = inlined_call_operand.vmem [shape: f32[1,128], index: 9, kind: input, shape index: {}]   ;;  %s5160_s10 = inlined_call_operand.<no memory space> [shape: f32[1,1], index: 10, kind: input, shape index: {}]   ;;  %s5161_s11 = inlined_call_operand.vmem [shape: f32[2,1], index: 11, kind: output, shape index: {}]  }
   0x1   :  { %v109_v0 = vld [vmem:[%s5150_s1 + $0x10] sm:$0x3]  ;;  %v3568_v4 = vld [vmem:[%s5150_s1 + $0x8] sm:$0xff]  ;;  %v3567_v5 = vld [vmem:[%s5150_s1] sm:$0xff]  ;;  %v3925_v26 = vmov 0.0   ;;  %vm1005_vm4 = vcmask 253952  }
   0x2   :  { %v279_v1 = vunpack.c.l.b16 %v109_v0  ;;  %v3535_v6 = vld [vmem:[%s5153_s0] sm:$0xff]  ;;  %v3536_v7 = vld [vmem:[%s5153_s0 + $0x8] sm:$0xff]  ;;  %v3537_v8 = vld [vmem:[%s5153_s0 + $0x10] sm:$0xff]  ;;  %995 = vst.msk [vmem:[#allocation3] sm:$0xff] %vm755_vm2, %v3925_v26  ;;  %s3928_s29 = smov 96   ;;  %vm1608_vm5 = vcmask 523264  }
   0x3   :  { %v3538_v9 = vld [vmem:[%s5153_s0 + $0x18] sm:$0xff]  ;;  %v3539_v10 = vld [vmem:[%s5153_s0 + $0x20] sm:$0xff]  ;;  %v3540_v11 = vld [vmem:[%s5153_s0 + $0x28] sm:$0xff]  ;;  %997 = vst.msk [vmem:[#allocation3 + $0x8] sm:$0x3] %vm996_vm3, %v3925_v26  ;;  %vm1625_vm6 = vcmask 785408  }
   0x4   :  { %v282_v2 = vpack.c.b16 %v279_v1, %v279_v1  ;;  %v3541_v12 = vld [vmem:[%s5153_s0 + $0x30] sm:$0xff]  ;;  %v3542_v13 = vld [vmem:[%s5153_s0 + $0x38] sm:$0xff]  ;;  %v3555_v14 = vld [vmem:[%s5153_s0 + $0xa0] sm:$0xff]  ;;  %1006 = vst.msk [vmem:[#allocation3] sm:$0x1] %vm1005_vm4, %v3925_v26  ;;  %vm2188_vm7 = vcmask 519168  }
   0x5   :  { %v4038_v15 = vld [vmem:[%s5151_s2] ss:$0 sm:$0xff]  ;;  %v3556_v21 = vld [vmem:[%s5153_s0 + $0xa8] sm:$0xff]  ;;  %v3562_v22 = vld [vmem:[%s5153_s0 + $0xd8] sm:$0xff]  ;;  %1026 = vst.msk [vmem:[#allocation3 + $0x9] sm:$0x1] %vm1005_vm4, %v3925_v26 }
   0x6   :  { %v384_v3 = vsel %vm382_vm0, %v282_v2, 0  ;;  %v4043_v16 = vld [vmem:[%s5152_s3] ss:$0 sm:$0xff]  ;;  %1027 = vst.msk [vmem:[#allocation3 + $0x19] sm:$0x1] %vm1005_vm4, %v3925_v26  ;;  %v3544_v29 = vld [vmem:[%s5153_s0 + $0x48] sm:$0xff] }
   0x7   :  { %391 = vmatpush.bf16.msra.mxu0 %v384_v3  ;;  %3652 = vmatpush.bf16.msra.mxu2 %v384_v3  ;;  %v3543_v17 = vld [vmem:[%s5153_s0 + $0x40] sm:$0xff]  ;;  %998 = vst.msk [vmem:[#allocation3 + $0xa0] sm:$0xff] %vm755_vm2, %v3925_v26  ;;  %v3557_v33 = vld [vmem:[%s5153_s0 + $0xb0] sm:$0xff]  ;;  %v3558_v48 = vld [vmem:[%s5153_s0 + $0xb8] sm:$0xff]  ;;  %vm2235_vm8 = vcmask 1041409   ;;  %vm2979_vm9 = vcmask 1024  }
   0x8   :  { %3653 = vmatpush.bf16.msra.mxu3 %v384_v3  ;;  %3651 = vmatpush.bf16.msra.mxu1 %v384_v3  ;;  %999 = vst.msk [vmem:[#allocation3 + $0xa8] sm:$0x3] %vm996_vm3, %v3925_v26  ;;  %v3563_v34 = vld [vmem:[%s5153_s0 + $0xe0] sm:$0xff]  ;;  %v3553_v39 = vld [vmem:[%s5153_s0 + $0x90] sm:$0xff]  ;;  %v3564_v49 = vld [vmem:[%s5153_s0 + $0xe8] sm:$0xff] }
   0x9   :  { %1001 = vst.msk [vmem:[#allocation3 + $0x90] sm:$0xff] %vm755_vm2, %v3925_v26  ;;  %v3545_v41 = vld [vmem:[%s5153_s0 + $0x50] sm:$0xff]  ;;  %v3554_v58 = vld [vmem:[%s5153_s0 + $0x98] sm:$0xff] }
   0xa   :  { %1002 = vst.msk [vmem:[#allocation3 + $0x98] sm:$0x3] %vm996_vm3, %v3925_v26  ;;  %v3546_v60 = vld [vmem:[%s5153_s0 + $0x58] sm:$0xff] }
   0xb   :  { %392 = vmatpush.bf16.msra.mxu0 %v3568_v4  ;;  %3655 = vmatpush.bf16.msra.mxu2 %v3568_v4  ;;  %1003 = vst.msk [vmem:[#allocation3 + $0x130] sm:$0xff] %vm755_vm2, %v3925_v26 }
   0xc   :  { %3656 = vmatpush.bf16.msra.mxu3 %v3568_v4  ;;  %3654 = vmatpush.bf16.msra.mxu1 %v3568_v4  ;;  %1004 = vst.msk [vmem:[#allocation3 + $0x138] sm:$0x3] %vm996_vm3, %v3925_v26  ;;  %v1095_v62 = vld [vmem:[#allocation3 + $0x2] sm:$0xff] }
   0xd   :  { %1007 = vst.msk [vmem:[#allocation3 + $0x10] sm:$0x1] %vm1005_vm4, %v3925_v26  ;;  %v3559_v4 = vld [vmem:[%s5153_s0 + $0xc0] sm:$0xff] }
   0xe   :  { %1008 = vst.msk [vmem:[#allocation3 + $0x20] sm:$0x1] %vm1005_vm4, %v3925_v26 }
   0xf   :  { %393 = vmatpush.bf16.msra.mxu0 %v3567_v5  ;;  %3658 = vmatpush.bf16.msra.mxu2 %v3567_v5  ;;  %1009 = vst.msk [vmem:[#allocation3 + $0x30] sm:$0x1] %vm1005_vm4, %v3925_v26 }
  0x10   :  { %3659 = vmatpush.bf16.msra.mxu3 %v3567_v5  ;;  %3657 = vmatpush.bf16.msra.mxu1 %v3567_v5  ;;  %1010 = vst.msk [vmem:[#allocation3 + $0x40] sm:$0x1] %vm1005_vm4, %v3925_v26  ;;  %v3565_v5 = vld [vmem:[%s5153_s0 + $0xf0] sm:$0xff] }
  0x11   :  { %1011 = vst.msk [vmem:[#allocation3 + $0x50] sm:$0x1] %vm1005_vm4, %v3925_v26 }
  0x12   :  { %3167 = vmatmul.msk.bf16.vlgmr.msra.gmra.mxu0 %vm285_vm1, %v3535_v6  ;;  %3187 = vmatmul.msk.bf16.vlgmr.msra.gmra.mxu2 %vm285_vm1, %v3555_v14  ;;  %1012 = vst.msk [vmem:[#allocation3 + $0x60] sm:$0x1] %vm1005_vm4, %v3925_v26 }
  0x13   :  { %3194 = vmatmul.msk.bf16.vlgmr.msra.gmra.mxu3 %vm285_vm1, %v3562_v22  ;;  %1013 = vst.msk [vmem:[#allocation3 + $0x70] sm:$0x1] %vm1005_vm4, %v3925_v26  ;;  %3185 = vmatmul.msk.bf16.vlgmr.msra.gmra.mxu1 %vm285_vm1, %v3553_v39 }
  0x14   :  { %1014 = vst.msk [vmem:[#allocation3 + $0x80] sm:$0x1] %vm1005_vm4, %v3925_v26 }
  0x15   :  { %1017 = vst.msk [vmem:[#allocation3 + $0xb0] sm:$0x1] %vm1005_vm4, %v3925_v26 }
  0x16   :  { %1018 = vst.msk [vmem:[#allocation3 + $0xc0] sm:$0x1] %vm1005_vm4, %v3925_v26 }
  0x17   :  { %1019 = vst.msk [vmem:[#allocation3 + $0xd0] sm:$0x1] %vm1005_vm4, %v3925_v26 }
  0x18   :  { %1020 = vst.msk [vmem:[#allocation3 + $0xe0] sm:$0x1] %vm1005_vm4, %v3925_v26 }
  0x19   :  { %1021 = vst.msk [vmem:[#allocation3 + $0xf0] sm:$0x1] %vm1005_vm4, %v3925_v26 }
  0x1a   :  { %1022 = vst.msk [vmem:[#allocation3 + $0x100] sm:$0x1] %vm1005_vm4, %v3925_v26 }
  0x1b   :  { %1023 = vst.msk [vmem:[#allocation3 + $0x110] sm:$0x1] %vm1005_vm4, %v3925_v26 }
  0x1c   :  { %1024 = vst.msk [vmem:[#allocation3 + $0x120] sm:$0x1] %vm1005_vm4, %v3925_v26 }
  0x1d   :  { %1028 = vst.msk [vmem:[#allocation3 + $0x29] sm:$0x1] %vm1005_vm4, %v3925_v26 }
  0x1e   :  { %1029 = vst.msk [vmem:[#allocation3 + $0x39] sm:$0x1] %vm1005_vm4, %v3925_v26 }
  0x1f   :  { %1030 = vst.msk [vmem:[#allocation3 + $0x49] sm:$0x1] %vm1005_vm4, %v3925_v26 }
  0x20   :  { %1031 = vst.msk [vmem:[#allocation3 + $0x59] sm:$0x1] %vm1005_vm4, %v3925_v26 }
  0x21   :  { %1032 = vst.msk [vmem:[#allocation3 + $0x69] sm:$0x1] %vm1005_vm4, %v3925_v26 }
  0x22   :  { %3168 = vmatmul.msk.bf16.gmra.mxu0 %vm285_vm1, %v3536_v7  ;;  %3188 = vmatmul.msk.bf16.gmra.mxu2 %vm285_vm1, %v3556_v21  ;;  %1033 = vst.msk [vmem:[#allocation3 + $0x79] sm:$0x1] %vm1005_vm4, %v3925_v26 }
  0x23   :  { %3195 = vmatmul.msk.bf16.gmra.mxu3 %vm285_vm1, %v3563_v34  ;;  %3186 = vmatmul.msk.bf16.gmra.mxu1 %vm285_vm1, %v3554_v58  ;;  %1034 = vst.msk [vmem:[#allocation3 + $0x89] sm:$0x1] %vm1005_vm4, %v3925_v26  ;;  %v3585_v34 = vld [vmem:[%s5154_s4 + $0x80] sm:$0xff] }
  0x24   :  { %1037 = vst.msk [vmem:[#allocation3 + $0xb9] sm:$0x1] %vm1005_vm4, %v3925_v26 }
  0x25   :  { %1038 = vst.msk [vmem:[#allocation3 + $0xc9] sm:$0x1] %vm1005_vm4, %v3925_v26 }
  0x26   :  { %1039 = vst.msk [vmem:[#allocation3 + $0xd9] sm:$0x1] %vm1005_vm4, %v3925_v26 }
  0x27   :  { %1040 = vst.msk [vmem:[#allocation3 + $0xe9] sm:$0x1] %vm1005_vm4, %v3925_v26 }
  0x28   :  { %1041 = vst.msk [vmem:[#allocation3 + $0xf9] sm:$0x1] %vm1005_vm4, %v3925_v26 }
  0x29   :  { %1042 = vst.msk [vmem:[#allocation3 + $0x109] sm:$0x1] %vm1005_vm4, %v3925_v26 }
  0x2a   :  { %1043 = vst.msk [vmem:[#allocation3 + $0x119] sm:$0x1] %vm1005_vm4, %v3925_v26 }
  0x2b   :  { %1044 = vst.msk [vmem:[#allocation3 + $0x129] sm:$0x1] %vm1005_vm4, %v3925_v26 }
  0x2c   :  { %1015 = vst.msk [vmem:[#allocation3 + $0x90] sm:$0x1] %vm1005_vm4, %v3925_v26 }
  0x2d   :  { %1016 = vst.msk [vmem:[#allocation3 + $0xa0] sm:$0x1] %vm1005_vm4, %v3925_v26 }
  0x2e   :  { %1025 = vst.msk [vmem:[#allocation3 + $0x130] sm:$0x1] %vm1005_vm4, %v3925_v26 }
  0x2f   :  { %1035 = vst.msk [vmem:[#allocation3 + $0x99] sm:$0x1] %vm1005_vm4, %v3925_v26 }
  0x30   :  { %1036 = vst.msk [vmem:[#allocation3 + $0xa9] sm:$0x1] %vm1005_vm4, %v3925_v26 }
  0x31   :  { %1045 = vst.msk [vmem:[#allocation3 + $0x139] sm:$0x1] %vm1005_vm4, %v3925_v26 }
  0x32   :  { %3169 = vmatmul.msk.bf16.gmra.mxu0 %vm285_vm1, %v3537_v8  ;;  %3189 = vmatmul.msk.bf16.gmra.mxu2 %vm285_vm1, %v3557_v33 }
  0x33   :  { %3196 = vmatmul.msk.bf16.gmra.mxu3 %vm285_vm1, %v3564_v49 }
  0x42   :  { %3170 = vmatmul.msk.bf16.gmra.mxu0 %vm285_vm1, %v3538_v9  ;;  %3190 = vmatmul.msk.bf16.gmra.mxu2 %vm285_vm1, %v3558_v48 }
  0x43   :  { %3197 = vmatmul.msk.bf16.gmra.mxu3 %vm285_vm1, %v3565_v5 }
  0x52   :  { %3171 = vmatmul.msk.bf16.gmra.mxu0 %vm285_vm1, %v3539_v10  ;;  %3191 = vmatmul.msk.bf16.gmra.mxu2 %vm285_vm1, %v3559_v4  ;;  %v3547_v10 = vld [vmem:[%s5153_s0 + $0x60] sm:$0xff] }
  0x62   :  { %3172 = vmatmul.msk.bf16.gmra.mxu0 %vm285_vm1, %v3540_v11 }
  0x72   :  { %3173 = vmatmul.msk.bf16.gmra.mxu0 %vm285_vm1, %v3541_v12 }
  0x82   :  { %3174 = vmatmul.msk.bf16.gmra.mxu0 %vm285_vm1, %v3542_v13 }
  0x8f   :  { %v395_v18 = vpop.f32.mrf.mxu0 }
  0x90   :  { %v559_v19 = vmul.f32 %v4038_v15, %v395_v18  ;;  %v3566_v18 = vld [vmem:[%s5153_s0 + $0xf8] sm:$0xff] }
  0x91   :  { %3198 = vmatmul.msk.bf16.gmra.mxu3 %vm285_vm1, %v3566_v18 }
  0x92   :  { %v627_v20 = vadd.f32 %v4043_v16, %v559_v19  ;;  %3175 = vmatmul.msk.bf16.gmra.mxu0 %vm285_vm1, %v3543_v17  ;;  %v3560_v17 = vld [vmem:[%s5153_s0 + $0xc8] sm:$0xff] }
  0x93   :  { %3192 = vmatmul.msk.bf16.gmra.mxu2 %vm285_vm1, %v3560_v17 }
  0x94   :  { %v691_v23 = vmax.f32 %v627_v20, 0.0 }
  0x95   :  { %v495_v18 = vpop.f32.mrf.mxu2 }
  0x96   :  { %756 = vst.msk [vmem:[#allocation2] sm:$0xff] %vm755_vm2, %v691_v23 }
  0x97   :  { %v397_v24 = vpop.f32.mrf.mxu0 }
  0x98   :  { %v560_v25 = vmul.f32 %v4038_v15, %v397_v24 }
  0x9a   :  { %v628_v27 = vadd.f32 %v4043_v16, %v560_v25 }
  0x9c   :  { %v692_v28 = vmax.f32 %v628_v27, 0.0 }
  0x9e   :  { %757 = vst.msk [vmem:[#allocation2 + $0x8] sm:$0xff] %vm755_vm2, %v692_v28 }
  0x9f   :  { %v400_v30 = vpop.f32.mrf.mxu0 }
  0xa0   :  { %v561_v31 = vmul.f32 %v4038_v15, %v400_v30  ;;  %v3586_v30 = vld [vmem:[%s5154_s4 + $0x88] sm:$0xff] }
  0xa1   :  { %1986 = vmatpush.bf16.msrb.mxu3 %v3586_v30 }
  0xa2   :  { %v629_v32 = vadd.f32 %v4043_v16, %v561_v31  ;;  %3176 = vmatmul.msk.bf16.gmra.mxu0 %vm285_vm1, %v3544_v29  ;;  %v3548_v31 = vld [vmem:[%s5153_s0 + $0x68] sm:$0xff] }
  0xa4   :  { %v693_v35 = vmax.f32 %v629_v32, 0.0 }
  0xa5   :  { %v820_v45 = vld [vmem:[#allocation2] ss:$2 sm:$0xff]  ;;  %v852_v46 = vld [vmem:[#allocation2 + $0x1] ss:$2 sm:$0xff]  ;;  %1987 = vmatpush.bf16.msrb.mxu3 %v3585_v34  ;;  %v599_v34 = vmul.f32 %v4038_v15, %v495_v18 }
  0xa6   :  { %758 = vst.msk [vmem:[#allocation2 + $0x10] sm:$0xff] %vm755_vm2, %v693_v35  ;;  %v883_v52 = vmax.f32 %v820_v45, %v852_v46 }
  0xa7   :  { %v402_v36 = vpop.f32.mrf.mxu0 }
  0xa8   :  { %v562_v37 = vmul.f32 %v4038_v15, %v402_v36 }
  0xaa   :  { %v630_v38 = vadd.f32 %v4043_v16, %v562_v37 }
  0xac   :  { %v694_v40 = vmax.f32 %v630_v38, 0.0 }
  0xae   :  { %759 = vst.msk [vmem:[#allocation2 + $0x18] sm:$0xff] %vm755_vm2, %v694_v40 }
  0xaf   :  { %v405_v42 = vpop.f32.mrf.mxu0 }
  0xb0   :  { %v563_v43 = vmul.f32 %v4038_v15, %v405_v42  ;;  %v3561_v42 = vld [vmem:[%s5153_s0 + $0xd0] sm:$0xff] }
  0xb1   :  { %3193 = vmatmul.msk.bf16.gmra.mxu2 %vm285_vm1, %v3561_v42 }
  0xb2   :  { %v631_v44 = vadd.f32 %v4043_v16, %v563_v43  ;;  %3177 = vmatmul.msk.bf16.gmra.mxu0 %vm285_vm1, %v3545_v41 }
  0xb4   :  { %v695_v47 = vmax.f32 %v631_v44, 0.0 }
  0xb5   :  { %v900_v50 = vld [vmem:[#allocation2 + $0x10] ss:$2 sm:$0xff]  ;;  %v932_v51 = vld [vmem:[#allocation2 + $0x11] ss:$2 sm:$0xff] }
  0xb6   :  { %760 = vst.msk [vmem:[#allocation2 + $0x20] sm:$0xff] %vm755_vm2, %v695_v47  ;;  %v963_v53 = vmax.f32 %v900_v50, %v932_v51  ;;  %v3549_v47 = vld [vmem:[%s5153_s0 + $0x70] sm:$0xff] }
  0xb7   :  { %v407_v54 = vpop.f32.mrf.mxu0 }
  0xb8   :  { %v564_v55 = vmul.f32 %v4038_v15, %v407_v54  ;;  %v979_v56 = vmax.f32 %v883_v52, %v963_v53 }
  0xba   :  { %v632_v57 = vadd.f32 %v4043_v16, %v564_v55  ;;  %1047 = vst.msk [vmem:[#allocation3 + $0x11] sm:$0xff] %vm755_vm2, %v979_v56 }
  0xbc   :  { %v696_v59 = vmax.f32 %v632_v57, 0.0 }
  0xbe   :  { %761 = vst.msk [vmem:[#allocation2 + $0x28] sm:$0xff] %vm755_vm2, %v696_v59 }
  0xbf   :  { %v410_v61 = vpop.f32.mrf.mxu0 }
  0xc0   :  { %v565_v63 = vmul.f32 %v4038_v15, %v410_v61 }
  0xc1   :  { %v4180_v0 = vld [vmem:[#allocation3 + $0x12] sm:$0xff] }
  0xc2   :  { %v633_v1 = vadd.f32 %v4043_v16, %v565_v63  ;;  %3178 = vmatmul.msk.bf16.gmra.mxu0 %vm285_vm1, %v3546_v60  ;;  %v3684_v2 = vpack.i.bf16 %v4180_v0, %v1095_v62  ;;  %v4259_v37 = vld [vmem:[#allocation3 + $0x10] sm:$0xff]  ;;  %v3550_v63 = vld [vmem:[%s5153_s0 + $0x78] sm:$0xff] }
  0xc4   :  { %v697_v3 = vmax.f32 %v633_v1, 0.0  ;;  %3685 = vrot.lane.b32.xlu2 %v3684_v2, %s3926_s28 }
  0xc5   :  { %v822_v19 = vld [vmem:[#allocation2 + $0x20] ss:$2 sm:$0xff]  ;;  %v854_v20 = vld [vmem:[#allocation2 + $0x21] ss:$2 sm:$0xff] }
  0xc6   :  { %762 = vst.msk [vmem:[#allocation2 + $0x30] sm:$0xff] %vm755_vm2, %v697_v3  ;;  %v884_v25 = vmax.f32 %v822_v19, %v854_v20 }
  0xc7   :  { %v412_v6 = vpop.f32.mrf.mxu0 }
  0xc8   :  { %v566_v7 = vmul.f32 %v4038_v15, %v412_v6 }
  0xca   :  { %v634_v8 = vadd.f32 %v4043_v16, %v566_v7 }
  0xcc   :  { %v698_v9 = vmax.f32 %v634_v8, 0.0 }
  0xce   :  { %763 = vst.msk [vmem:[#allocation2 + $0x38] sm:$0xff] %vm755_vm2, %v698_v9 }
  0xcf   :  { %v415_v11 = vpop.f32.mrf.mxu0 }
  0xd0   :  { %v567_v12 = vmul.f32 %v4038_v15, %v415_v11 }
  0xd2   :  { %v635_v13 = vadd.f32 %v4043_v16, %v567_v12  ;;  %3179 = vmatmul.msk.bf16.gmra.mxu0 %vm285_vm1, %v3547_v10 }
  0xd4   :  { %v699_v14 = vmax.f32 %v635_v13, 0.0  ;;  %v1079_v13 = vld [vmem:[#allocation3 + $0x1] sm:$0xff] }
  0xd5   :  { %v902_v21 = vld [vmem:[#allocation2 + $0x30] ss:$2 sm:$0xff]  ;;  %v934_v22 = vld [vmem:[#allocation2 + $0x31] ss:$2 sm:$0xff] }
  0xd6   :  { %764 = vst.msk [vmem:[#allocation2 + $0x40] sm:$0xff] %vm755_vm2, %v699_v14  ;;  %v964_v26 = vmax.f32 %v902_v21, %v934_v22  ;;  %v4310_v14 = vld [vmem:[#allocation3 + $0x11] sm:$0xff]  ;;  %v3551_v22 = vld [vmem:[%s5153_s0 + $0x80] sm:$0xff] }
  0xd7   :  { %v417_v23 = vpop.f32.mrf.mxu0  ;;  %v3679_v20 = vpack.i.bf16 %v4310_v14, %v1079_v13 }
  0xd8   :  { %v568_v24 = vmul.f32 %v4038_v15, %v417_v23  ;;  %v980_v28 = vmax.f32 %v884_v25, %v964_v26  ;;  %v497_v25 = vpop.f32.mrf.mxu2 }
  0xda   :  { %v636_v27 = vadd.f32 %v4043_v16, %v568_v24  ;;  %1048 = vst.msk [vmem:[#allocation3 + $0x21] sm:$0xff] %vm755_vm2, %v980_v28 }
  0xdc   :  { %v700_v29 = vmax.f32 %v636_v27, 0.0 }
  0xde   :  { %765 = vst.msk [vmem:[#allocation2 + $0x48] sm:$0xff] %vm755_vm2, %v700_v29 }
  0xdf   :  { %v420_v32 = vpop.f32.mrf.mxu0 }
  0xe0   :  { %v569_v33 = vmul.f32 %v4038_v15, %v420_v32 }
  0xe1   :  { %v4257_v36 = vld [vmem:[#allocation3 + $0x22] sm:$0xff] }
  0xe2   :  { %v637_v35 = vadd.f32 %v4043_v16, %v569_v33  ;;  %3180 = vmatmul.msk.bf16.gmra.mxu0 %vm285_vm1, %v3548_v31  ;;  %v1112_v38 = vld [vmem:[#allocation3 + $0x20] sm:$0xff]  ;;  %v3664_v40 = vpack.i.bf16 %v4257_v36, %v4180_v0 }
  0xe3   :  { %v3689_v41 = vpack.i.bf16 %v1112_v38, %v4259_v37  ;;  %v4289_v2 = vld [vmem:[#allocation3 + $0x21] sm:$0xff] }
  0xe4   :  { %v701_v39 = vmax.f32 %v637_v35, 0.0  ;;  %3665 = vrot.lane.b32.xlu0 %v3664_v40, %s3927_s27  ;;  %v600_v35 = vmul.f32 %v4038_v15, %v497_v25 }
  0xe5   :  { %3690 = vrot.lane.b32.xlu2 %v3689_v41, %s3928_s29  ;;  %v824_v51 = vld [vmem:[#allocation2 + $0x40] ss:$2 sm:$0xff]  ;;  %v856_v52 = vld [vmem:[#allocation2 + $0x41] ss:$2 sm:$0xff]  ;;  %v667_v41 = vadd.f32 %v4043_v16, %v599_v34 }
  0xe6   :  { %766 = vst.msk [vmem:[#allocation2 + $0x50] sm:$0xff] %vm755_vm2, %v701_v39  ;;  %v885_v56 = vmax.f32 %v824_v51, %v856_v52  ;;  %v668_v42 = vadd.f32 %v4043_v16, %v600_v35 }
  0xe7   :  { %v422_v43 = vpop.f32.mrf.mxu0 }
  0xe8   :  { %v570_v44 = vmul.f32 %v4038_v15, %v422_v43  ;;  %v500_v43 = vpop.f32.mrf.mxu2 }
  0xea   :  { %v638_v45 = vadd.f32 %v4043_v16, %v570_v44  ;;  %v530_v44 = vpop.f32.mrf.mxu3 }
  0xec   :  { %v702_v46 = vmax.f32 %v638_v45, 0.0 }
  0xee   :  { %767 = vst.msk [vmem:[#allocation2 + $0x58] sm:$0xff] %vm755_vm2, %v702_v46  ;;  %v731_v46 = vmax.f32 %v667_v41, 0.0 }
  0xef   :  { %v425_v48 = vpop.f32.mrf.mxu0 }
  0xf0   :  { %v571_v49 = vmul.f32 %v4038_v15, %v425_v48  ;;  %796 = vst.msk [vmem:[#allocation2 + $0x140] sm:$0xff] %vm755_vm2, %v731_v46 }
  0xf2   :  { %v639_v50 = vadd.f32 %v4043_v16, %v571_v49  ;;  %3181 = vmatmul.msk.bf16.gmra.mxu0 %vm285_vm1, %v3549_v47  ;;  %v732_v47 = vmax.f32 %v668_v42, 0.0  ;;  %v3552_v49 = vld [vmem:[%s5153_s0 + $0x88] sm:$0xff] }
  0xf4   :  { %v703_v53 = vmax.f32 %v639_v50, 0.0  ;;  %797 = vst.msk [vmem:[#allocation2 + $0x148] sm:$0xff] %vm755_vm2, %v732_v47 }
  0xf5   :  { %v904_v54 = vld [vmem:[#allocation2 + $0x50] ss:$2 sm:$0xff]  ;;  %v936_v55 = vld [vmem:[#allocation2 + $0x51] ss:$2 sm:$0xff] }
  0xf6   :  { %v965_v57 = vmax.f32 %v904_v54, %v936_v55  ;;  %768 = vst.msk [vmem:[#allocation2 + $0x60] sm:$0xff] %vm755_vm2, %v703_v53  ;;  %v502_v53 = vpop.f32.mrf.mxu2  ;;  %v532_v54 = vpop.f32.mrf.mxu3 }
  0xf7   :  { %v427_v58 = vpop.f32.mrf.mxu0 }
  0xf8   :  { %v981_v59 = vmax.f32 %v885_v56, %v965_v57  ;;  %v572_v60 = vmul.f32 %v4038_v15, %v427_v58  ;;  %v601_v58 = vmul.f32 %v4038_v15, %v500_v43 }
  0xfa   :  { %1049 = vst.msk [vmem:[#allocation3 + $0x31] sm:$0xff] %vm755_vm2, %v981_v59  ;;  %v640_v61 = vadd.f32 %v4043_v16, %v572_v60  ;;  %v613_v59 = vmul.f32 %v4038_v15, %v530_v44  ;;  %v602_v60 = vmul.f32 %v4038_v15, %v502_v53 }
  0xfc   :  { %v704_v62 = vmax.f32 %v640_v61, 0.0 }
  0xfe   :  { %769 = vst.msk [vmem:[#allocation2 + $0x68] sm:$0xff] %vm755_vm2, %v704_v62  ;;  %v614_v62 = vmul.f32 %v4038_v15, %v532_v54 }
  0xff   :  { %v430_v0 = vpop.f32.mrf.mxu0 }
 0x100   :  { %v573_v1 = vmul.f32 %v4038_v15, %v430_v0  ;;  %v669_v0 = vadd.f32 %v4043_v16, %v601_v58 }
 0x101   :  { %v4291_v3 = vld [vmem:[#allocation3 + $0x32] sm:$0xff] }
 0x102   :  { %v1177_v4 = vld [vmem:[#allocation3 + $0x31] sm:$0xff]  ;;  %v641_v6 = vadd.f32 %v4043_v16, %v573_v1  ;;  %3182 = vmatmul.msk.bf16.gmra.mxu0 %vm285_vm1, %v3550_v63  ;;  %v1692_v7 = vpack.c.bf16 %v4291_v3, %v4257_v36  ;;  %v3709_v10 = vpack.i.bf16 %v4291_v3, %v4257_v36  ;;  %v681_v1 = vadd.f32 %v4043_v16, %v613_v59  ;;  %v3574_v36 = vld [vmem:[%s5154_s4 + $0x28] sm:$0xff] }
 0x103   :  { %v4293_v5 = vld [vmem:[#allocation3 + $0x30] sm:$0xff]  ;;  %v4300_v8 = vpack.i.bf16 %v1177_v4, %v4289_v2  ;;  %v670_v4 = vadd.f32 %v4043_v16, %v602_v60 }
 0x104   :  { %v3669_v9 = vpack.i.bf16 %v4293_v5, %v1112_v38  ;;  %v705_v11 = vmax.f32 %v641_v6, 0.0  ;;  %3271 = vmatmul.msk.bf16.vlgmr.msrb.gmra.mxu3 %vm755_vm2, %v1692_v7  ;;  %v682_v6 = vadd.f32 %v4043_v16, %v614_v62  ;;  %v485_v7 = vpop.f32.mrf.mxu1  ;;  %v745_v13 = vmax.f32 %v681_v1, 0.0  ;;  %v3584_v62 = vld [vmem:[%s5154_s4 + $0x78] sm:$0xff] }
 0x105   :  { %3675 = vrot.lane.b32.xlu1 %v4300_v8, %s3928_s29  ;;  %v826_v27 = vld [vmem:[#allocation2 + $0x60] ss:$2 sm:$0xff]  ;;  %v858_v28 = vld [vmem:[#allocation2 + $0x61] ss:$2 sm:$0xff]  ;;  %v734_v18 = vmax.f32 %v670_v4, 0.0  ;;  %1931 = vmatpush.bf16.msrb.mxu2 %v3584_v62 }
 0x106   :  { %3670 = vrot.lane.b32.xlu0 %v3669_v9, %s3926_s28  ;;  %770 = vst.msk [vmem:[#allocation2 + $0x70] sm:$0xff] %vm755_vm2, %v705_v11  ;;  %v886_v32 = vmax.f32 %v826_v27, %v858_v28  ;;  %v505_v9 = vpop.f32.mrf.mxu2 }
 0x107   :  { %v432_v12 = vpop.f32.mrf.mxu0  ;;  %810 = vst.msk [vmem:[#allocation2 + $0x1b0] sm:$0xff] %vm755_vm2, %v745_v13  ;;  %v603_v34 = vmul.f32 %v4038_v15, %v505_v9 }
 0x108   :  { %v574_v17 = vmul.f32 %v4038_v15, %v432_v12  ;;  %v733_v12 = vmax.f32 %v669_v0, 0.0  ;;  %799 = vst.msk [vmem:[#allocation2 + $0x158] sm:$0xff] %vm755_vm2, %v734_v18 }
 0x10a   :  { %v642_v19 = vadd.f32 %v4043_v16, %v574_v17  ;;  %v535_v17 = vpop.f32.mrf.mxu3  ;;  %798 = vst.msk [vmem:[#allocation2 + $0x150] sm:$0xff] %vm755_vm2, %v733_v12 }
 0x10b   :  { %v615_v35 = vmul.f32 %v4038_v15, %v535_v17 }
 0x10c   :  { %v706_v21 = vmax.f32 %v642_v19, 0.0 }
 0x10d   :  { %3680 = vrot.lane.b32.xlu1 %v3679_v20, %s3927_s27  ;;  %v746_v20 = vmax.f32 %v682_v6, 0.0  ;;  %v683_v46 = vadd.f32 %v4043_v16, %v615_v35 }
 0x10e   :  { %771 = vst.msk [vmem:[#allocation2 + $0x78] sm:$0xff] %vm755_vm2, %v706_v21 }
 0x10f   :  { %v435_v23 = vpop.f32.mrf.mxu0  ;;  %811 = vst.msk [vmem:[#allocation2 + $0x1b8] sm:$0xff] %vm755_vm2, %v746_v20 }
 0x110   :  { %v575_v24 = vmul.f32 %v4038_v15, %v435_v23  ;;  %v487_v23 = vpop.f32.mrf.mxu1 }
 0x112   :  { %v643_v26 = vadd.f32 %v4043_v16, %v575_v24  ;;  %3183 = vmatmul.msk.bf16.gmra.mxu0 %vm285_vm1, %v3551_v22  ;;  %v507_v24 = vpop.f32.mrf.mxu2  ;;  %v537_v27 = vpop.f32.mrf.mxu3 }
 0x113   :  { %v616_v41 = vmul.f32 %v4038_v15, %v537_v27 }
 0x114   :  { %v707_v29 = vmax.f32 %v643_v26, 0.0 }
 0x115   :  { %v906_v30 = vld [vmem:[#allocation2 + $0x70] ss:$2 sm:$0xff]  ;;  %v938_v31 = vld [vmem:[#allocation2 + $0x71] ss:$2 sm:$0xff]  ;;  %v684_v54 = vadd.f32 %v4043_v16, %v616_v41 }
 0x116   :  { %v966_v33 = vmax.f32 %v906_v30, %v938_v31  ;;  %772 = vst.msk [vmem:[#allocation2 + $0x80] sm:$0xff] %vm755_vm2, %v707_v29 }
 0x117   :  { %v437_v38 = vpop.f32.mrf.mxu0 }
 0x118   :  { %v576_v39 = vmul.f32 %v4038_v15, %v437_v38  ;;  %v982_v40 = vmax.f32 %v886_v32, %v966_v33  ;;  %v595_v33 = vmul.f32 %v4038_v15, %v485_v7 }
 0x11a   :  { %v644_v45 = vadd.f32 %v4043_v16, %v576_v39  ;;  %1050 = vst.msk [vmem:[#allocation3 + $0x41] sm:$0xff] %vm755_vm2, %v982_v40  ;;  %v596_v39 = vmul.f32 %v4038_v15, %v487_v23  ;;  %v604_v40 = vmul.f32 %v4038_v15, %v507_v24  ;;  %v663_v44 = vadd.f32 %v4043_v16, %v595_v33  ;;  %v3582_v33 = vld [vmem:[%s5154_s4 + $0x68] sm:$0xff] }
 0x11c   :  { %v708_v48 = vmax.f32 %v644_v45, 0.0  ;;  %v671_v45 = vadd.f32 %v4043_v16, %v603_v34  ;;  %v664_v47 = vadd.f32 %v4043_v16, %v596_v39  ;;  %v727_v53 = vmax.f32 %v663_v44, 0.0 }
 0x11e   :  { %773 = vst.msk [vmem:[#allocation2 + $0x88] sm:$0xff] %vm755_vm2, %v708_v48  ;;  %v672_v48 = vadd.f32 %v4043_v16, %v604_v40  ;;  %v728_v59 = vmax.f32 %v664_v47, 0.0 }
 0x11f   :  { %v440_v50 = vpop.f32.mrf.mxu0  ;;  %792 = vst.msk [vmem:[#allocation2 + $0x120] sm:$0xff] %vm755_vm2, %v727_v53  ;;  %v872_v53 = vld [vmem:[#allocation2 + $0x141] ss:$2 sm:$0xff] }
 0x120   :  { %v577_v51 = vmul.f32 %v4038_v15, %v440_v50  ;;  %v510_v50 = vpop.f32.mrf.mxu2  ;;  %v736_v60 = vmax.f32 %v672_v48, 0.0  ;;  %793 = vst.msk [vmem:[#allocation2 + $0x128] sm:$0xff] %vm755_vm2, %v728_v59 }
 0x121   :  { %v4338_v52 = vld [vmem:[#allocation3 + $0x42] sm:$0xff]  ;;  %v605_v23 = vmul.f32 %v4038_v15, %v510_v50 }
 0x122   :  { %v645_v55 = vadd.f32 %v4043_v16, %v577_v51  ;;  %3184 = vmatmul.msk.bf16.gmra.mxu0 %vm285_vm1, %v3552_v49  ;;  %v3694_v56 = vpack.i.bf16 %v4338_v52, %v4291_v3  ;;  %v490_v49 = vpop.f32.mrf.mxu1  ;;  %v4389_v1 = vld [vmem:[#allocation3 + $0x41] sm:$0xff]  ;;  %801 = vst.msk [vmem:[#allocation2 + $0x168] sm:$0xff] %vm755_vm2, %v736_v60  ;;  %v3580_v60 = vld [vmem:[%s5154_s4 + $0x58] sm:$0xff] }
 0x123   :  { %v1162_v4 = vld [vmem:[#allocation3 + $0x40] sm:$0xff] }
 0x124   :  { %v709_v57 = vmax.f32 %v645_v55, 0.0  ;;  %3695 = vrot.lane.b32.xlu0 %v3694_v56, %s3927_s27  ;;  %v540_v55 = vpop.f32.mrf.mxu3  ;;  %v735_v56 = vmax.f32 %v671_v45, 0.0  ;;  %v3719_v48 = vpack.i.bf16 %v1162_v4, %v4293_v5  ;;  %v952_v5 = vld [vmem:[#allocation2 + $0x151] ss:$2 sm:$0xff] }
 0x125   :  { %v828_v25 = vld [vmem:[#allocation2 + $0x80] ss:$2 sm:$0xff]  ;;  %v860_v26 = vld [vmem:[#allocation2 + $0x81] ss:$2 sm:$0xff] }
 0x126   :  { %774 = vst.msk [vmem:[#allocation2 + $0x90] sm:$0xff] %vm755_vm2, %v709_v57  ;;  %v887_v29 = vmax.f32 %v828_v25, %v860_v26  ;;  %v747_v57 = vmax.f32 %v683_v46, 0.0  ;;  %v840_v46 = vld [vmem:[#allocation2 + $0x140] ss:$2 sm:$0xff] }
 0x127   :  { %v442_v61 = vpop.f32.mrf.mxu0  ;;  %800 = vst.msk [vmem:[#allocation2 + $0x160] sm:$0xff] %vm755_vm2, %v735_v56  ;;  %v920_v56 = vld [vmem:[#allocation2 + $0x150] ss:$2 sm:$0xff]  ;;  %v870_v59 = vld [vmem:[#allocation2 + $0x121] ss:$2 sm:$0xff] }
 0x128   :  { %v578_v63 = vmul.f32 %v4038_v15, %v442_v61  ;;  %v748_v61 = vmax.f32 %v684_v54, 0.0  ;;  %812 = vst.msk [vmem:[#allocation2 + $0x1c0] sm:$0xff] %vm755_vm2, %v747_v57  ;;  %v512_v12 = vpop.f32.mrf.mxu2  ;;  %v973_v62 = vmax.f32 %v920_v56, %v952_v5 }
 0x129   :  { %v606_v25 = vmul.f32 %v4038_v15, %v512_v12 }
 0x12a   :  { %v646_v11 = vadd.f32 %v4043_v16, %v578_v63  ;;  %813 = vst.msk [vmem:[#allocation2 + $0x1c8] sm:$0xff] %vm755_vm2, %v748_v61  ;;  %v893_v61 = vmax.f32 %v840_v46, %v872_v53 }
 0x12c   :  { %v710_v19 = vmax.f32 %v646_v11, 0.0  ;;  %3700 = vrot.lane.b32.xlu0 %v4300_v8, %s3927_s27  ;;  %v492_v11 = vpop.f32.mrf.mxu1  ;;  %v542_v20 = vpop.f32.mrf.mxu3 }
 0x12d   :  { %v598_v24 = vmul.f32 %v4038_v15, %v492_v11 }
 0x12e   :  { %775 = vst.msk [vmem:[#allocation2 + $0x98] sm:$0xff] %vm755_vm2, %v710_v19 }
 0x12f   :  { %v445_v21 = vpop.f32.mrf.mxu0 }
 0x130   :  { %v579_v22 = vmul.f32 %v4038_v15, %v445_v21  ;;  %v3583_v21 = vld [vmem:[%s5154_s4 + $0x70] sm:$0xff]  ;;  %v515_v45 = vpop.f32.mrf.mxu2 }
 0x131   :  { %1932 = vmatpush.bf16.msrb.mxu2 %v3583_v21 }
 0x132   :  { %v647_v8 = vadd.f32 %v4043_v16, %v579_v22  ;;  %v597_v22 = vmul.f32 %v4038_v15, %v490_v49 }
 0x134   :  { %v711_v28 = vmax.f32 %v647_v8, 0.0  ;;  %v665_v27 = vadd.f32 %v4043_v16, %v597_v22  ;;  %v545_v50 = vpop.f32.mrf.mxu3 }
 0x135   :  { %v908_v30 = vld [vmem:[#allocation2 + $0x90] ss:$2 sm:$0xff]  ;;  %v940_v31 = vld [vmem:[#allocation2 + $0x91] ss:$2 sm:$0xff]  ;;  %1933 = vmatpush.bf16.msrb.mxu2 %v3582_v33 }
 0x136   :  { %v967_v32 = vmax.f32 %v908_v30, %v940_v31  ;;  %776 = vst.msk [vmem:[#allocation2 + $0xa0] sm:$0xff] %vm755_vm2, %v711_v28  ;;  %v673_v28 = vadd.f32 %v4043_v16, %v605_v23  ;;  %v674_v30 = vadd.f32 %v4043_v16, %v606_v25  ;;  %v617_v31 = vmul.f32 %v4038_v15, %v540_v55  ;;  %v3575_v55 = vld [vmem:[%s5154_s4 + $0x30] sm:$0xff] }
 0x137   :  { %v447_v38 = vpop.f32.mrf.mxu0  ;;  %v729_v35 = vmax.f32 %v665_v27, 0.0  ;;  %v3579_v23 = vld [vmem:[%s5154_s4 + $0x50] sm:$0xff]  ;;  %v989_v25 = vmax.f32 %v893_v61, %v973_v62  ;;  %v3570_v62 = vld [vmem:[%s5154_s4 + $0x8] sm:$0xff] }
 0x138   :  { %v580_v42 = vmul.f32 %v4038_v15, %v447_v38  ;;  %v983_v43 = vmax.f32 %v887_v29, %v967_v32  ;;  %v666_v29 = vadd.f32 %v4043_v16, %v598_v24  ;;  %v618_v32 = vmul.f32 %v4038_v15, %v542_v20  ;;  %v517_v11 = vpop.f32.mrf.mxu2  ;;  %v3573_v24 = vld [vmem:[%s5154_s4 + $0x20] sm:$0xff] }
 0x139   :  { %v737_v38 = vmax.f32 %v673_v28, 0.0  ;;  %v685_v40 = vadd.f32 %v4043_v16, %v617_v31  ;;  %794 = vst.msk [vmem:[#allocation2 + $0x130] sm:$0xff] %vm755_vm2, %v729_v35  ;;  %v607_v35 = vmul.f32 %v4038_v15, %v515_v45 }
 0x13a   :  { %v648_v51 = vadd.f32 %v4043_v16, %v580_v42  ;;  %1051 = vst.msk [vmem:[#allocation3 + $0x51] sm:$0xff] %vm755_vm2, %v983_v43  ;;  %v730_v41 = vmax.f32 %v666_v29, 0.0  ;;  %v3576_v42 = vld [vmem:[%s5154_s4 + $0x38] sm:$0xff]  ;;  %v738_v43 = vmax.f32 %v674_v30, 0.0  ;;  %v686_v44 = vadd.f32 %v4043_v16, %v618_v32 }
 0x13b   :  { %802 = vst.msk [vmem:[#allocation2 + $0x170] sm:$0xff] %vm755_vm2, %v737_v38  ;;  %v749_v49 = vmax.f32 %v685_v40, 0.0  ;;  %1882 = vmatpush.bf16.msrb.mxu1 %v3576_v42  ;;  %v619_v38 = vmul.f32 %v4038_v15, %v545_v50  ;;  %v3578_v42 = vld [vmem:[%s5154_s4 + $0x48] sm:$0xff] }
 0x13c   :  { %v712_v58 = vmax.f32 %v648_v51, 0.0  ;;  %v3581_v51 = vld [vmem:[%s5154_s4 + $0x60] sm:$0xff]  ;;  %795 = vst.msk [vmem:[#allocation2 + $0x138] sm:$0xff] %vm755_vm2, %v730_v41  ;;  %v750_v54 = vmax.f32 %v686_v44, 0.0  ;;  %v547_v20 = vpop.f32.mrf.mxu3 }
 0x13d   :  { %814 = vst.msk [vmem:[#allocation2 + $0x1d0] sm:$0xff] %vm755_vm2, %v749_v49  ;;  %1934 = vmatpush.bf16.msrb.mxu2 %v3581_v51  ;;  %v620_v41 = vmul.f32 %v4038_v15, %v547_v20 }
 0x13e   :  { %777 = vst.msk [vmem:[#allocation2 + $0xa8] sm:$0xff] %vm755_vm2, %v712_v58  ;;  %v838_v58 = vld [vmem:[#allocation2 + $0x120] ss:$2 sm:$0xff] }
 0x13f   :  { %v450_v63 = vpop.f32.mrf.mxu0  ;;  %803 = vst.msk [vmem:[#allocation2 + $0x178] sm:$0xff] %vm755_vm2, %v738_v43  ;;  %1883 = vmatpush.bf16.msrb.mxu1 %v3575_v55  ;;  %v3572_v43 = vld [vmem:[%s5154_s4 + $0x18] sm:$0xff]  ;;  %v688_v50 = vadd.f32 %v4043_v16, %v620_v41 }
 0x140   :  { %v581_v0 = vmul.f32 %v4038_v15, %v450_v63  ;;  %815 = vst.msk [vmem:[#allocation2 + $0x1d8] sm:$0xff] %vm755_vm2, %v750_v54  ;;  %v520_v51 = vpop.f32.mrf.mxu2 }
 0x141   :  { %v4392_v6 = vld [vmem:[#allocation3 + $0x52] sm:$0xff]  ;;  %1935 = vmatpush.bf16.msrb.mxu2 %v3580_v60  ;;  %1057 = vst.msk [vmem:[#allocation3 + $0xd1] sm:$0xff] %vm755_vm2, %v989_v25  ;;  %v752_v60 = vmax.f32 %v688_v50, 0.0 }
 0x142   :  { %v1179_v7 = vld [vmem:[#allocation3 + $0x51] sm:$0xff]  ;;  %v649_v13 = vadd.f32 %v4043_v16, %v581_v0  ;;  %v1695_v17 = vpack.c.bf16 %v4392_v6, %v4338_v52  ;;  %v3739_v8 = vpack.i.bf16 %v4392_v6, %v4338_v52  ;;  %v874_v0 = vld [vmem:[#allocation2 + $0x161] ss:$2 sm:$0xff] }
 0x143   :  { %v4394_v9 = vld [vmem:[#allocation3 + $0x50] sm:$0xff]  ;;  %v4401_v18 = vpack.i.bf16 %v1179_v7, %v4389_v1  ;;  %v892_v7 = vmax.f32 %v838_v58, %v870_v59  ;;  %1884 = vmatpush.bf16.msrb.mxu1 %v3574_v36  ;;  %817 = vst.msk [vmem:[#allocation2 + $0x1e8] sm:$0xff] %vm755_vm2, %v752_v60 }
 0x144   :  { %v3704_v19 = vpack.i.bf16 %v4394_v9, %v1162_v4  ;;  %v713_v26 = vmax.f32 %v649_v13, 0.0  ;;  %3272 = vmatmul.msk.bf16.gmra.mxu3 %vm755_vm2, %v1695_v17  ;;  %v918_v17 = vld [vmem:[#allocation2 + $0x130] ss:$2 sm:$0xff]  ;;  %v550_v5 = vpop.f32.mrf.mxu3 }
 0x145   :  { %3715 = vrot.lane.b32.xlu2 %v4401_v18, %s3928_s29  ;;  %v830_v4 = vld [vmem:[#allocation2 + $0xa0] ss:$2 sm:$0xff]  ;;  %v862_v12 = vld [vmem:[#allocation2 + $0xa1] ss:$2 sm:$0xff]  ;;  %1936 = vmatpush.bf16.msrb.mxu2 %v3579_v23  ;;  %v3571_v58 = vld [vmem:[%s5154_s4 + $0x10] sm:$0xff] }
 0x146   :  { %3705 = vrot.lane.b32.xlu1 %v3704_v19, %s3926_s28  ;;  %778 = vst.msk [vmem:[#allocation2 + $0xb0] sm:$0xff] %vm755_vm2, %v713_v26  ;;  %v950_v19 = vld [vmem:[#allocation2 + $0x131] ss:$2 sm:$0xff]  ;;  %v922_v27 = vld [vmem:[#allocation2 + $0x170] ss:$2 sm:$0xff]  ;;  %v888_v29 = vmax.f32 %v830_v4, %v862_v12  ;;  %v609_v4 = vmul.f32 %v4038_v15, %v520_v51 }
 0x147   :  { %v452_v34 = vpop.f32.mrf.mxu0  ;;  %v972_v22 = vmax.f32 %v918_v17, %v950_v19  ;;  %v954_v28 = vld [vmem:[#allocation2 + $0x171] ss:$2 sm:$0xff]  ;;  %1885 = vmatpush.bf16.msrb.mxu1 %v3573_v24 }
 0x148   :  { %v582_v39 = vmul.f32 %v4038_v15, %v452_v34  ;;  %v974_v32 = vmax.f32 %v922_v27, %v954_v28 }
 0x149   :  { %v988_v33 = vmax.f32 %v892_v7, %v972_v22  ;;  %1937 = vmatpush.bf16.msrb.mxu2 %v3578_v42 }
 0x14a   :  { %v650_v47 = vadd.f32 %v4043_v16, %v582_v39  ;;  %v608_v39 = vmul.f32 %v4038_v15, %v517_v11  ;;  %v3569_v11 = vld [vmem:[%s5154_s4] sm:$0xff] }
 0x14b   :  { %1056 = vst.msk [vmem:[#allocation3 + $0xc1] sm:$0xff] %vm755_vm2, %v988_v33  ;;  %1886 = vmatpush.bf16.msrb.mxu1 %v3572_v43 }
 0x14c   :  { %v714_v57 = vmax.f32 %v650_v47, 0.0  ;;  %v675_v47 = vadd.f32 %v4043_v16, %v607_v35  ;;  %v676_v49 = vadd.f32 %v4043_v16, %v608_v39  ;;  %v552_v19 = vpop.f32.mrf.mxu3 }
 0x14d   :  { %3720 = vrot.lane.b32.xlu2 %v3719_v48, %s3928_s29  ;;  %v687_v48 = vadd.f32 %v4043_v16, %v619_v38 }
 0x14e   :  { %3710 = vrot.lane.b32.xlu1 %v3709_v10, %s3926_s28  ;;  %779 = vst.msk [vmem:[#allocation2 + $0xb8] sm:$0xff] %vm755_vm2, %v714_v57  ;;  %v842_v10 = vld [vmem:[#allocation2 + $0x160] ss:$2 sm:$0xff]  ;;  %v739_v54 = vmax.f32 %v675_v47, 0.0  ;;  %v740_v56 = vmax.f32 %v676_v49, 0.0 }
 0x14f   :  { %v455_v63 = vpop.f32.mrf.mxu0  ;;  %v894_v21 = vmax.f32 %v842_v10, %v874_v0  ;;  %v751_v55 = vmax.f32 %v687_v48, 0.0  ;;  %v3577_v57 = vld [vmem:[%s5154_s4 + $0x40] sm:$0xff]  ;;  %1887 = vmatpush.bf16.msrb.mxu1 %v3571_v58 }
 0x150   :  { %v583_v3 = vmul.f32 %v4038_v15, %v455_v63  ;;  %804 = vst.msk [vmem:[#allocation2 + $0x180] sm:$0xff] %vm755_vm2, %v739_v54  ;;  %1938 = vmatpush.bf16.msrb.mxu2 %v3577_v57 }
 0x151   :  { %v990_v44 = vmax.f32 %v894_v21, %v974_v32  ;;  %816 = vst.msk [vmem:[#allocation2 + $0x1e0] sm:$0xff] %vm755_vm2, %v751_v55 }
 0x152   :  { %v651_v13 = vadd.f32 %v4043_v16, %v583_v3  ;;  %805 = vst.msk [vmem:[#allocation2 + $0x188] sm:$0xff] %vm755_vm2, %v740_v56  ;;  %v522_v3 = vpop.f32.mrf.mxu2 }
 0x153   :  { %1058 = vst.msk [vmem:[#allocation3 + $0xe1] sm:$0xff] %vm755_vm2, %v990_v44  ;;  %v610_v7 = vmul.f32 %v4038_v15, %v522_v3  ;;  %1888 = vmatpush.bf16.msrb.mxu1 %v3570_v62 }
 0x154   :  { %v715_v26 = vmax.f32 %v651_v13, 0.0  ;;  %v677_v13 = vadd.f32 %v4043_v16, %v609_v4 }
 0x155   :  { %v910_v30 = vld [vmem:[#allocation2 + $0xb0] ss:$2 sm:$0xff]  ;;  %v942_v31 = vld [vmem:[#allocation2 + $0xb1] ss:$2 sm:$0xff]  ;;  %v678_v17 = vadd.f32 %v4043_v16, %v610_v7 }
 0x156   :  { %v968_v34 = vmax.f32 %v910_v30, %v942_v31  ;;  %780 = vst.msk [vmem:[#allocation2 + $0xc0] sm:$0xff] %vm755_vm2, %v715_v26  ;;  %v741_v20 = vmax.f32 %v677_v13, 0.0  ;;  %v3666_v35 = vpop.permute.xlu0 %3665 }
 0x157   :  { %v457_v40 = vpop.f32.mrf.mxu0  ;;  %v742_v24 = vmax.f32 %v678_v17, 0.0  ;;  %1889 = vmatpush.bf16.msrb.mxu1 %v3569_v11  ;;  %v3668_v57 = vunpack.i.h.bf16 %v3666_v35  ;;  %v3667_v58 = vunpack.i.l.bf16 %v3666_v35  ;;  %v928_v35 = vld [vmem:[#allocation2 + $0x1d0] ss:$2 sm:$0xff] }
 0x158   :  { %v584_v45 = vmul.f32 %v4038_v15, %v457_v40  ;;  %v984_v46 = vmax.f32 %v888_v29, %v968_v34  ;;  %806 = vst.msk [vmem:[#allocation2 + $0x190] sm:$0xff] %vm755_vm2, %v741_v20  ;;  %v850_v40 = vld [vmem:[#allocation2 + $0x1e0] ss:$2 sm:$0xff]  ;;  %v882_v42 = vld [vmem:[#allocation2 + $0x1e1] ss:$2 sm:$0xff] }
 0x159   :  { %807 = vst.msk [vmem:[#allocation2 + $0x198] sm:$0xff] %vm755_vm2, %v742_v24  ;;  %v844_v33 = vld [vmem:[#allocation2 + $0x180] ss:$2 sm:$0xff]  ;;  %v876_v34 = vld [vmem:[#allocation2 + $0x181] ss:$2 sm:$0xff]  ;;  %v898_v50 = vmax.f32 %v850_v40, %v882_v42  ;;  %v1642_v24 = vsel %vm755_vm2, %v4310_v14, %v3667_v58 }
 0x15a   :  { %v652_v53 = vadd.f32 %v4043_v16, %v584_v45  ;;  %1052 = vst.msk [vmem:[#allocation3 + $0x61] sm:$0xff] %vm755_vm2, %v984_v46  ;;  %v525_v31 = vpop.f32.mrf.mxu2  ;;  %v895_v39 = vmax.f32 %v844_v33, %v876_v34  ;;  %v958_v14 = vld [vmem:[#allocation2 + $0x1b1] ss:$2 sm:$0xff]  ;;  %v880_v34 = vld [vmem:[#allocation2 + $0x1c1] ss:$2 sm:$0xff] }
 0x15b   :  { %v1063_v40 = vld [vmem:[#allocation3] sm:$0xff] }
 0x15c   :  { %v716_v59 = vmax.f32 %v652_v53, 0.0 }
 0x15e   :  { %781 = vst.msk [vmem:[#allocation2 + $0xc8] sm:$0xff] %vm755_vm2, %v716_v59 }
 0x15f   :  { %v460_v61 = vpop.f32.mrf.mxu0 }
 0x160   :  { %v585_v63 = vmul.f32 %v4038_v15, %v460_v61  ;;  %v4521_v15 = vld [vmem:[%s5151_s2] ss:$0 sm:$0xff]  ;;  %v924_v43 = vld [vmem:[#allocation2 + $0x190] ss:$2 sm:$0xff]  ;;  %v956_v44 = vld [vmem:[#allocation2 + $0x191] ss:$2 sm:$0xff] }
 0x161   :  { %v4504_v36 = vld [vmem:[#allocation3 + $0x62] sm:$0xff]  ;;  %v621_v21 = vmul.f32 %v4521_v15, %v550_v5  ;;  %v622_v22 = vmul.f32 %v4521_v15, %v552_v19  ;;  %v975_v45 = vmax.f32 %v924_v43, %v956_v44  ;;  %v611_v46 = vmul.f32 %v4521_v15, %v525_v31 }
 0x162   :  { %v653_v10 = vadd.f32 %v4043_v16, %v585_v63  ;;  %v3724_v0 = vpack.i.bf16 %v4504_v36, %v4392_v6  ;;  %v4530_v16 = vld [vmem:[%s5152_s3] ss:$0 sm:$0xff]  ;;  %v527_v47 = vpop.f32.mrf.mxu2  ;;  %v4548_v63 = vpop.permute.xlu2 %3685 }
 0x163   :  { %v689_v26 = vadd.f32 %v4530_v16, %v621_v21  ;;  %v690_v27 = vadd.f32 %v4530_v16, %v622_v22  ;;  %v612_v51 = vmul.f32 %v4521_v15, %v527_v47  ;;  %v991_v53 = vmax.f32 %v895_v39, %v975_v45 }
 0x164   :  { %v717_v12 = vmax.f32 %v653_v10, 0.0  ;;  %3725 = vrot.lane.b32.xlu0 %v3724_v0, %s3927_s27  ;;  %v679_v5 = vadd.f32 %v4530_v16, %v611_v46  ;;  %v3688_v42 = vunpack.i.h.bf16 %v4548_v63  ;;  %v3687_v43 = vunpack.i.l.bf16 %v4548_v63 }
 0x165   :  { %v753_v29 = vmax.f32 %v689_v26, 0.0  ;;  %v754_v30 = vmax.f32 %v690_v27, 0.0  ;;  %v832_v48 = vld [vmem:[#allocation2 + $0xc0] ss:$2 sm:$0xff]  ;;  %v864_v49 = vld [vmem:[#allocation2 + $0xc1] ss:$2 sm:$0xff]  ;;  %v680_v62 = vadd.f32 %v4530_v16, %v612_v51 }
 0x166   :  { %782 = vst.msk [vmem:[#allocation2 + $0xd0] sm:$0xff] %vm755_vm2, %v717_v12  ;;  %v889_v3 = vmax.f32 %v832_v48, %v864_v49  ;;  %v743_v4 = vmax.f32 %v679_v5, 0.0  ;;  %v4571_v51 = vld [vmem:[#allocation3 + $0x60] sm:$0xff] }
 0x167   :  { %v462_v23 = vpop.f32.mrf.mxu0  ;;  %818 = vst.msk [vmem:[#allocation2 + $0x1f0] sm:$0xff] %vm755_vm2, %v753_v29  ;;  %v744_v19 = vmax.f32 %v680_v62, 0.0  ;;  %v926_v29 = vld [vmem:[#allocation2 + $0x1b0] ss:$2 sm:$0xff] }
 0x168   :  { %v586_v25 = vmul.f32 %v4521_v15, %v462_v23  ;;  %819 = vst.msk [vmem:[#allocation2 + $0x1f8] sm:$0xff] %vm755_vm2, %v754_v30  ;;  %v976_v46 = vmax.f32 %v926_v29, %v958_v14 }
 0x169   :  { %1059 = vst.msk [vmem:[#allocation3 + $0xf1] sm:$0xff] %vm755_vm2, %v991_v53 }
 0x16a   :  { %v654_v28 = vadd.f32 %v4530_v16, %v586_v25  ;;  %808 = vst.msk [vmem:[#allocation2 + $0x1a0] sm:$0xff] %vm755_vm2, %v743_v4  ;;  %v1643_v25 = vsel %vm755_vm2, %v4289_v2, %v3668_v57  ;;  %v3691_v39 = vpop.permute.xlu2 %3690 }
 0x16b   :  { %809 = vst.msk [vmem:[#allocation2 + $0x1a8] sm:$0xff] %vm755_vm2, %v744_v19  ;;  %v3693_v53 = vunpack.i.h.bf16 %v3691_v39 }
 0x16c   :  { %v718_v32 = vmax.f32 %v654_v28, 0.0  ;;  %3730 = vrot.lane.b32.xlu0 %v4401_v18, %s3927_s27 }
 0x16e   :  { %783 = vst.msk [vmem:[#allocation2 + $0xd8] sm:$0xff] %vm755_vm2, %v718_v32  ;;  %v848_v32 = vld [vmem:[#allocation2 + $0x1c0] ss:$2 sm:$0xff] }
 0x16f   :  { %v465_v38 = vpop.f32.mrf.mxu0  ;;  %v930_v55 = vld [vmem:[#allocation2 + $0x1f0] ss:$2 sm:$0xff]  ;;  %v962_v56 = vld [vmem:[#allocation2 + $0x1f1] ss:$2 sm:$0xff]  ;;  %v897_v47 = vmax.f32 %v848_v32, %v880_v34 }
 0x170   :  { %v587_v41 = vmul.f32 %v4521_v15, %v465_v38  ;;  %v978_v61 = vmax.f32 %v930_v55, %v962_v56  ;;  %v960_v38 = vld [vmem:[#allocation2 + $0x1d1] ss:$2 sm:$0xff] }
 0x171   :  { %v977_v48 = vmax.f32 %v928_v35, %v960_v38  ;;  %v1199_v34 = vld [vmem:[#allocation3 + $0x92] sm:$0xff] }
 0x172   :  { %v655_v18 = vadd.f32 %v4530_v16, %v587_v41  ;;  %v994_v17 = vmax.f32 %v898_v50, %v978_v61  ;;  %v4569_v50 = vld [vmem:[#allocation3 + $0x61] sm:$0xff]  ;;  %v1183_v35 = vld [vmem:[#allocation3 + $0x91] sm:$0xff] }
 0x173   :  { %v846_v62 = vld [vmem:[#allocation2 + $0x1a0] ss:$2 sm:$0xff]  ;;  %v878_v63 = vld [vmem:[#allocation2 + $0x1a1] ss:$2 sm:$0xff]  ;;  %v1167_v38 = vld [vmem:[#allocation3 + $0x90] sm:$0xff] }
 0x174   :  { %v719_v54 = vmax.f32 %v655_v18, 0.0  ;;  %1062 = vst.msk [vmem:[#allocation3 + $0x121] sm:$0xff] %vm755_vm2, %v994_v17 }
 0x175   :  { %v912_v59 = vld [vmem:[#allocation2 + $0xd0] ss:$2 sm:$0xff]  ;;  %v944_v60 = vld [vmem:[#allocation2 + $0xd1] ss:$2 sm:$0xff] }
 0x176   :  { %v969_v10 = vmax.f32 %v912_v59, %v944_v60  ;;  %784 = vst.msk [vmem:[#allocation2 + $0xe0] sm:$0xff] %vm755_vm2, %v719_v54  ;;  %v3692_v54 = vunpack.i.l.bf16 %v3691_v39 }
 0x177   :  { %v3676_v0 = vpop.permute.xlu1 %3675  ;;  %v467_v13 = vpop.f32.mrf.mxu0 }
 0x178   :  { %v3678_v7 = vunpack.i.h.bf16 %v3676_v0  ;;  %v3677_v11 = vunpack.i.l.bf16 %v3676_v0  ;;  %v3671_v12 = vpop.permute.xlu0 %3670  ;;  %v588_v22 = vmul.f32 %v4521_v15, %v467_v13  ;;  %v985_v23 = vmax.f32 %v889_v3, %v969_v10 }
 0x179   :  { %v3673_v20 = vunpack.i.h.bf16 %v3671_v12  ;;  %v3672_v21 = vunpack.i.l.bf16 %v3671_v12  ;;  %v896_v0 = vmax.f32 %v846_v62, %v878_v63  ;;  %v993_v12 = vmax.f32 %v897_v47, %v977_v48 }
 0x17a   :  { %v656_v28 = vadd.f32 %v4530_v16, %v588_v22  ;;  %1053 = vst.msk [vmem:[#allocation3 + $0x71] sm:$0xff] %vm755_vm2, %v985_v23  ;;  %v3749_v22 = vpack.i.bf16 %v4571_v51, %v4394_v9 }
 0x17b   :  { %v1659_v26 = vsel %vm1608_vm5, %v1643_v25, %v3673_v20  ;;  %v1658_v27 = vsel %vm1608_vm5, %v1642_v24, %v3672_v21  ;;  %v992_v17 = vmax.f32 %v896_v0, %v976_v46  ;;  %1061 = vst.msk [vmem:[#allocation3 + $0x111] sm:$0xff] %vm755_vm2, %v993_v12 }
 0x17c   :  { %v1674_v30 = vsel %vm1625_vm6, %v1658_v27, %v3677_v11  ;;  %v1675_v31 = vsel %vm1625_vm6, %v1659_v26, %v3678_v7  ;;  %v720_v2 = vmax.f32 %v656_v28, 0.0 }
 0x17d   :  { %v1691_v33 = vpack.c.bf16 %v1675_v31, %v1674_v30  ;;  %1060 = vst.msk [vmem:[#allocation3 + $0x101] sm:$0xff] %vm755_vm2, %v992_v17 }
 0x17e   :  { %785 = vst.msk [vmem:[#allocation2 + $0xe8] sm:$0xff] %vm755_vm2, %v720_v2 }
 0x17f   :  { %1939 = vmatmul.bf16.vlgmr.msrb.gmra.mxu2 %v1691_v33  ;;  %v3681_v41 = vpop.permute.xlu1 %3680  ;;  %v470_v18 = vpop.f32.mrf.mxu0 }
 0x180   :  { %v3683_v44 = vunpack.i.h.bf16 %v3681_v41  ;;  %v3682_v45 = vunpack.i.l.bf16 %v3681_v41  ;;  %v589_v49 = vmul.f32 %v4521_v15, %v470_v18 }
 0x181   :  { %v4576_v5 = vld [vmem:[#allocation3 + $0x72] sm:$0xff] }
 0x182   :  { %v1593_v55 = vsel %vm755_vm2, %v4259_v37, %v3683_v44  ;;  %v1592_v56 = vsel %vm755_vm2, %v1063_v40, %v3682_v45  ;;  %v4578_v57 = vld [vmem:[#allocation3 + $0x71] sm:$0xff]  ;;  %v657_v59 = vadd.f32 %v4530_v16, %v589_v49  ;;  %v1698_v60 = vpack.c.bf16 %v4576_v5, %v4504_v36 }
 0x183   :  { %v4580_v58 = vld [vmem:[#allocation3 + $0x70] sm:$0xff]  ;;  %v4587_v61 = vpack.i.bf16 %v4578_v57, %v4569_v50  ;;  %v1609_v3 = vsel %vm1608_vm5, %v1592_v56, %v3687_v43  ;;  %v1610_v10 = vsel %vm1608_vm5, %v1593_v55, %v3688_v42  ;;  %v3769_v55 = vpack.i.bf16 %v4576_v5, %v4504_v36  ;;  %v4648_v36 = vld [vmem:[#allocation3 + $0xc0] sm:$0xff] }
 0x184   :  { %v3734_v37 = vpack.i.bf16 %v4580_v58, %v4571_v51  ;;  %v721_v4 = vmax.f32 %v657_v59, 0.0  ;;  %3273 = vmatmul.msk.bf16.gmra.mxu3 %vm755_vm2, %v1698_v60  ;;  %v1626_v7 = vsel %vm1625_vm6, %v1609_v3, %v3692_v54  ;;  %v1627_v11 = vsel %vm1625_vm6, %v1610_v10, %v3693_v53  ;;  %v4640_v59 = vld [vmem:[#allocation3 + $0xd2] sm:$0xff] }
 0x185   :  { %3745 = vrot.lane.b32.xlu2 %v4587_v61, %s3928_s29  ;;  %v1690_v13 = vpack.c.bf16 %v1627_v11, %v1626_v7  ;;  %v834_v27 = vld [vmem:[#allocation2 + $0xe0] ss:$2 sm:$0xff]  ;;  %v866_v28 = vld [vmem:[#allocation2 + $0xe1] ss:$2 sm:$0xff]  ;;  %v4646_v60 = vld [vmem:[#allocation3 + $0xd1] sm:$0xff] }
 0x186   :  { %3735 = vrot.lane.b32.xlu1 %v3734_v37, %s3926_s28  ;;  %786 = vst.msk [vmem:[#allocation2 + $0xf0] sm:$0xff] %vm755_vm2, %v721_v4  ;;  %v890_v31 = vmax.f32 %v834_v27, %v866_v28 }
 0x187   :  { %1890 = vmatmul.bf16.vlgmr.msrb.gmra.mxu1 %v1690_v13  ;;  %v472_v19 = vpop.f32.mrf.mxu0 }
 0x188   :  { %v590_v20 = vmul.f32 %v4521_v15, %v472_v19 }
 0x18a   :  { %v658_v21 = vadd.f32 %v4530_v16, %v590_v20 }
 0x18c   :  { %v722_v23 = vmax.f32 %v658_v21, 0.0 }
 0x18d   :  { %3750 = vrot.lane.b32.xlu2 %v3749_v22, %s3928_s29 }
 0x18e   :  { %3740 = vrot.lane.b32.xlu1 %v3739_v8, %s3926_s28  ;;  %787 = vst.msk [vmem:[#allocation2 + $0xf8] sm:$0xff] %vm755_vm2, %v722_v23  ;;  %v3923_v23 = vld [vmem:[#allocation3 + $0x31] sm:$0xff] }
 0x18f   :  { %v475_v24 = vpop.f32.mrf.mxu0 }
 0x190   :  { %v591_v25 = vmul.f32 %v4521_v15, %v475_v24 }
 0x192   :  { %v659_v26 = vadd.f32 %v4530_v16, %v591_v25 }
 0x194   :  { %v723_v29 = vmax.f32 %v659_v26, 0.0 }
 0x195   :  { %v914_v30 = vld [vmem:[#allocation2 + $0xf0] ss:$2 sm:$0xff]  ;;  %v946_v9 = vld [vmem:[#allocation2 + $0xf1] ss:$2 sm:$0xff] }
 0x196   :  { %v970_v14 = vmax.f32 %v914_v30, %v946_v9  ;;  %788 = vst.msk [vmem:[#allocation2 + $0x100] sm:$0xff] %vm755_vm2, %v723_v29  ;;  %v3696_v37 = vpop.permute.xlu0 %3695 }
 0x197   :  { %v477_v32 = vpop.f32.mrf.mxu0  ;;  %v3698_v4 = vunpack.i.h.bf16 %v3696_v37  ;;  %v3697_v7 = vunpack.i.l.bf16 %v3696_v37 }
 0x198   :  { %v592_v52 = vmul.f32 %v4521_v15, %v477_v32  ;;  %v986_v6 = vmax.f32 %v890_v31, %v970_v14 }
 0x199   :  { %v1644_v24 = vsel %vm755_vm2, %v3923_v23, %v3697_v7  ;;  %v1645_v25 = vsel %vm755_vm2, %v4389_v1, %v3698_v4  ;;  %v4701_v4 = vld [vmem:[#allocation3 + $0xe0] sm:$0xff] }
 0x19a   :  { %v660_v8 = vadd.f32 %v4530_v16, %v592_v52  ;;  %1054 = vst.msk [vmem:[#allocation3 + $0x81] sm:$0xff] %vm755_vm2, %v986_v6  ;;  %v4672_v6 = vld [vmem:[#allocation3 + $0xf2] sm:$0xff]  ;;  %v4721_v23 = vld [vmem:[#allocation3 + $0x101] sm:$0xff] }
 0x19c   :  { %v724_v2 = vmax.f32 %v660_v8, 0.0 }
 0x19e   :  { %789 = vst.msk [vmem:[#allocation2 + $0x108] sm:$0xff] %vm755_vm2, %v724_v2  ;;  %v3701_v28 = vpop.permute.xlu0 %3700  ;;  %v4674_v2 = vld [vmem:[#allocation3 + $0xe2] sm:$0xff] }
 0x19f   :  { %v480_v33 = vpop.f32.mrf.mxu0  ;;  %v3716_v0 = vpop.permute.xlu2 %3715  ;;  %v3703_v32 = vunpack.i.h.bf16 %v3701_v28  ;;  %v3702_v52 = vunpack.i.l.bf16 %v3701_v28  ;;  %v1206_v28 = vld [vmem:[#allocation3 + $0x122] sm:$0xff] }
 0x1a0   :  { %v593_v39 = vmul.f32 %v4521_v15, %v480_v33  ;;  %v3718_v26 = vunpack.i.h.bf16 %v3716_v0  ;;  %v3717_v27 = vunpack.i.l.bf16 %v3716_v0  ;;  %v1103_v33 = vld [vmem:[#allocation3 + $0xa2] sm:$0xff]  ;;  %v4699_v0 = vld [vmem:[#allocation3 + $0xf0] sm:$0xff] }
 0x1a1   :  { %v1198_v40 = vld [vmem:[#allocation3 + $0x82] sm:$0xff] }
 0x1a2   :  { %v4620_v41 = vld [vmem:[#allocation3 + $0x81] sm:$0xff]  ;;  %v661_v43 = vadd.f32 %v4530_v16, %v593_v39  ;;  %v1701_v44 = vpack.c.bf16 %v1199_v34, %v1198_v40  ;;  %v3754_v46 = vpack.i.bf16 %v1198_v40, %v4576_v5  ;;  %v4650_v5 = vld [vmem:[#allocation3 + $0xd0] sm:$0xff]  ;;  %v1707_v39 = vpack.c.bf16 %v4672_v6, %v4674_v2 }
 0x1a3   :  { %v1166_v42 = vld [vmem:[#allocation3 + $0x80] sm:$0xff]  ;;  %v3779_v45 = vpack.i.bf16 %v1183_v35, %v4620_v41  ;;  %v3774_v10 = vpack.i.bf16 %v4650_v5, %v4648_v36  ;;  %v3924_v40 = vld [vmem:[#allocation3 + $0x30] sm:$0xff] }
 0x1a4   :  { %v3764_v18 = vpack.i.bf16 %v1167_v38, %v1166_v42  ;;  %v725_v47 = vmax.f32 %v661_v43, 0.0  ;;  %3274 = vmatmul.msk.bf16.gmra.mxu3 %vm755_vm2, %v1701_v44  ;;  %3755 = vrot.lane.b32.xlu0 %v3754_v46, %s3927_s27  ;;  %v3784_v54 = vpack.i.bf16 %v1166_v42, %v4580_v58  ;;  %v1065_v34 = vld [vmem:[#allocation3 + $0x20] sm:$0xff]  ;;  %v1595_v42 = vsel %vm755_vm2, %v3924_v40, %v3703_v32  ;;  %v1175_v32 = vld [vmem:[#allocation3 + $0x130] sm:$0xff] }
 0x1a5   :  { %3780 = vrot.lane.b32.xlu2 %v3779_v45, %s3928_s29  ;;  %v836_v63 = vld [vmem:[#allocation2 + $0x100] ss:$2 sm:$0xff]  ;;  %v868_v3 = vld [vmem:[#allocation2 + $0x101] ss:$2 sm:$0xff]  ;;  %v1594_v43 = vsel %vm755_vm2, %v1065_v34, %v3702_v52 }
 0x1a6   :  { %3765 = vrot.lane.b32.xlu1 %v3764_v18, %s3926_s28  ;;  %790 = vst.msk [vmem:[#allocation2 + $0x110] sm:$0xff] %vm755_vm2, %v725_v47  ;;  %v891_v13 = vmax.f32 %v836_v63, %v868_v3  ;;  %v4695_v3 = vld [vmem:[#allocation3 + $0xe1] sm:$0xff] }
 0x1a7   :  { %v482_v48 = vpop.f32.mrf.mxu0  ;;  %v3721_v8 = vpop.permute.xlu2 %3720  ;;  %v1174_v52 = vld [vmem:[#allocation3 + $0x120] sm:$0xff] }
 0x1a8   :  { %v594_v49 = vmul.f32 %v4521_v15, %v482_v48  ;;  %v4642_v15 = vld [vmem:[#allocation3 + $0xc2] sm:$0xff]  ;;  %v3723_v44 = vunpack.i.h.bf16 %v3721_v8  ;;  %v3722_v45 = vunpack.i.l.bf16 %v3721_v8 }
 0x1a9   :  { %v1704_v62 = vpack.c.bf16 %v4640_v59, %v4642_v15 }
 0x1aa   :  { %v662_v53 = vadd.f32 %v4530_v16, %v594_v49  ;;  %v4644_v16 = vld [vmem:[#allocation3 + $0xc1] sm:$0xff] }
 0x1ac   :  { %v726_v56 = vmax.f32 %v662_v53, 0.0  ;;  %3760 = vrot.lane.b32.xlu0 %v4587_v61, %s3927_s27  ;;  %v4656_v61 = vpack.i.bf16 %v4646_v60, %v4644_v16 }
 0x1ad   :  { %3785 = vrot.lane.b32.xlu2 %v3784_v54, %s3928_s29 }
 0x1ae   :  { %3770 = vrot.lane.b32.xlu1 %v3769_v55, %s3926_s28  ;;  %791 = vst.msk [vmem:[#allocation2 + $0x118] sm:$0xff] %vm755_vm2, %v726_v56 }
 0x1b4   :  { %3275 = vmatmul.msk.bf16.gmra.mxu3 %vm755_vm2, %v1704_v62  ;;  %v1087_v62 = vld [vmem:[#allocation3 + $0xa1] sm:$0xff] }
 0x1b5   :  { %3790 = vrot.lane.b32.xlu2 %v4656_v61, %s3928_s29  ;;  %v916_v11 = vld [vmem:[#allocation2 + $0x110] ss:$2 sm:$0xff]  ;;  %v948_v12 = vld [vmem:[#allocation2 + $0x111] ss:$2 sm:$0xff] }
 0x1b6   :  { %3775 = vrot.lane.b32.xlu1 %v3774_v10, %s3926_s28  ;;  %v971_v17 = vmax.f32 %v916_v11, %v948_v12  ;;  %v4697_v10 = vld [vmem:[#allocation3 + $0xf1] sm:$0xff]  ;;  %v3814_v12 = vpack.i.bf16 %v4699_v0, %v4701_v4 }
 0x1b7   :  { %v3824_v11 = vpack.i.bf16 %v4697_v10, %v4695_v3 }
 0x1b8   :  { %v3706_v19 = vpop.permute.xlu1 %3705  ;;  %v987_v22 = vmax.f32 %v891_v13, %v971_v17  ;;  %v1204_v13 = vld [vmem:[#allocation3 + $0x102] sm:$0xff]  ;;  %v1205_v17 = vld [vmem:[#allocation3 + $0x112] sm:$0xff] }
 0x1b9   :  { %v3708_v20 = vunpack.i.h.bf16 %v3706_v19  ;;  %v3707_v21 = vunpack.i.l.bf16 %v3706_v19  ;;  %v1710_v19 = vpack.c.bf16 %v1205_v17, %v1204_v13  ;;  %v3894_v34 = vpack.i.bf16 %v1205_v17, %v1204_v13 }
 0x1ba   :  { %1055 = vst.msk [vmem:[#allocation3 + $0xb1] sm:$0xff] %vm755_vm2, %v987_v22  ;;  %v3834_v22 = vpack.i.bf16 %v4640_v59, %v4642_v15 }
 0x1bb   :  { %v1660_v29 = vsel %vm1608_vm5, %v1644_v24, %v3707_v21  ;;  %v1661_v30 = vsel %vm1608_vm5, %v1645_v25, %v3708_v20  ;;  %v3804_v20 = vpack.i.bf16 %v4674_v2, %v4640_v59  ;;  %v3839_v21 = vpack.i.bf16 %v4701_v4, %v4650_v5  ;;  %v4723_v24 = vld [vmem:[#allocation3 + $0x111] sm:$0xff]  ;;  %v4725_v25 = vld [vmem:[#allocation3 + $0x100] sm:$0xff] }
 0x1bc   :  { %v1676_v9 = vsel %vm1625_vm6, %v1660_v29, %v3717_v27  ;;  %v1677_v31 = vsel %vm1625_vm6, %v1661_v30, %v3718_v26  ;;  %v4727_v26 = vld [vmem:[#allocation3 + $0x110] sm:$0xff]  ;;  %v3854_v27 = vpack.i.bf16 %v4723_v24, %v4721_v23  ;;  %v3844_v30 = vpack.i.bf16 %v1204_v13, %v4672_v6 }
 0x1bd   :  { %v1694_v14 = vpack.c.bf16 %v1677_v31, %v1676_v9  ;;  %v3849_v59 = vpack.i.bf16 %v4727_v26, %v4725_v25  ;;  %v3869_v9 = vpack.i.bf16 %v4725_v25, %v4699_v0  ;;  %v3864_v31 = vpack.i.bf16 %v4672_v6, %v4674_v2  ;;  %v1068_v13 = vld [vmem:[#allocation3 + $0x50] sm:$0xff] }
 0x1be   :  { %v3874_v2 = vpack.i.bf16 %v1206_v28, %v1205_v17 }
 0x1bf   :  { %1944 = vmatmul.bf16.gmra.mxu2 %v1694_v14  ;;  %v1191_v14 = vld [vmem:[#allocation3 + $0x131] sm:$0xff] }
 0x1c0   :  { %v3711_v1 = vpop.permute.xlu1 %3710 }
 0x1c1   :  { %v3713_v35 = vunpack.i.h.bf16 %v3711_v1  ;;  %v3712_v38 = vunpack.i.l.bf16 %v3711_v1  ;;  %v1151_v18 = vld [vmem:[#allocation3 + $0xb2] sm:$0xff]  ;;  %v3879_v1 = vpack.i.bf16 %v1175_v32, %v1174_v52 }
 0x1c2   :  { %v4680_v46 = vld [vmem:[#allocation3 + $0xb0] sm:$0xff]  ;;  %v3794_v47 = vpack.i.bf16 %v4642_v15, %v1151_v18  ;;  %v3809_v49 = vpack.i.bf16 %v1151_v18, %v1103_v33  ;;  %v3899_v33 = vpack.i.bf16 %v1174_v52, %v4727_v26  ;;  %v4773_v52 = vld [vmem:[%s5155_s5] ss:$0 sm:$0xff] }
 0x1c3   :  { %v3819_v48 = vpack.i.bf16 %v4648_v36, %v4680_v46  ;;  %v1611_v53 = vsel %vm1608_vm5, %v1594_v43, %v3712_v38  ;;  %v1612_v54 = vsel %vm1608_vm5, %v1595_v42, %v3713_v35  ;;  %v4693_v63 = vld [vmem:[#allocation3 + $0xb1] sm:$0xff] }
 0x1c4   :  { %v1628_v55 = vsel %vm1625_vm6, %v1611_v53, %v3722_v45  ;;  %3276 = vmatmul.msk.bf16.gmra.mxu3 %vm755_vm2, %v1707_v39  ;;  %3795 = vrot.lane.b32.xlu0 %v3794_v47, %s3927_s27  ;;  %v1629_v56 = vsel %vm1625_vm6, %v1612_v54, %v3723_v44  ;;  %v3799_v7 = vpack.i.bf16 %v4693_v63, %v1087_v62  ;;  %v1207_v15 = vld [vmem:[#allocation3 + $0x132] sm:$0xff] }
 0x1c5   :  { %3820 = vrot.lane.b32.xlu2 %v3819_v48, %s3928_s29  ;;  %3810 = vrot.lane.b32.xlu1 %v3809_v49, %s3926_s28  ;;  %v1693_v37 = vpack.c.bf16 %v1629_v56, %v1628_v55  ;;  %v1713_v29 = vpack.c.bf16 %v1207_v15, %v1206_v28  ;;  %v1131_v42 = vld [vmem:[#allocation3 + $0x51] sm:$0xff] }
 0x1c7   :  { %1895 = vmatmul.bf16.gmra.mxu1 %v1693_v37 }
 0x1cc   :  { %3800 = vrot.lane.b32.xlu0 %v3799_v7, %s3927_s27 }
 0x1cd   :  { %3825 = vrot.lane.b32.xlu2 %v3824_v11, %s3928_s29  ;;  %3815 = vrot.lane.b32.xlu1 %v3814_v12, %s3926_s28 }
 0x1d4   :  { %3277 = vmatmul.msk.bf16.gmra.mxu3 %vm755_vm2, %v1710_v19  ;;  %3805 = vrot.lane.b32.xlu0 %v3804_v20, %s3927_s27 }
 0x1d5   :  { %3840 = vrot.lane.b32.xlu2 %v3839_v21, %s3928_s29  ;;  %3835 = vrot.lane.b32.xlu1 %v3834_v22, %s3926_s28 }
 0x1d6   :  { %v3726_v6 = vpop.permute.xlu0 %3725 }
 0x1d7   :  { %v3728_v38 = vunpack.i.h.bf16 %v3726_v6  ;;  %v3727_v39 = vunpack.i.l.bf16 %v3726_v6 }
 0x1d9   :  { %v1646_v45 = vsel %vm755_vm2, %v1131_v42, %v3727_v39  ;;  %v1647_v18 = vsel %vm755_vm2, %v4569_v50, %v3728_v38  ;;  %v1067_v50 = vld [vmem:[#allocation3 + $0x40] sm:$0xff] }
 0x1dc   :  { %3830 = vrot.lane.b32.xlu0 %v4656_v61, %s3927_s27  ;;  %v4746_v61 = vld [vmem:[#allocation3 + $0x121] sm:$0xff] }
 0x1dd   :  { %3855 = vrot.lane.b32.xlu2 %v3854_v27, %s3928_s29  ;;  %3850 = vrot.lane.b32.xlu1 %v3849_v59, %s3926_s28  ;;  %v3884_v8 = vpack.i.bf16 %v1191_v14, %v4746_v61 }
 0x1de   :  { %v3731_v49 = vpop.permute.xlu0 %3730 }
 0x1df   :  { %v3746_v35 = vpop.permute.xlu2 %3745  ;;  %v3733_v62 = vunpack.i.h.bf16 %v3731_v49  ;;  %v3732_v7 = vunpack.i.l.bf16 %v3731_v49 }
 0x1e0   :  { %v3748_v47 = vunpack.i.h.bf16 %v3746_v35  ;;  %v3747_v48 = vunpack.i.l.bf16 %v3746_v35 }
 0x1e1   :  { %v1597_v20 = vsel %vm755_vm2, %v1068_v13, %v3733_v62  ;;  %v1596_v21 = vsel %vm755_vm2, %v1067_v50, %v3732_v7 }
 0x1e4   :  { %3278 = vmatmul.msk.bf16.gmra.mxu3 %vm755_vm2, %v1713_v29  ;;  %3845 = vrot.lane.b32.xlu0 %v3844_v30, %s3927_s27 }
 0x1e5   :  { %3870 = vrot.lane.b32.xlu2 %v3869_v9, %s3928_s29  ;;  %3865 = vrot.lane.b32.xlu1 %v3864_v31, %s3926_s28  ;;  %v1989_v9 = vpop.f32.mrf.mxu3 }
 0x1ec   :  { %3860 = vrot.lane.b32.xlu0 %v3824_v11, %s3927_s27  ;;  %v3751_v11 = vpop.permute.xlu2 %3750 }
 0x1ed   :  { %3885 = vrot.lane.b32.xlu2 %v3884_v8, %s3928_s29  ;;  %3880 = vrot.lane.b32.xlu1 %v3879_v1, %s3926_s28  ;;  %v3753_v22 = vunpack.i.h.bf16 %v3751_v11  ;;  %v3752_v59 = vunpack.i.l.bf16 %v3751_v11  ;;  %v4778_v1 = vld [vmem:[%s5156_s6] ss:$0 sm:$0xff]  ;;  %v1991_v39 = vpop.f32.mrf.mxu3 }
 0x1f4   :  { %3875 = vrot.lane.b32.xlu0 %v3874_v2, %s3927_s27 }
 0x1f5   :  { %3900 = vrot.lane.b32.xlu2 %v3899_v33, %s3928_s29  ;;  %3895 = vrot.lane.b32.xlu1 %v3894_v34, %s3926_s28 }
 0x1f8   :  { %v3736_v40 = vpop.permute.xlu1 %3735 }
 0x1f9   :  { %v3738_v43 = vunpack.i.h.bf16 %v3736_v40  ;;  %v3737_v44 = vunpack.i.l.bf16 %v3736_v40 }
 0x1fb   :  { %v1662_v53 = vsel %vm1608_vm5, %v1646_v45, %v3737_v44  ;;  %v1663_v54 = vsel %vm1608_vm5, %v1647_v18, %v3738_v43 }
 0x1fc   :  { %v1678_v55 = vsel %vm1625_vm6, %v1662_v53, %v3747_v48  ;;  %v1679_v56 = vsel %vm1625_vm6, %v1663_v54, %v3748_v47  ;;  %3890 = vrot.lane.b32.xlu0 %v3854_v27, %s3927_s27 }
 0x1fd   :  { %v1697_v37 = vpack.c.bf16 %v1679_v56, %v1678_v55 }
 0x1ff   :  { %1949 = vmatmul.bf16.gmra.mxu2 %v1697_v37  ;;  %v3781_v44 = vpop.permute.xlu2 %3780 }
 0x200   :  { %v3741_v12 = vpop.permute.xlu1 %3740  ;;  %v3783_v55 = vunpack.i.h.bf16 %v3781_v44  ;;  %v3782_v56 = vunpack.i.l.bf16 %v3781_v44 }
 0x201   :  { %v3743_v17 = vunpack.i.h.bf16 %v3741_v12  ;;  %v3742_v19 = vunpack.i.l.bf16 %v3741_v12 }
 0x202   :  { %v1940_v15 = vpop.f32.mrf.mxu2 }
 0x203   :  { %v1613_v28 = vsel %vm1608_vm5, %v1596_v21, %v3742_v19  ;;  %v1614_v27 = vsel %vm1608_vm5, %v1597_v20, %v3743_v17 }
 0x204   :  { %v1630_v29 = vsel %vm1625_vm6, %v1613_v28, %v3752_v59  ;;  %v1631_v30 = vsel %vm1625_vm6, %v1614_v27, %v3753_v22  ;;  %v1891_v31 = vpop.f32.mrf.mxu1 }
 0x205   :  { %v1696_v14 = vpack.c.bf16 %v1631_v30, %v1630_v29  ;;  %v1941_v32 = vadd.f32 %v1940_v15, %v1891_v31 }
 0x207   :  { %1900 = vmatmul.bf16.gmra.mxu1 %v1696_v14  ;;  %v1990_v8 = vadd.f32 %v1989_v9, %v1941_v32  ;;  %v3786_v20 = vpop.permute.xlu2 %3785 }
 0x208   :  { %v3788_v31 = vunpack.i.h.bf16 %v3786_v20  ;;  %v3787_v14 = vunpack.i.l.bf16 %v3786_v20 }
 0x209   :  { %v2033_v6 = vmul.f32 %v4773_v52, %v1990_v8 }
 0x20a   :  { %v1942_v33 = vpop.f32.mrf.mxu2 }
 0x20b   :  { %v2053_v2 = vadd.f32 %v4778_v1, %v2033_v6 }
 0x20c   :  { %v1893_v34 = vpop.f32.mrf.mxu1 }
 0x20d   :  { %v2069_v35 = vmax.f32 %v2053_v2, 0.0  ;;  %v1943_v38 = vadd.f32 %v1942_v33, %v1893_v34 }
 0x20f   :  { %2085 = vst.msk [vmem:[#allocation4] sm:$0xff] %vm1608_vm5, %v2069_v35  ;;  %v1992_v40 = vadd.f32 %v1991_v39, %v1943_v38  ;;  %v3791_v38 = vpop.permute.xlu2 %3790 }
 0x211   :  { %v2034_v42 = vmul.f32 %v4773_v52, %v1992_v40 }
 0x213   :  { %v2054_v43 = vadd.f32 %v4778_v1, %v2034_v42 }
 0x215   :  { %v2070_v45 = vmax.f32 %v2054_v43, 0.0 }
 0x216   :  { %v3756_v47 = vpop.permute.xlu0 %3755  ;;  %v2101_v13 = vld [vmem:[#allocation4] ss:$2 sm:$0xf]  ;;  %v2117_v17 = vld [vmem:[#allocation4 + $0x1] ss:$2 sm:$0xf] }
 0x217   :  { %2086 = vst.msk [vmem:[#allocation4 + $0x8] sm:$0xff] %vm1608_vm5, %v2070_v45  ;;  %v3758_v53 = vunpack.i.h.bf16 %v3756_v47  ;;  %v3757_v54 = vunpack.i.l.bf16 %v3756_v47  ;;  %v3792_v47 = vunpack.i.l.bf16 %v3791_v38 }
 0x218   :  { %v3766_v18 = vpop.permute.xlu1 %3765 }
 0x219   :  { %v3768_v48 = vunpack.i.h.bf16 %v3766_v18  ;;  %v3767_v49 = vunpack.i.l.bf16 %v3766_v18  ;;  %v1648_v37 = vsel %vm755_vm2, %v4578_v57, %v3757_v54  ;;  %v1649_v62 = vsel %vm755_vm2, %v4620_v41, %v3758_v53 }
 0x21a   :  { %v2132_v57 = vmax.f32 %v2101_v13, %v2117_v17  ;;  %v3793_v18 = vunpack.i.h.bf16 %v3791_v38 }
 0x21b   :  { %v1664_v7 = vsel %vm1608_vm5, %v1648_v37, %v3767_v49  ;;  %v1665_v11 = vsel %vm1608_vm5, %v1649_v62, %v3768_v48 }
 0x21c   :  { %v1680_v12 = vsel %vm1625_vm6, %v1664_v7, %v3782_v56  ;;  %v1681_v50 = vsel %vm1625_vm6, %v1665_v11, %v3783_v55  ;;  %v1071_v7 = vld [vmem:[#allocation3 + $0xa0] sm:$0xff] }
 0x21d   :  { %v1700_v19 = vpack.c.bf16 %v1681_v50, %v1680_v12 }
 0x21e   :  { %v2141_v21 = vld [vmem:[#allocation4 + $0x8] ss:$2 sm:$0xf]  ;;  %v2157_v22 = vld [vmem:[#allocation4 + $0x9] ss:$2 sm:$0xf]  ;;  %v3761_v15 = vpop.permute.xlu0 %3760 }
 0x21f   :  { %1954 = vmatmul.bf16.gmra.mxu2 %v1700_v19  ;;  %v2172_v28 = vmax.f32 %v2141_v21, %v2157_v22  ;;  %v3763_v29 = vunpack.i.h.bf16 %v3761_v15  ;;  %v3762_v30 = vunpack.i.l.bf16 %v3761_v15  ;;  %v3821_v40 = vpop.permute.xlu2 %3820 }
 0x220   :  { %v3771_v59 = vpop.permute.xlu1 %3770  ;;  %v3823_v19 = vunpack.i.h.bf16 %v3821_v40 }
 0x221   :  { %v3773_v41 = vunpack.i.h.bf16 %v3771_v59  ;;  %v3772_v27 = vunpack.i.l.bf16 %v3771_v59  ;;  %v2180_v9 = vmax.f32 %v2132_v57, %v2172_v28  ;;  %v1599_v32 = vsel %vm755_vm2, %v4580_v58, %v3763_v29 }
 0x222   :  { %v1598_v8 = vsel %vm755_vm2, %v4571_v51, %v3762_v30 }
 0x223   :  { %v1615_v6 = vsel %vm1608_vm5, %v1598_v8, %v3772_v27  ;;  %v1616_v2 = vsel %vm1608_vm5, %v1599_v32, %v3773_v41  ;;  %2189 = vst.msk [vmem:[#allocation5] sm:$0xf] %vm2188_vm7, %v2180_v9  ;;  %v1994_v41 = vpop.f32.mrf.mxu3 }
 0x224   :  { %v1632_v33 = vsel %vm1625_vm6, %v1615_v6, %v3787_v14  ;;  %v1633_v34 = vsel %vm1625_vm6, %v1616_v2, %v3788_v31 }
 0x225   :  { %v1699_v35 = vpack.c.bf16 %v1633_v34, %v1632_v33 }
 0x227   :  { %1905 = vmatmul.bf16.gmra.mxu1 %v1699_v35  ;;  %v3826_v37 = vpop.permute.xlu2 %3825 }
 0x228   :  { %v3776_v39 = vpop.permute.xlu1 %3775  ;;  %v3828_v2 = vunpack.i.h.bf16 %v3826_v37  ;;  %v3827_v38 = vunpack.i.l.bf16 %v3826_v37 }
 0x229   :  { %v3778_v51 = vunpack.i.h.bf16 %v3776_v39  ;;  %v3777_v45 = vunpack.i.l.bf16 %v3776_v39 }
 0x22f   :  { %v3841_v9 = vpop.permute.xlu2 %3840 }
 0x236   :  { %v3796_v42 = vpop.permute.xlu0 %3795 }
 0x237   :  { %v3798_v58 = vunpack.i.h.bf16 %v3796_v42  ;;  %v3797_v43 = vunpack.i.l.bf16 %v3796_v42  ;;  %v3811_v44 = vpop.permute.xlu1 %3810 }
 0x238   :  { %v3812_v17 = vunpack.i.l.bf16 %v3811_v44 }
 0x239   :  { %v1651_v48 = vsel %vm755_vm2, %v4644_v16, %v3798_v58  ;;  %v1650_v49 = vsel %vm755_vm2, %v4693_v63, %v3797_v43  ;;  %v3813_v16 = vunpack.i.h.bf16 %v3811_v44  ;;  %v3822_v63 = vunpack.i.l.bf16 %v3821_v40 }
 0x23a   :  { %v1666_v53 = vsel %vm1608_vm5, %v1650_v49, %v3777_v45  ;;  %v1667_v54 = vsel %vm1608_vm5, %v1651_v48, %v3778_v51 }
 0x23b   :  { %v1682_v55 = vsel %vm1625_vm6, %v1666_v53, %v3792_v47  ;;  %v1683_v56 = vsel %vm1625_vm6, %v1667_v54, %v3793_v18 }
 0x23c   :  { %v1703_v62 = vpack.c.bf16 %v1683_v56, %v1682_v55  ;;  %v3856_v56 = vpop.permute.xlu2 %3855 }
 0x23e   :  { %1959 = vmatmul.bf16.gmra.mxu2 %v1703_v62  ;;  %v3801_v11 = vpop.permute.xlu0 %3800  ;;  %v3843_v62 = vunpack.i.h.bf16 %v3841_v9 }
 0x23f   :  { %v3816_v12 = vpop.permute.xlu1 %3815  ;;  %v3803_v50 = vunpack.i.h.bf16 %v3801_v11  ;;  %v3802_v13 = vunpack.i.l.bf16 %v3801_v11 }
 0x240   :  { %v3818_v6 = vunpack.i.h.bf16 %v3816_v12  ;;  %v3817_v33 = vunpack.i.l.bf16 %v3816_v12 }
 0x241   :  { %v1600_v20 = vsel %vm755_vm2, %v1071_v7, %v3802_v13  ;;  %v1601_v21 = vsel %vm755_vm2, %v4680_v46, %v3803_v50  ;;  %v3842_v50 = vunpack.i.l.bf16 %v3841_v9 }
 0x242   :  { %v1945_v22 = vpop.f32.mrf.mxu2  ;;  %v1617_v59 = vsel %vm1608_vm5, %v1600_v20, %v3812_v17  ;;  %v1618_v15 = vsel %vm1608_vm5, %v1601_v21, %v3813_v16 }
 0x243   :  { %v1634_v57 = vsel %vm1625_vm6, %v1617_v59, %v3822_v63  ;;  %v1635_v28 = vsel %vm1625_vm6, %v1618_v15, %v3823_v19 }
 0x244   :  { %v1896_v27 = vpop.f32.mrf.mxu1  ;;  %v1702_v29 = vpack.c.bf16 %v1635_v28, %v1634_v57  ;;  %v3858_v28 = vunpack.i.h.bf16 %v3856_v56  ;;  %v3871_v9 = vpop.permute.xlu2 %3870 }
 0x245   :  { %v1946_v30 = vadd.f32 %v1945_v22, %v1896_v27 }
 0x246   :  { %v3806_v31 = vpop.permute.xlu0 %3805  ;;  %1910 = vmatmul.bf16.gmra.mxu1 %v1702_v29 }
 0x247   :  { %v1995_v14 = vadd.f32 %v1994_v41, %v1946_v30  ;;  %v3836_v32 = vpop.permute.xlu1 %3835  ;;  %v3808_v8 = vunpack.i.h.bf16 %v3806_v31  ;;  %v3807_v46 = vunpack.i.l.bf16 %v3806_v31  ;;  %v3857_v41 = vunpack.i.l.bf16 %v3856_v56 }
 0x248   :  { %v3838_v37 = vunpack.i.h.bf16 %v3836_v32  ;;  %v3837_v7 = vunpack.i.l.bf16 %v3836_v32 }
 0x249   :  { %v2035_v34 = vmul.f32 %v4773_v52, %v1995_v14  ;;  %v1653_v35 = vsel %vm755_vm2, %v4695_v3, %v3808_v8  ;;  %v1652_v39 = vsel %vm755_vm2, %v4646_v60, %v3807_v46  ;;  %v1996_v3 = vpop.f32.mrf.mxu3 }
 0x24a   :  { %v1669_v40 = vsel %vm1608_vm5, %v1653_v35, %v3818_v6  ;;  %v1668_v58 = vsel %vm1608_vm5, %v1652_v39, %v3817_v33  ;;  %v1947_v44 = vpop.f32.mrf.mxu2 }
 0x24b   :  { %v2055_v42 = vadd.f32 %v4778_v1, %v2035_v34  ;;  %v1685_v43 = vsel %vm1625_vm6, %v1669_v40, %v3828_v2  ;;  %v1684_v45 = vsel %vm1625_vm6, %v1668_v58, %v3827_v38 }
 0x24c   :  { %v1898_v51 = vpop.f32.mrf.mxu1  ;;  %v1706_v48 = vpack.c.bf16 %v1685_v43, %v1684_v45  ;;  %v3872_v43 = vunpack.i.l.bf16 %v3871_v9 }
 0x24d   :  { %v2071_v18 = vmax.f32 %v2055_v42, 0.0  ;;  %v1948_v47 = vadd.f32 %v1947_v44, %v1898_v51 }
 0x24e   :  { %v3831_v49 = vpop.permute.xlu0 %3830  ;;  %1964 = vmatmul.bf16.gmra.mxu2 %v1706_v48 }
 0x24f   :  { %2087 = vst.msk [vmem:[#allocation4 + $0x10] sm:$0xff] %vm1608_vm5, %v2071_v18  ;;  %v1997_v60 = vadd.f32 %v1996_v3, %v1948_v47  ;;  %v3851_v53 = vpop.permute.xlu1 %3850  ;;  %v3833_v54 = vunpack.i.h.bf16 %v3831_v49  ;;  %v3832_v55 = vunpack.i.l.bf16 %v3831_v49 }
 0x250   :  { %v3853_v57 = vunpack.i.h.bf16 %v3851_v53 }
 0x251   :  { %v2036_v11 = vmul.f32 %v4773_v52, %v1997_v60  ;;  %v1603_v12 = vsel %vm755_vm2, %v4650_v5, %v3833_v54  ;;  %v1602_v13 = vsel %vm755_vm2, %v4648_v36, %v3832_v55  ;;  %v3852_v36 = vunpack.i.l.bf16 %v3851_v53  ;;  %v3886_v60 = vpop.permute.xlu2 %3885 }
 0x252   :  { %v1620_v16 = vsel %vm1608_vm5, %v1603_v12, %v3838_v37  ;;  %v1619_v19 = vsel %vm1608_vm5, %v1602_v13, %v3837_v7  ;;  %v3888_v37 = vunpack.i.h.bf16 %v3886_v60 }
 0x253   :  { %v2056_v17 = vadd.f32 %v4778_v1, %v2036_v11  ;;  %v1637_v63 = vsel %vm1625_vm6, %v1620_v16, %v3843_v62  ;;  %v1636_v20 = vsel %vm1625_vm6, %v1619_v19, %v3842_v50  ;;  %v3887_v62 = vunpack.i.l.bf16 %v3886_v60 }
 0x254   :  { %v1705_v22 = vpack.c.bf16 %v1637_v63, %v1636_v20 }
 0x255   :  { %v2072_v21 = vmax.f32 %v2056_v17, 0.0 }
 0x256   :  { %v3846_v59 = vpop.permute.xlu0 %3845  ;;  %1915 = vmatmul.bf16.gmra.mxu1 %v1705_v22  ;;  %v2103_v46 = vld [vmem:[#allocation4 + $0x10] ss:$2 sm:$0xf]  ;;  %v2119_v6 = vld [vmem:[#allocation4 + $0x11] ss:$2 sm:$0xf] }
 0x257   :  { %2088 = vst.msk [vmem:[#allocation4 + $0x18] sm:$0xff] %vm1608_vm5, %v2072_v21  ;;  %v3848_v5 = vunpack.i.h.bf16 %v3846_v59  ;;  %v3847_v15 = vunpack.i.l.bf16 %v3846_v59  ;;  %v3866_v27 = vpop.permute.xlu1 %3865  ;;  %v2133_v38 = vmax.f32 %v2103_v46, %v2119_v6 }
 0x258   :  { %v3868_v42 = vunpack.i.h.bf16 %v3866_v27  ;;  %v3867_v58 = vunpack.i.l.bf16 %v3866_v27 }
 0x259   :  { %v1655_v29 = vsel %vm755_vm2, %v4721_v23, %v3848_v5  ;;  %v1654_v30 = vsel %vm755_vm2, %v4697_v10, %v3847_v15  ;;  %v3873_v10 = vunpack.i.h.bf16 %v3871_v9  ;;  %v3901_v63 = vpop.permute.xlu2 %3900  ;;  %v1999_v9 = vpop.f32.mrf.mxu3 }
 0x25a   :  { %v1670_v31 = vsel %vm1608_vm5, %v1654_v30, %v3852_v36  ;;  %v1671_v14 = vsel %vm1608_vm5, %v1655_v29, %v3853_v57  ;;  %v3903_v5 = vunpack.i.h.bf16 %v3901_v63  ;;  %v3902_v15 = vunpack.i.l.bf16 %v3901_v63 }
 0x25b   :  { %v1686_v32 = vsel %vm1625_vm6, %v1670_v31, %v3857_v41  ;;  %v1687_v8 = vsel %vm1625_vm6, %v1671_v14, %v3858_v28 }
 0x25c   :  { %v1709_v2 = vpack.c.bf16 %v1687_v8, %v1686_v32 }
 0x25e   :  { %v2143_v33 = vld [vmem:[#allocation4 + $0x18] ss:$2 sm:$0xf]  ;;  %v2159_v34 = vld [vmem:[#allocation4 + $0x19] ss:$2 sm:$0xf]  ;;  %v3861_v35 = vpop.permute.xlu0 %3860  ;;  %1969 = vmatmul.bf16.gmra.mxu2 %v1709_v2 }
 0x25f   :  { %v2173_v23 = vmax.f32 %v2143_v33, %v2159_v34  ;;  %v3863_v39 = vunpack.i.h.bf16 %v3861_v35  ;;  %v3862_v40 = vunpack.i.l.bf16 %v3861_v35  ;;  %v3881_v48 = vpop.permute.xlu1 %3880 }
 0x260   :  { %v3883_v56 = vunpack.i.h.bf16 %v3881_v48 }
 0x261   :  { %v1605_v44 = vsel %vm755_vm2, %v4699_v0, %v3863_v39  ;;  %v1604_v51 = vsel %vm755_vm2, %v4701_v4, %v3862_v40  ;;  %v2181_v45 = vmax.f32 %v2133_v38, %v2173_v23  ;;  %v3882_v4 = vunpack.i.l.bf16 %v3881_v48  ;;  %v2001_v33 = vpop.f32.mrf.mxu3 }
 0x262   :  { %v1621_v18 = vsel %vm1608_vm5, %v1604_v51, %v3867_v58  ;;  %v1622_v47 = vsel %vm1608_vm5, %v1605_v44, %v3868_v42 }
 0x263   :  { %v1638_v3 = vsel %vm1625_vm6, %v1621_v18, %v3872_v43  ;;  %v1639_v49 = vsel %vm1625_vm6, %v1622_v47, %v3873_v10  ;;  %2190 = vst.msk [vmem:[#allocation5 + $0x4] sm:$0xf] %vm2188_vm7, %v2181_v45 }
 0x264   :  { %v1708_v53 = vpack.c.bf16 %v1639_v49, %v1638_v3 }
 0x266   :  { %v3876_v54 = vpop.permute.xlu0 %3875  ;;  %1920 = vmatmul.bf16.gmra.mxu1 %v1708_v53 }
 0x267   :  { %v3878_v55 = vunpack.i.h.bf16 %v3876_v54  ;;  %v3877_v0 = vunpack.i.l.bf16 %v3876_v54  ;;  %v3896_v19 = vpop.permute.xlu1 %3895 }
 0x268   :  { %v3898_v59 = vunpack.i.h.bf16 %v3896_v19 }
 0x269   :  { %v1657_v7 = vsel %vm755_vm2, %v4746_v61, %v3878_v55  ;;  %v1656_v11 = vsel %vm755_vm2, %v4723_v24, %v3877_v0  ;;  %v3897_v61 = vunpack.i.l.bf16 %v3896_v19  ;;  %v2004_v45 = vpop.f32.mrf.mxu3 }
 0x26a   :  { %v1672_v12 = vsel %vm1608_vm5, %v1656_v11, %v3882_v4  ;;  %v1673_v50 = vsel %vm1608_vm5, %v1657_v7, %v3883_v56 }
 0x26b   :  { %v1688_v13 = vsel %vm1625_vm6, %v1672_v12, %v3887_v62  ;;  %v1689_v16 = vsel %vm1625_vm6, %v1673_v50, %v3888_v37 }
 0x26c   :  { %v1712_v17 = vpack.c.bf16 %v1689_v16, %v1688_v13 }
 0x26e   :  { %v3891_v20 = vpop.permute.xlu0 %3890  ;;  %1974 = vmatmul.bf16.gmra.mxu2 %v1712_v17 }
 0x26f   :  { %v3893_v21 = vunpack.i.h.bf16 %v3891_v20  ;;  %v3892_v22 = vunpack.i.l.bf16 %v3891_v20 }
 0x271   :  { %v1607_v24 = vsel %vm755_vm2, %v4727_v26, %v3893_v21  ;;  %v1606_v57 = vsel %vm755_vm2, %v4725_v25, %v3892_v22  ;;  %v2006_v0 = vpop.f32.mrf.mxu3 }
 0x272   :  { %v1623_v36 = vsel %vm1608_vm5, %v1606_v57, %v3897_v61  ;;  %v1624_v28 = vsel %vm1608_vm5, %v1607_v24, %v3898_v59 }
 0x273   :  { %v1640_v41 = vsel %vm1625_vm6, %v1623_v36, %v3902_v15  ;;  %v1641_v27 = vsel %vm1625_vm6, %v1624_v28, %v3903_v5 }
 0x274   :  { %v1711_v29 = vpack.c.bf16 %v1641_v27, %v1640_v41 }
 0x276   :  { %1925 = vmatmul.bf16.gmra.mxu1 %v1711_v29 }
 0x279   :  { %v2009_v7 = vpop.f32.mrf.mxu3 }
 0x281   :  { %v2011_v20 = vpop.f32.mrf.mxu3 }
 0x282   :  { %v1950_v30 = vpop.f32.mrf.mxu2 }
 0x284   :  { %v1901_v31 = vpop.f32.mrf.mxu1 }
 0x285   :  { %v1951_v14 = vadd.f32 %v1950_v30, %v1901_v31 }
 0x287   :  { %v2000_v32 = vadd.f32 %v1999_v9, %v1951_v14 }
 0x289   :  { %v2037_v26 = vmul.f32 %v4773_v52, %v2000_v32  ;;  %v2014_v57 = vpop.f32.mrf.mxu3 }
 0x28a   :  { %v1952_v25 = vpop.f32.mrf.mxu2 }
 0x28b   :  { %v2057_v8 = vadd.f32 %v4778_v1, %v2037_v26 }
 0x28c   :  { %v1903_v46 = vpop.f32.mrf.mxu1 }
 0x28d   :  { %v2073_v6 = vmax.f32 %v2057_v8, 0.0  ;;  %v1953_v2 = vadd.f32 %v1952_v25, %v1903_v46 }
 0x28f   :  { %2089 = vst.msk [vmem:[#allocation4 + $0x20] sm:$0xff] %vm1608_vm5, %v2073_v6  ;;  %v2002_v34 = vadd.f32 %v2001_v33, %v1953_v2 }
 0x291   :  { %v2038_v35 = vmul.f32 %v4773_v52, %v2002_v34  ;;  %v2016_v32 = vpop.f32.mrf.mxu3 }
 0x293   :  { %v2058_v38 = vadd.f32 %v4778_v1, %v2038_v35 }
 0x295   :  { %v2074_v23 = vmax.f32 %v2058_v38, 0.0 }
 0x296   :  { %v2105_v39 = vld [vmem:[#allocation4 + $0x20] ss:$2 sm:$0xf]  ;;  %v2121_v40 = vld [vmem:[#allocation4 + $0x21] ss:$2 sm:$0xf] }
 0x297   :  { %2090 = vst.msk [vmem:[#allocation4 + $0x28] sm:$0xff] %vm1608_vm5, %v2074_v23  ;;  %v2134_v58 = vmax.f32 %v2105_v39, %v2121_v40 }
 0x29e   :  { %v2145_v10 = vld [vmem:[#allocation4 + $0x28] ss:$2 sm:$0xf]  ;;  %v2161_v42 = vld [vmem:[#allocation4 + $0x29] ss:$2 sm:$0xf] }
 0x29f   :  { %v2174_v43 = vmax.f32 %v2145_v10, %v2161_v42  ;;  %v2019_v42 = vpop.f32.mrf.mxu3 }
 0x2a1   :  { %v2182_v44 = vmax.f32 %v2134_v58, %v2174_v43 }
 0x2a2   :  { %v1955_v51 = vpop.f32.mrf.mxu2 }
 0x2a3   :  { %2191 = vst.msk [vmem:[#allocation5 + $0x8] sm:$0xf] %vm2188_vm7, %v2182_v44 }
 0x2a4   :  { %v1906_v18 = vpop.f32.mrf.mxu1 }
 0x2a5   :  { %v1956_v47 = vadd.f32 %v1955_v51, %v1906_v18 }
 0x2a7   :  { %v2005_v48 = vadd.f32 %v2004_v45, %v1956_v47 }
 0x2a9   :  { %v2039_v3 = vmul.f32 %v4773_v52, %v2005_v48 }
 0x2aa   :  { %v1957_v60 = vpop.f32.mrf.mxu2 }
 0x2ab   :  { %v2059_v49 = vadd.f32 %v4778_v1, %v2039_v3  ;;  %v3594_v3 = vld [vmem:[%s5157_s7 + $0x38] sm:$0xff] }
 0x2ac   :  { %v1908_v53 = vpop.f32.mrf.mxu1  ;;  %2861 = vmatpush.bf16.msra.mxu3 %v3594_v3  ;;  %v3600_v3 = vld [vmem:[%s5157_s7 + $0x68] sm:$0xff] }
 0x2ad   :  { %v2075_v54 = vmax.f32 %v2059_v49, 0.0  ;;  %v1958_v55 = vadd.f32 %v1957_v60, %v1908_v53 }
 0x2af   :  { %2091 = vst.msk [vmem:[#allocation4 + $0x30] sm:$0xff] %vm1608_vm5, %v2075_v54  ;;  %v2007_v56 = vadd.f32 %v2006_v0, %v1958_v55  ;;  %v2021_v54 = vpop.f32.mrf.mxu3 }
 0x2b1   :  { %v2040_v4 = vmul.f32 %v4773_v52, %v2007_v56 }
 0x2b3   :  { %v2060_v37 = vadd.f32 %v4778_v1, %v2040_v4 }
 0x2b5   :  { %v2076_v62 = vmax.f32 %v2060_v37, 0.0  ;;  %v2203_v37 = vld [vmem:[#allocation5 + $0x3] sm:$0x1] }
 0x2b6   :  { %v2107_v11 = vld [vmem:[#allocation4 + $0x30] ss:$2 sm:$0xf]  ;;  %v2123_v12 = vld [vmem:[#allocation4 + $0x31] ss:$2 sm:$0xf] }
 0x2b7   :  { %2092 = vst.msk [vmem:[#allocation4 + $0x38] sm:$0xff] %vm1608_vm5, %v2076_v62  ;;  %v2135_v16 = vmax.f32 %v2107_v11, %v2123_v12  ;;  %v2199_v62 = vld [vmem:[#allocation5 + $0x1] sm:$0x1] }
 0x2be   :  { %v2147_v50 = vld [vmem:[#allocation4 + $0x38] ss:$2 sm:$0xf]  ;;  %v2163_v13 = vld [vmem:[#allocation4 + $0x39] ss:$2 sm:$0xf] }
 0x2bf   :  { %v2175_v17 = vmax.f32 %v2147_v50, %v2163_v13 }
 0x2c1   :  { %v1960_v19 = vpop.f32.mrf.mxu2  ;;  %v2183_v63 = vmax.f32 %v2135_v16, %v2175_v17 }
 0x2c3   :  { %v1911_v21 = vpop.f32.mrf.mxu1  ;;  %2192 = vst.msk [vmem:[#allocation5 + $0xc] sm:$0xf] %vm2188_vm7, %v2183_v63 }
 0x2c4   :  { %v1961_v22 = vadd.f32 %v1960_v19, %v1911_v21 }
 0x2c6   :  { %v2010_v59 = vadd.f32 %v2009_v7, %v1961_v22 }
 0x2c8   :  { %v2041_v61 = vmul.f32 %v4773_v52, %v2010_v59  ;;  %v3602_v59 = vld [vmem:[%s5157_s7 + $0x78] sm:$0xff] }
 0x2c9   :  { %v1962_v5 = vpop.f32.mrf.mxu2  ;;  %2874 = vmatpush.bf16.msra.mxu1 %v3602_v59 }
 0x2ca   :  { %v2061_v15 = vadd.f32 %v4778_v1, %v2041_v61  ;;  %v3610_v61 = vld [vmem:[%s5157_s7 + $0xb8] sm:$0xff] }
 0x2cb   :  { %v1913_v24 = vpop.f32.mrf.mxu1  ;;  %2887 = vmatpush.bf16.msra.mxu2 %v3610_v61  ;;  %v3587_v61 = vld [vmem:[%s5157_s7] sm:$0xff] }
 0x2cc   :  { %v2077_v36 = vmax.f32 %v2061_v15, 0.0  ;;  %v1963_v28 = vadd.f32 %v1962_v5, %v1913_v24  ;;  %v3593_v5 = vld [vmem:[%s5157_s7 + $0x30] sm:$0xff] }
 0x2cd   :  { %2862 = vmatpush.bf16.msra.mxu3 %v3593_v5  ;;  %v3604_v5 = vld [vmem:[%s5157_s7 + $0x88] sm:$0xff] }
 0x2ce   :  { %2093 = vst.msk [vmem:[#allocation4 + $0x40] sm:$0xff] %vm1608_vm5, %v2077_v36  ;;  %v2012_v41 = vadd.f32 %v2011_v20, %v1963_v28  ;;  %v3601_v36 = vld [vmem:[%s5157_s7 + $0x70] sm:$0xff] }
 0x2cf   :  { %v3609_v28 = vld [vmem:[%s5157_s7 + $0xb0] sm:$0xff]  ;;  %2875 = vmatpush.bf16.msra.mxu1 %v3601_v36  ;;  %v3626_v36 = vld [vmem:[%s5157_s7 + $0x138] sm:$0xff] }
 0x2d0   :  { %v2042_v27 = vmul.f32 %v4773_v52, %v2012_v41  ;;  %2888 = vmatpush.bf16.msra.mxu2 %v3609_v28  ;;  %v3617_v28 = vld [vmem:[%s5157_s7 + $0xf0] sm:$0xff] }
 0x2d1   :  { %v1965_v30 = vpop.f32.mrf.mxu2 }
 0x2d2   :  { %v2062_v29 = vadd.f32 %v4778_v1, %v2042_v27  ;;  %v3592_v27 = vld [vmem:[%s5157_s7 + $0x28] sm:$0xff] }
 0x2d3   :  { %v1916_v31 = vpop.f32.mrf.mxu1  ;;  %2863 = vmatpush.bf16.msra.mxu3 %v3592_v27  ;;  %2876 = vmatpush.bf16.msra.mxu1 %v3600_v3  ;;  %v3634_v3 = vld [vmem:[%s5157_s7 + $0x178] sm:$0xff] }
 0x2d4   :  { %v2078_v9 = vmax.f32 %v2062_v29, 0.0  ;;  %v1966_v14 = vadd.f32 %v1965_v30, %v1916_v31  ;;  %v2024_v29 = vpop.f32.mrf.mxu3 }
 0x2d5   :  { %v2109_v46 = vld [vmem:[#allocation4 + $0x40] ss:$2 sm:$0xf]  ;;  %v2125_v6 = vld [vmem:[#allocation4 + $0x41] ss:$2 sm:$0xf] }
 0x2d6   :  { %2094 = vst.msk [vmem:[#allocation4 + $0x48] sm:$0xff] %vm1608_vm5, %v2078_v9  ;;  %v2015_v26 = vadd.f32 %v2014_v57, %v1966_v14  ;;  %v2136_v23 = vmax.f32 %v2109_v46, %v2125_v6 }
 0x2d8   :  { %v2043_v8 = vmul.f32 %v4773_v52, %v2015_v26 }
 0x2d9   :  { %v1967_v25 = vpop.f32.mrf.mxu2 }
 0x2da   :  { %v2063_v2 = vadd.f32 %v4778_v1, %v2043_v8  ;;  %v2208_v8 = vld [vmem:[#allocation5 + $0x5] sm:$0x1] }
 0x2db   :  { %v1918_v33 = vpop.f32.mrf.mxu1 }
 0x2dc   :  { %v1968_v38 = vadd.f32 %v1967_v25, %v1918_v33  ;;  %v2079_v40 = vmax.f32 %v2063_v2, 0.0 }
 0x2dd   :  { %v2149_v34 = vld [vmem:[#allocation4 + $0x48] ss:$2 sm:$0xf]  ;;  %v2165_v35 = vld [vmem:[#allocation4 + $0x49] ss:$2 sm:$0xf] }
 0x2de   :  { %v2176_v39 = vmax.f32 %v2149_v34, %v2165_v35  ;;  %v2017_v10 = vadd.f32 %v2016_v32, %v1968_v38  ;;  %2095 = vst.msk [vmem:[#allocation4 + $0x50] sm:$0xff] %vm1608_vm5, %v2079_v40  ;;  %v2212_v40 = vld [vmem:[#allocation5 + $0x7] sm:$0x1] }
 0x2e0   :  { %v2184_v58 = vmax.f32 %v2136_v23, %v2176_v39  ;;  %v2044_v43 = vmul.f32 %v4773_v52, %v2017_v10  ;;  %v2026_v10 = vpop.f32.mrf.mxu3 }
 0x2e1   :  { %v1970_v44 = vpop.f32.mrf.mxu2 }
 0x2e2   :  { %2193 = vst.msk [vmem:[#allocation5 + $0x10] sm:$0xf] %vm2188_vm7, %v2184_v58  ;;  %v2064_v51 = vadd.f32 %v4778_v1, %v2044_v43 }
 0x2e3   :  { %v1921_v45 = vpop.f32.mrf.mxu1 }
 0x2e4   :  { %v2080_v18 = vmax.f32 %v2064_v51, 0.0  ;;  %v1971_v47 = vadd.f32 %v1970_v44, %v1921_v45 }
 0x2e5   :  { %v2111_v7 = vld [vmem:[#allocation4 + $0x50] ss:$2 sm:$0xf]  ;;  %v2127_v13 = vld [vmem:[#allocation4 + $0x51] ss:$2 sm:$0xf] }
 0x2e6   :  { %v2020_v48 = vadd.f32 %v2019_v42, %v1971_v47  ;;  %2096 = vst.msk [vmem:[#allocation4 + $0x58] sm:$0xff] %vm1608_vm5, %v2080_v18  ;;  %v2137_v21 = vmax.f32 %v2111_v7, %v2127_v13  ;;  %v3597_v7 = vld [vmem:[%s5157_s7 + $0x50] sm:$0xff] }
 0x2e7   :  { %v3605_v13 = vld [vmem:[%s5157_s7 + $0x90] sm:$0xff] }
 0x2e8   :  { %v2045_v49 = vmul.f32 %v4773_v52, %v2020_v48 }
 0x2e9   :  { %v2204_v60 = vld [vmem:[#allocation5 + $0x13] sm:$0x1]  ;;  %v2200_v53 = vld [vmem:[#allocation5 + $0x11] sm:$0x1]  ;;  %v1972_v55 = vpop.f32.mrf.mxu2 }
 0x2ea   :  { %v2252_v0 = vrot.slane %v2204_v60, 7  ;;  %v2240_v56 = vrot.slane %v2200_v53, 7  ;;  %v2065_v4 = vadd.f32 %v4778_v1, %v2045_v49  ;;  %v3608_v49 = vld [vmem:[%s5157_s7 + $0xa8] sm:$0xff]  ;;  %v3591_v60 = vld [vmem:[%s5157_s7 + $0x20] sm:$0xff] }
 0x2eb   :  { %v1923_v11 = vpop.f32.mrf.mxu1  ;;  %2889 = vmatpush.bf16.msra.mxu2 %v3608_v49  ;;  %2864 = vmatpush.bf16.msra.mxu3 %v3591_v60 }
 0x2ec   :  { %v2253_v12 = vsel %vm2235_vm8, %v2252_v0, %v2203_v37  ;;  %v2241_v50 = vsel %vm2235_vm8, %v2240_v56, %v2199_v62  ;;  %v2081_v16 = vmax.f32 %v2065_v4, 0.0  ;;  %v1973_v17 = vadd.f32 %v1972_v55, %v1923_v11  ;;  %v3607_v55 = vld [vmem:[%s5157_s7 + $0xa0] sm:$0xff]  ;;  %v3590_v0 = vld [vmem:[%s5157_s7 + $0x18] sm:$0xff]  ;;  %v3589_v37 = vld [vmem:[%s5157_s7 + $0x10] sm:$0xff] }
 0x2ed   :  { %2254 = vrot.lane.b32.xlu1 %v2253_v12, %s3926_s28  ;;  %2242 = vrot.lane.b32.xlu0 %v2241_v50, %s3926_s28  ;;  %v2151_v19 = vld [vmem:[#allocation4 + $0x58] ss:$2 sm:$0xf]  ;;  %v2167_v63 = vld [vmem:[#allocation4 + $0x59] ss:$2 sm:$0xf] }
 0x2ee   :  { %v2022_v20 = vadd.f32 %v2021_v54, %v1973_v17  ;;  %v2177_v22 = vmax.f32 %v2151_v19, %v2167_v63  ;;  %2097 = vst.msk [vmem:[#allocation4 + $0x60] sm:$0xff] %vm1608_vm5, %v2081_v16  ;;  %v3606_v4 = vld [vmem:[%s5157_s7 + $0x98] sm:$0xff]  ;;  %v2217_v11 = vld [vmem:[#allocation5 + $0x9] sm:$0x1] }
 0x2ef   :  { %2890 = vmatpush.bf16.msra.mxu2 %v3607_v55  ;;  %2865 = vmatpush.bf16.msra.mxu3 %v3590_v0  ;;  %v3588_v50 = vld [vmem:[%s5157_s7 + $0x8] sm:$0xff] }
 0x2f0   :  { %v2046_v15 = vmul.f32 %v4773_v52, %v2022_v20  ;;  %v2185_v57 = vmax.f32 %v2137_v21, %v2177_v22  ;;  %v3596_v63 = vld [vmem:[%s5157_s7 + $0x48] sm:$0xff] }
 0x2f1   :  { %v1975_v24 = vpop.f32.mrf.mxu2 }
 0x2f2   :  { %v2066_v41 = vadd.f32 %v4778_v1, %v2046_v15  ;;  %2194 = vst.msk [vmem:[#allocation5 + $0x14] sm:$0xf] %vm2188_vm7, %v2185_v57  ;;  %v3618_v15 = vld [vmem:[%s5157_s7 + $0xf8] sm:$0xff]  ;;  %v3595_v57 = vld [vmem:[%s5157_s7 + $0x40] sm:$0xff] }
 0x2f3   :  { %v1926_v30 = vpop.f32.mrf.mxu1  ;;  %2891 = vmatpush.bf16.msra.mxu2 %v3606_v4  ;;  %2866 = vmatpush.bf16.msra.mxu3 %v3589_v37  ;;  %v2197_v4 = vld [vmem:[#allocation5] sm:$0x1] }
 0x2f4   :  { %v2082_v9 = vmax.f32 %v2066_v41, 0.0  ;;  %v1976_v31 = vadd.f32 %v1975_v24, %v1926_v30 }
 0x2f5   :  { %v2113_v6 = vld [vmem:[#allocation4 + $0x60] ss:$2 sm:$0xf]  ;;  %v2129_v38 = vld [vmem:[#allocation4 + $0x61] ss:$2 sm:$0xf] }
 0x2f6   :  { %v2025_v14 = vadd.f32 %v2024_v29, %v1976_v31  ;;  %2098 = vst.msk [vmem:[#allocation4 + $0x68] sm:$0xff] %vm1608_vm5, %v2082_v9  ;;  %v2138_v18 = vmax.f32 %v2113_v6, %v2129_v38  ;;  %v3615_v38 = vld [vmem:[%s5157_s7 + $0xe0] sm:$0xff] }
 0x2f7   :  { %2867 = vmatpush.bf16.msra.mxu3 %v3588_v50  ;;  %2892 = vmatpush.bf16.msra.mxu2 %v3605_v13 }
 0x2f8   :  { %v2047_v32 = vmul.f32 %v4773_v52, %v2025_v14  ;;  %v2230_v14 = vld [vmem:[#allocation5 + $0xf] sm:$0x1] }
 0x2f9   :  { %v2209_v25 = vld [vmem:[#allocation5 + $0x15] sm:$0x1]  ;;  %v2213_v46 = vld [vmem:[#allocation5 + $0x17] sm:$0x1]  ;;  %v1977_v2 = vpop.f32.mrf.mxu2 }
 0x2fa   :  { %v2067_v26 = vadd.f32 %v4778_v1, %v2047_v32  ;;  %v2264_v34 = vrot.slane %v2209_v25, 7  ;;  %v2276_v35 = vrot.slane %v2213_v46, 7  ;;  %v2221_v32 = vld [vmem:[#allocation5 + $0xb] sm:$0x1] }
 0x2fb   :  { %v1928_v33 = vpop.f32.mrf.mxu1  ;;  %2868 = vmatpush.bf16.msra.mxu3 %v3587_v61  ;;  %2893 = vmatpush.bf16.msra.mxu2 %v3604_v5  ;;  %v2211_v61 = vld [vmem:[#allocation5 + $0x16] sm:$0x1]  ;;  %v3648_v5 = vld [vmem:[%s5157_s7 + $0x1e8] sm:$0xff] }
 0x2fc   :  { %v2083_v23 = vmax.f32 %v2067_v26, 0.0  ;;  %v1978_v39 = vadd.f32 %v1977_v2, %v1928_v33  ;;  %v2265_v42 = vsel %vm2235_vm8, %v2264_v34, %v2208_v8  ;;  %v2277_v58 = vsel %vm2235_vm8, %v2276_v35, %v2212_v40  ;;  %v2226_v26 = vld [vmem:[#allocation5 + $0xd] sm:$0x1]  ;;  %v3625_v2 = vld [vmem:[%s5157_s7 + $0x130] sm:$0xff]  ;;  %v3603_v33 = vld [vmem:[%s5157_s7 + $0x80] sm:$0xff] }
 0x2fd   :  { %v2153_v43 = vld [vmem:[#allocation4 + $0x68] ss:$2 sm:$0xf]  ;;  %v2169_v44 = vld [vmem:[#allocation4 + $0x69] ss:$2 sm:$0xf]  ;;  %v3904_v45 = vpack.i.bf16 %v2277_v58, %v2265_v42 }
 0x2fe   :  { %v2027_v51 = vadd.f32 %v2026_v10, %v1978_v39  ;;  %v2178_v47 = vmax.f32 %v2153_v43, %v2169_v44  ;;  %2099 = vst.msk [vmem:[#allocation4 + $0x70] sm:$0xff] %vm1608_vm5, %v2083_v23  ;;  %v3616_v34 = vld [vmem:[%s5157_s7 + $0xe8] sm:$0xff]  ;;  %v3623_v23 = vld [vmem:[%s5157_s7 + $0x120] sm:$0xff]  ;;  %v3614_v39 = vld [vmem:[%s5157_s7 + $0xd8] sm:$0xff] }
 0x2ff   :  { %3905 = vrot.lane.b32.xlu2 %v3904_v45, %s3926_s28  ;;  %2900 = vmatpush.bf16.msrb.mxu3 %v3618_v15  ;;  %v3624_v35 = vld [vmem:[%s5157_s7 + $0x128] sm:$0xff]  ;;  %v3622_v40 = vld [vmem:[%s5157_s7 + $0x118] sm:$0xff]  ;;  %v3613_v10 = vld [vmem:[%s5157_s7 + $0xd0] sm:$0xff] }
 0x300   :  { %v2048_v48 = vmul.f32 %v4773_v52, %v2027_v51  ;;  %v2186_v53 = vmax.f32 %v2138_v18, %v2178_v47  ;;  %v3599_v52 = vld [vmem:[%s5157_s7 + $0x60] sm:$0xff]  ;;  %2894 = vmatpush.bf16.msra.mxu2 %v3603_v33  ;;  %v3621_v42 = vld [vmem:[%s5157_s7 + $0x110] sm:$0xff]  ;;  %v3612_v58 = vld [vmem:[%s5157_s7 + $0xc8] sm:$0xff] }
 0x301   :  { %2877 = vmatpush.bf16.msra.mxu1 %v3599_v52  ;;  %v3620_v43 = vld [vmem:[%s5157_s7 + $0x108] sm:$0xff]  ;;  %v3611_v44 = vld [vmem:[%s5157_s7 + $0xc0] sm:$0xff]  ;;  %v2207_v45 = vld [vmem:[#allocation5 + $0x14] sm:$0x1] }
 0x302   :  { %v2068_v54 = vadd.f32 %v4778_v1, %v2048_v48  ;;  %2195 = vst.msk [vmem:[#allocation5 + $0x18] sm:$0xf] %vm2188_vm7, %v2186_v53  ;;  %v3598_v1 = vld [vmem:[%s5157_s7 + $0x58] sm:$0xff]  ;;  %v3619_v51 = vld [vmem:[%s5157_s7 + $0x100] sm:$0xff]  ;;  %v2202_v18 = vld [vmem:[#allocation5 + $0x12] sm:$0x1] }
 0x303   :  { %2901 = vmatpush.bf16.msrb.mxu3 %v3617_v28  ;;  %v2198_v47 = vld [vmem:[#allocation5 + $0x10] sm:$0x1]  ;;  %v2259_v48 = vrot.slane %v2207_v45, 7  ;;  %v2247_v60 = vrot.slane %v2202_v18, 7  ;;  %v2206_v52 = vld [vmem:[#allocation5 + $0x4] sm:$0x1] }
 0x304   :  { %v2084_v56 = vmax.f32 %v2068_v54, 0.0  ;;  %v2234_v53 = vrot.slane %v2198_v47, 7  ;;  %2926 = vmatpush.bf16.msrb.mxu2 %v3634_v3  ;;  %v3633_v54 = vld [vmem:[%s5157_s7 + $0x170] sm:$0xff]  ;;  %v3640_v15 = vld [vmem:[%s5157_s7 + $0x1a8] sm:$0xff]  ;;  %v2210_v28 = vld [vmem:[#allocation5 + $0x6] sm:$0x1] }
 0x305   :  { %2878 = vmatpush.bf16.msra.mxu1 %v3598_v1  ;;  %v2115_v16 = vld [vmem:[#allocation4 + $0x70] ss:$2 sm:$0xf]  ;;  %v2131_v17 = vld [vmem:[#allocation4 + $0x71] ss:$2 sm:$0xf]  ;;  %v2260_v0 = vsel %vm2235_vm8, %v2259_v48, %v2206_v52 }
 0x306   :  { %2100 = vst.msk [vmem:[#allocation4 + $0x78] sm:$0xff] %vm1608_vm5, %v2084_v56  ;;  %v2139_v22 = vmax.f32 %v2115_v16, %v2131_v17  ;;  %v2201_v1 = vld [vmem:[#allocation5 + $0x2] sm:$0x1]  ;;  %v3650_v16 = vld [vmem:[%s5157_s7 + $0x1f8] sm:$0xff]  ;;  %v2224_v52 = vld [vmem:[#allocation5 + $0xc] sm:$0x1] }
 0x307   :  { %2902 = vmatpush.bf16.msrb.mxu3 %v3616_v34  ;;  %v3642_v17 = vld [vmem:[%s5157_s7 + $0x1b8] sm:$0xff]  ;;  %v3643_v34 = vld [vmem:[%s5157_s7 + $0x1c0] sm:$0xff] }
 0x308   :  { %2927 = vmatpush.bf16.msrb.mxu2 %v3633_v54  ;;  %v2219_v54 = vld [vmem:[#allocation5 + $0xa] sm:$0x1] }
 0x309   :  { %v2218_v62 = vld [vmem:[#allocation5 + $0x19] sm:$0x1]  ;;  %2879 = vmatpush.bf16.msra.mxu1 %v3597_v7  ;;  %v2222_v41 = vld [vmem:[#allocation5 + $0x1b] sm:$0x1]  ;;  %v2248_v7 = vsel %vm2235_vm8, %v2247_v60, %v2201_v1  ;;  %v2216_v33 = vld [vmem:[#allocation5 + $0x18] sm:$0x1] }
 0x30a   :  { %v2288_v12 = vrot.slane %v2218_v62, 7  ;;  %v2300_v27 = vrot.slane %v2222_v41, 7  ;;  %v3647_v41 = vld [vmem:[%s5157_s7 + $0x1e0] sm:$0xff]  ;;  %v2220_v45 = vld [vmem:[#allocation5 + $0x1a] sm:$0x1] }
 0x30b   :  { %2903 = vmatpush.bf16.msrb.mxu3 %v3615_v38  ;;  %v2283_v38 = vrot.slane %v2216_v33, 7  ;;  %v2295_v3 = vrot.slane %v2220_v45, 7 }
 0x30c   :  { %v2289_v19 = vsel %vm2235_vm8, %v2288_v12, %v2217_v11  ;;  %v2301_v25 = vsel %vm2235_vm8, %v2300_v27, %v2221_v32  ;;  %v2236_v12 = vsel %vm2235_vm8, %v2234_v53, %v2197_v4  ;;  %v3639_v27 = vld [vmem:[%s5157_s7 + $0x1a0] sm:$0xff] }
 0x30d   :  { %v2155_v20 = vld [vmem:[#allocation4 + $0x78] ss:$2 sm:$0xf]  ;;  %v2171_v21 = vld [vmem:[#allocation4 + $0x79] ss:$2 sm:$0xf]  ;;  %2290 = vrot.lane.b32.xlu0 %v2289_v19, %s3926_s28  ;;  %2880 = vmatpush.bf16.msra.mxu1 %v3596_v63 }
 0x30e   :  { %v2179_v59 = vmax.f32 %v2155_v20, %v2171_v21  ;;  %v3632_v20 = vld [vmem:[%s5157_s7 + $0x168] sm:$0xff]  ;;  %v3649_v21 = vld [vmem:[%s5157_s7 + $0x1f0] sm:$0xff] }
 0x30f   :  { %2904 = vmatpush.bf16.msrb.mxu3 %v3614_v39  ;;  %2928 = vmatpush.bf16.msrb.mxu2 %v3632_v20 }
 0x310   :  { %v2187_v24 = vmax.f32 %v2139_v22, %v2179_v59  ;;  %v3641_v22 = vld [vmem:[%s5157_s7 + $0x1b0] sm:$0xff]  ;;  %v3631_v59 = vld [vmem:[%s5157_s7 + $0x160] sm:$0xff] }
 0x311   :  { %2881 = vmatpush.bf16.msra.mxu1 %v3595_v57  ;;  %v3630_v57 = vld [vmem:[%s5157_s7 + $0x158] sm:$0xff] }
 0x312   :  { %2196 = vst.msk [vmem:[#allocation5 + $0x1c] sm:$0xf] %vm2188_vm7, %v2187_v24  ;;  %v2271_v24 = vrot.slane %v2211_v61, 7 }
 0x313   :  { %2905 = vmatpush.bf16.msrb.mxu3 %v3613_v10  ;;  %2929 = vmatpush.bf16.msrb.mxu2 %v3631_v59  ;;  %v3918_v59 = vld [vmem:[%s5158_s8] ss:$0 sm:$0xff] }
 0x315   :  { %2913 = vmatpush.bf16.msrb.mxu1 %v3626_v36 }
 0x317   :  { %2906 = vmatpush.bf16.msrb.mxu3 %v3612_v58  ;;  %2930 = vmatpush.bf16.msrb.mxu2 %v3630_v57 }
 0x319   :  { %v2231_v29 = vld [vmem:[#allocation5 + $0x1f] sm:$0x1]  ;;  %v2227_v30 = vld [vmem:[#allocation5 + $0x1d] sm:$0x1]  ;;  %2914 = vmatpush.bf16.msrb.mxu1 %v3625_v2  ;;  %v3636_v2 = vld [vmem:[%s5157_s7 + $0x188] sm:$0xff] }
 0x31a   :  { %v2324_v9 = vrot.slane %v2231_v29, 7  ;;  %v2312_v31 = vrot.slane %v2227_v30, 7  ;;  %v2272_v29 = vsel %vm2235_vm8, %v2271_v24, %v2210_v28  ;;  %v3629_v30 = vld [vmem:[%s5157_s7 + $0x150] sm:$0xff]  ;;  %v2229_v58 = vld [vmem:[#allocation5 + $0x1e] sm:$0x1] }
 0x31b   :  { %2907 = vmatpush.bf16.msrb.mxu3 %v3611_v44  ;;  %2931 = vmatpush.bf16.msrb.mxu2 %v3629_v30  ;;  %v2225_v18 = vld [vmem:[#allocation5 + $0x1c] sm:$0x1] }
 0x31c   :  { %v2325_v8 = vsel %vm2235_vm8, %v2324_v9, %v2230_v14  ;;  %v2313_v46 = vsel %vm2235_vm8, %v2312_v31, %v2226_v26  ;;  %v3646_v31 = vld [vmem:[%s5157_s7 + $0x1d8] sm:$0xff]  ;;  %v3628_v26 = vld [vmem:[%s5157_s7 + $0x148] sm:$0xff] }
 0x31d   :  { %2326 = vrot.lane.b32.xlu2 %v2325_v8, %s3926_s28  ;;  %v3909_v6 = vpack.i.bf16 %v2313_v46, %v2301_v25  ;;  %2915 = vmatpush.bf16.msrb.mxu1 %v3624_v35  ;;  %v3638_v14 = vld [vmem:[%s5157_s7 + $0x198] sm:$0xff]  ;;  %v3645_v8 = vld [vmem:[%s5157_s7 + $0x1d0] sm:$0xff]  ;;  %v3627_v46 = vld [vmem:[%s5157_s7 + $0x140] sm:$0xff] }
 0x31e   :  { %v3637_v25 = vld [vmem:[%s5157_s7 + $0x190] sm:$0xff]  ;;  %v3635_v35 = vld [vmem:[%s5157_s7 + $0x180] sm:$0xff] }
 0x31f   :  { %3910 = vrot.lane.b32.xlu1 %v3909_v6, %s3926_s28  ;;  %2932 = vmatpush.bf16.msrb.mxu2 %v3628_v26  ;;  %v3644_v6 = vld [vmem:[%s5157_s7 + $0x1c8] sm:$0xff] }
 0x321   :  { %2916 = vmatpush.bf16.msrb.mxu1 %v3623_v23  ;;  %v2215_v23 = vld [vmem:[#allocation5 + $0x8] sm:$0x1] }
 0x323   :  { %2933 = vmatpush.bf16.msrb.mxu2 %v3627_v46 }
 0x325   :  { %2917 = vmatpush.bf16.msrb.mxu1 %v3622_v40  ;;  %v2284_v40 = vsel %vm2235_vm8, %v2283_v38, %v2215_v23 }
 0x329   :  { %2918 = vmatpush.bf16.msrb.mxu1 %v3621_v42 }
 0x32d   :  { %2919 = vmatpush.bf16.msrb.mxu1 %v3620_v43  ;;  %v2319_v43 = vrot.slane %v2229_v58, 7 }
 0x331   :  { %2920 = vmatpush.bf16.msrb.mxu1 %v3619_v51  ;;  %v2228_v51 = vld [vmem:[#allocation5 + $0xe] sm:$0x1] }
 0x332   :  { %v2320_v47 = vsel %vm2235_vm8, %v2319_v43, %v2228_v51 }
 0x359   :  { %v3906_v49 = vpop.permute.xlu2 %3905 }
 0x35a   :  { %v3907_v55 = vunpack.i.l.bf16 %v3906_v49  ;;  %v3908_v36 = vunpack.i.h.bf16 %v3906_v49  ;;  %v2307_v49 = vrot.slane %v2225_v18, 7 }
 0x35c   :  { %v2331_v56 = vsel %vm1608_vm5, %v2260_v0, %v3907_v55  ;;  %v2332_v9 = vsel %vm1608_vm5, %v2272_v29, %v3908_v36  ;;  %v2308_v1 = vsel %vm2235_vm8, %v2307_v49, %v2224_v52 }
 0x35d   :  { %v2339_v37 = vpack.c.bf16 %v2331_v56, %v2331_v56  ;;  %v2340_v32 = vpack.c.bf16 %v2332_v9, %v2332_v9  ;;  %v2296_v56 = vsel %vm2235_vm8, %v2295_v3, %v2219_v54 }
 0x35f   :  { %v2255_v62 = vpop.permute.xlu1 %2254  ;;  %v2243_v11 = vpop.permute.xlu0 %2242  ;;  %2895 = vmatmul.bf16.vlgmr.msra.gmra.mxu2 %v2339_v37 }
 0x360   :  { %v2330_v50 = vsel %vm1608_vm5, %v2248_v7, %v2255_v62  ;;  %v2329_v13 = vsel %vm1608_vm5, %v2236_v12, %v2243_v11 }
 0x361   :  { %v2338_v19 = vpack.c.bf16 %v2330_v50, %v2330_v50  ;;  %v2337_v63 = vpack.c.bf16 %v2329_v13, %v2329_v13 }
 0x363   :  { %2869 = vmatmul.bf16.vlgmr.msra.gmra.mxu3 %v2337_v63  ;;  %2882 = vmatmul.bf16.vlgmr.msra.gmra.mxu1 %v2338_v19 }
 0x364   :  { %2952 = vmatpush.bf16.msra.mxu1 %v3650_v16  ;;  %2939 = vmatpush.bf16.msra.mxu3 %v3642_v17 }
 0x368   :  { %2953 = vmatpush.bf16.msra.mxu1 %v3649_v21  ;;  %2940 = vmatpush.bf16.msra.mxu3 %v3641_v22  ;;  %v16_v21 = vstv %s5160_s10 }
 0x369   :  { %17 = vst [vmem:[#allocation6] sm:$0x1] %v16_v21 }
 0x36c   :  { %2954 = vmatpush.bf16.msra.mxu1 %v3648_v5  ;;  %2941 = vmatpush.bf16.msra.mxu3 %v3640_v15 }
 0x370   :  { %2955 = vmatpush.bf16.msra.mxu1 %v3647_v41  ;;  %2942 = vmatpush.bf16.msra.mxu3 %v3639_v27  ;;  %v3920_v46 = vld [vmem:[#allocation6] ss:$0 sm:$0xff] }
 0x373   :  { %2908 = vmatmul.bf16.vlgmr.msrb.gmra.mxu3 %v2340_v32 }
 0x374   :  { %2956 = vmatpush.bf16.msra.mxu1 %v3646_v31  ;;  %2943 = vmatpush.bf16.msra.mxu3 %v3638_v14  ;;  %v3919_v31 = vld [vmem:[%s5159_s9] ss:$0 sm:$0xff] }
 0x377   :  { %v2327_v44 = vpop.permute.xlu2 %2326 }
 0x378   :  { %2957 = vmatpush.bf16.msra.mxu1 %v3645_v8  ;;  %2944 = vmatpush.bf16.msra.mxu3 %v3637_v25  ;;  %v2336_v48 = vsel %vm1608_vm5, %v2320_v47, %v2327_v44 }
 0x379   :  { %v2344_v60 = vpack.c.bf16 %v2336_v48, %v2336_v48 }
 0x37c   :  { %2958 = vmatpush.bf16.msra.mxu1 %v3644_v6  ;;  %2945 = vmatpush.bf16.msra.mxu3 %v3636_v2 }
 0x37f   :  { %v2291_v39 = vpop.permute.xlu0 %2290 }
 0x380   :  { %2959 = vmatpush.bf16.msra.mxu1 %v3643_v34  ;;  %2946 = vmatpush.bf16.msra.mxu3 %v3635_v35  ;;  %v2333_v10 = vsel %vm1608_vm5, %v2284_v40, %v2291_v39 }
 0x381   :  { %v2341_v42 = vpack.c.bf16 %v2333_v10, %v2333_v10 }
 0x383   :  { %2921 = vmatmul.bf16.vlgmr.msrb.gmra.mxu1 %v2341_v42 }
 0x391   :  { %v3911_v53 = vpop.permute.xlu1 %3910 }
 0x392   :  { %v3913_v55 = vunpack.i.h.bf16 %v3911_v53  ;;  %v3912_v0 = vunpack.i.l.bf16 %v3911_v53 }
 0x393   :  { %2960 = vmatmul.bf16.vlgmr.msra.gmra.mxu1 %v2344_v60 }
 0x394   :  { %v2334_v4 = vsel %vm1608_vm5, %v2296_v56, %v3912_v0  ;;  %v2335_v37 = vsel %vm1608_vm5, %v2308_v1, %v3913_v55 }
 0x395   :  { %v2342_v62 = vpack.c.bf16 %v2334_v4, %v2334_v4  ;;  %v2343_v7 = vpack.c.bf16 %v2335_v37, %v2335_v37 }
 0x397   :  { %2934 = vmatmul.bf16.vlgmr.msrb.gmra.mxu2 %v2342_v62  ;;  %2947 = vmatmul.bf16.vlgmr.msra.gmra.mxu3 %v2343_v7 }
 0x3e0   :  { %v2883_v11 = vpop.f32.mrf.mxu1 }
 0x3e2   :  { %v2896_v12 = vpop.f32.mrf.mxu2 }
 0x3e6   :  { %v2870_v50 = vpop.f32.mrf.mxu3 }
 0x3e7   :  { %v2871_v61 = vadd.f32 %v3918_v59, %v2870_v50 }
 0x3e8   :  { %v2885_v13 = vpop.f32.mrf.mxu1 }
 0x3e9   :  { %v2884_v15 = vadd.f32 %v2883_v11, %v2871_v61 }
 0x3ea   :  { %v2898_v16 = vpop.f32.mrf.mxu2 }
 0x3eb   :  { %v2897_v24 = vadd.f32 %v2896_v12, %v2884_v15 }
 0x3ee   :  { %v2872_v17 = vpop.f32.mrf.mxu3 }
 0x3f6   :  { %v2909_v19 = vpop.f32.mrf.mxu3 }
 0x3f7   :  { %v2910_v57 = vadd.f32 %v2909_v19, %v2897_v24 }
 0x3fe   :  { %v2911_v63 = vpop.f32.mrf.mxu3 }
 0x400   :  { %v2922_v20 = vpop.f32.mrf.mxu1 }
 0x401   :  { %v2923_v28 = vadd.f32 %v2922_v20, %v2910_v57 }
 0x408   :  { %v2924_v22 = vpop.f32.mrf.mxu1 }
 0x410   :  { %v2961_v5 = vpop.f32.mrf.mxu1 }
 0x418   :  { %v2963_v36 = vpop.f32.mrf.mxu1 }
 0x41a   :  { %v2935_v41 = vpop.f32.mrf.mxu2  ;;  %v2948_v27 = vpop.f32.mrf.mxu3 }
 0x41b   :  { %v2936_v29 = vadd.f32 %v2935_v41, %v2923_v28 }
 0x41d   :  { %v2949_v30 = vadd.f32 %v2948_v27, %v2936_v29 }
 0x41f   :  { %v2962_v9 = vadd.f32 %v2961_v5, %v2949_v30 }
 0x421   :  { %v2965_v14 = vmax.f32 %v2962_v9, 0.0 }
 0x422   :  { %v2937_v32 = vpop.f32.mrf.mxu2  ;;  %v2950_v26 = vpop.f32.mrf.mxu3 }
 0x423   :  { %v2970_v8 = vmul.f32 %v3919_v31, %v2965_v14 }
 0x425   :  { %v2971_v25 = vsel %vm382_vm0, %v2970_v8, 0.0 }
 0x426   :  { %2972 = vadd.xlane.f32.xlu0 %v2971_v25 }
 0x499   :  { %v2973_v6 = vpop.xlane.xlu0 %2972 }
 0x49a   :  { %v2978_v2 = vadd.f32 %v3920_v46, %v2973_v6 }
 0x49c   :  { %2980 = vst.msk [vmem:[%s5161_s11] sm:$0x3] %vm2979_vm9, %v2978_v2 }

</bundles_post_ra>
